<compile_context>
chip_gen: v5e
topology: v5e:2x2
jax: 0.10.0
libtpu: 0.0.40
codegen_flags: <defaults>
</compile_context>

<pallas_src>
import functools

import jax
import jax.numpy as jnp
from jax import lax
from jax.experimental import pallas as pl
from jax.experimental.pallas import tpu as pltpu


def _round_up(x, m):
    return (x + m - 1) // m * m


def _full_spec(shape):
    nd = len(shape)
    return pl.BlockSpec(shape, lambda i, _nd=nd: (0,) * _nd)


# ----------------------------------------------------------------------------
# Fused kernel: n_layers LSTM over the full sequence + fc + sigmoid.
# ----------------------------------------------------------------------------
def _fused_lstm_fc_kernel(
    emb_ref,          # (T*B, E)      matmul dtype (time-major flattened embeds)
    wih0_t_ref,       # (E, 4H)       matmul dtype
    wih_rest_t_ref,   # (Lr, H, 4H)   matmul dtype, Lr = max(L-1, 1)
    whh_t_ref,        # (L, H, 4H)    matmul dtype
    b_ref,            # (L, 1, 4H)    f32   (b_ih + b_hh per layer)
    h0_ref,           # (L, B, H)     f32
    c0_ref,           # (L, B, H)     f32
    fc_wt_ref,        # (H, OP)       matmul dtype (O padded to 128 lanes)
    fc_b_ref,         # (1, OP)       f32
    hf_ref,           # out: (L, B, H) f32
    cf_ref,           # out: (L, B, H) f32
    out_ref,          # out: (B, OP)   f32
    seq_s,            # scratch (T*B or 8, H) matmul dtype (inter-layer sequence)
    xproj_s,          # scratch (T*B, 4H) f32 (hoisted input projection)
    *, n_layers, seq_len, batch, hidden_dim, time_unroll):
    T, B, H = seq_len, batch, hidden_dim
    mm_dtype = wih0_t_ref.dtype

    top_h = None
    for l in range(n_layers):            # static unroll over layers
        # ---- hoisted input projection: one big (T*B, K) x (K, 4H) MXU matmul ----
        if l == 0:
            x_in = emb_ref[...]                         # (T*B, E)  mm dtype
            w_in = wih0_t_ref[...]                      # (E, 4H)
        else:
            x_in = seq_s[...]                           # (T*B, H)  already mm dtype
            w_in = wih_rest_t_ref[l - 1]                # (H, 4H)
        xproj_s[...] = (
            jnp.dot(x_in, w_in, preferred_element_type=jnp.float32) + b_ref[l])

        # ---- serial recurrence over time; h/c carried in vregs ----
        whh_t = whh_t_ref[l]                            # (H, 4H), loaded once
        store_seq = l < n_layers - 1                    # top layer seq never read

        def step(t, carry, _store_seq=store_seq, _whh_t=whh_t):
            h_prev, c_prev = carry                      # (B, H) f32 each
            row = pl.multiple_of(t * B, B)              # sublane-aligned (B % 8 == 0)
            gates = xproj_s[pl.ds(row, B), :] + jnp.dot(
                h_prev.astype(mm_dtype), _whh_t,
                preferred_element_type=jnp.float32)     # (B, 4H) f32
            # Gate slices are whole 128-lane tiles when H % 128 == 0.
            i = jax.nn.sigmoid(gates[:, 0 * H:1 * H])
            f = jax.nn.sigmoid(gates[:, 1 * H:2 * H])
            g = jnp.tanh(gates[:, 2 * H:3 * H])
            o = jax.nn.sigmoid(gates[:, 3 * H:4 * H])
            c_new = f * c_prev + i * g
            h_new = o * jnp.tanh(c_new)
            if _store_seq:
                seq_s[pl.ds(row, B), :] = h_new.astype(mm_dtype)
            return (h_new, c_new)

        h_fin, c_fin = lax.fori_loop(0, T, step, (h0_ref[l], c0_ref[l]),
                                     unroll=time_unroll)

        # Final per-layer states written once (not per timestep).
        hf_ref[l] = h_fin
        cf_ref[l] = c_fin
        top_h = h_fin

    # ---- fc + sigmoid on the LAST timestep's top-layer hidden state only ----
    # (lstm_out[:, -1, :] == h_n[-1] for a batch_first LSTM, so this matches
    #  PyTorch's view(-1,H) -> dropout(eval) -> fc -> sigmoid -> view(B,-1)[:, -1].)
    out_ref[...] = jax.nn.sigmoid(
        jnp.dot(top_h.astype(mm_dtype), fc_wt_ref[...],
                preferred_element_type=jnp.float32) + fc_b_ref[...])


# ----------------------------------------------------------------------------
# Wrapper
# ----------------------------------------------------------------------------
def hatred_speech_lstm_forward(params, x_ids, hidden, *, n_layers, hidden_dim,
                               output_size, matmul_dtype=jnp.bfloat16):
    """x_ids: (B, T) int32;  hidden = (h0, c0), each (n_layers, B, H).

    Returns (sig_out (B,), (h_n, c_n)) matching the PyTorch module (eval mode).
    """
    B, T = x_ids.shape
    H = hidden_dim
    E = params["embedding"].shape[1]
    h0, c0 = hidden

    # Layout requirements for lane/sublane-aligned gate slices and seq stores.
    assert B % 8 == 0, f"batch must be a multiple of 8, got {B}"
    assert H % 128 == 0, f"hidden_dim must be a multiple of 128, got {H}"

    # Embedding lookup gathered TIME-MAJOR directly -> (T*B, E); the (B,T,E)
    # layout is never materialized (no HBM transpose round trip).
    ids_tm = jnp.transpose(x_ids, (1, 0)).reshape(T * B)          # (T*B,) int32
    emb_in = jnp.take(params["embedding"], ids_tm, axis=0).astype(matmul_dtype)

    # Pack / transpose weights once (bf16 matmul operands, f32 accumulation).
    wih0_t = params["w_ih_0"].T.astype(matmul_dtype)              # (E, 4H)
    if n_layers > 1:
        wih_rest_t = jnp.stack(
            [params[f"w_ih_{l}"].T for l in range(1, n_layers)], 0
        ).astype(matmul_dtype)                                    # (L-1, H, 4H)
    else:
        wih_rest_t = jnp.zeros((1, H, 4 * H), matmul_dtype)       # unused dummy
    whh_t = jnp.stack(
        [params[f"w_hh_{l}"].T for l in range(n_layers)], 0
    ).astype(matmul_dtype)                                        # (L, H, 4H)
    b = jnp.stack(
        [(params[f"b_ih_{l}"] + params[f"b_hh_{l}"]).reshape(1, 4 * H)
         for l in range(n_layers)], 0)                            # (L, 1, 4H) f32

    # fc weights padded to a lane-dense 128-wide output slab.
    OP = _round_up(max(output_size, 1), 128)
    fc_wt = (jnp.zeros((H, OP), jnp.float32)
             .at[:, :output_size].set(params["fc_w"].T)).astype(matmul_dtype)
    fc_b = jnp.zeros((1, OP), jnp.float32).at[0, :output_size].set(params["fc_b"])

    # Bounded partial unroll of the time loop (full unroll only for tiny T).
    time_unroll = T if T <= 8 else 8

    # seq_s is only read when there is a second layer.
    seq_rows = T * B if n_layers > 1 else 8
    mm_itemsize = jnp.dtype(matmul_dtype).itemsize

    # VMEM budget + cost estimate (helps XLA schedule around this long call).
    def _nbytes(a):
        return int(a.size) * a.dtype.itemsize
    in_bytes = sum(_nbytes(a) for a in
                   (emb_in, wih0_t, wih_rest_t, whh_t, b, h0, c0, fc_wt, fc_b))
    out_bytes = (2 * n_layers * B * H + B * OP) * 4
    scratch_bytes = seq_rows * H * mm_itemsize + T * B * 4 * H * 4
    vmem_needed = 2 * (in_bytes + out_bytes) + scratch_bytes
    vmem_limit = int(min(100 * 2**20, max(vmem_needed + (4 << 20), 32 << 20)))

    flops = 0
    for l in range(n_layers):
        K = E if l == 0 else H
        flops += 2 * T * B * K * 4 * H      # hoisted input projection
        flops += 2 * T * B * H * 4 * H      # recurrent matmul
    flops += 2 * B * H * OP                 # fc
    transcendentals = n_layers * T * B * 5 * H + B * OP
    cost = pl.CostEstimate(flops=flops, transcendentals=transcendentals,
                           bytes_accessed=in_bytes + out_bytes)

    kernel = functools.partial(_fused_lstm_fc_kernel, n_layers=n_layers,
                               seq_len=T, batch=B, hidden_dim=H,
                               time_unroll=time_unroll)

    hf, cf, out_pad = pl.pallas_call(
        kernel,
        out_shape=(jax.ShapeDtypeStruct((n_layers, B, H), jnp.float32),
                   jax.ShapeDtypeStruct((n_layers, B, H), jnp.float32),
                   jax.ShapeDtypeStruct((B, OP), jnp.float32)),
        grid=(1,),
        in_specs=[_full_spec(emb_in.shape),
                  _full_spec(wih0_t.shape),
                  _full_spec(wih_rest_t.shape),
                  _full_spec(whh_t.shape),
                  _full_spec(b.shape),
                  _full_spec(h0.shape),
                  _full_spec(c0.shape),
                  _full_spec(fc_wt.shape),
                  _full_spec(fc_b.shape)],
        out_specs=(_full_spec((n_layers, B, H)),
                   _full_spec((n_layers, B, H)),
                   _full_spec((B, OP))),
        scratch_shapes=[pltpu.VMEM((seq_rows, H), matmul_dtype),
                        pltpu.VMEM((T * B, 4 * H), jnp.float32)],
        compiler_params=pltpu.CompilerParams(
            dimension_semantics=("arbitrary",),
            vmem_limit_bytes=vmem_limit),
        cost_estimate=cost,
    )(emb_in, wih0_t, wih_rest_t, whh_t, b, h0, c0, fc_wt, fc_b)

    # sig(fc(h_T))[:, -1]  ==  PyTorch sig_out[:, -1]  (holds for any output_size).
    sig_out = out_pad[:, :output_size][:, -1]                     # (B,)
    return sig_out, (hf, cf)


# ----------------------------------------------------------------------------
# Params / hidden init
# ----------------------------------------------------------------------------
def init_params(key, vocab_size, embedding_dim, hidden_dim, n_layers,
                output_size):
    params = {}
    k_emb, k_lstm, k_fc = jax.random.split(key, 3)
    params["embedding"] = jax.random.normal(
        k_emb, (vocab_size, embedding_dim), jnp.float32)

    stdv = 1.0 / jnp.sqrt(jnp.float32(hidden_dim))
    lkeys = jax.random.split(k_lstm, n_layers * 4)
    for l in range(n_layers):
        in_dim = embedding_dim if l == 0 else hidden_dim
        k0, k1, k2, k3 = lkeys[4 * l:4 * l + 4]
        params[f"w_ih_{l}"] = jax.random.uniform(
            k0, (4 * hidden_dim, in_dim), jnp.float32, -stdv, stdv)
        params[f"w_hh_{l}"] = jax.random.uniform(
            k1, (4 * hidden_dim, hidden_dim), jnp.float32, -stdv, stdv)
        params[f"b_ih_{l}"] = jax.random.uniform(
            k2, (4 * hidden_dim,), jnp.float32, -stdv, stdv)
        params[f"b_hh_{l}"] = jax.random.uniform(
            k3, (4 * hidden_dim,), jnp.float32, -stdv, stdv)

    kf0, kf1 = jax.random.split(k_fc)
    fc_stdv = 1.0 / jnp.sqrt(jnp.float32(hidden_dim))
    params["fc_w"] = jax.random.uniform(
        kf0, (output_size, hidden_dim), jnp.float32, -fc_stdv, fc_stdv)
    params["fc_b"] = jax.random.uniform(
        kf1, (output_size,), jnp.float32, -fc_stdv, fc_stdv)
    return params


def init_hidden(batch_size, n_layers, hidden_dim):
    shape = (n_layers, batch_size, hidden_dim)
    return (jnp.zeros(shape, jnp.float32), jnp.zeros(shape, jnp.float32))


if __name__ == "__main__":
    # Small, module-consistent shapes (H=E=128 keeps gate slices lane-aligned,
    # B=8 keeps the flattened time-major rows sublane-aligned).
    vocab_size = 100
    output_size = 1
    embedding_dim = 128
    hidden_dim = 128
    n_layers = 2
    batch_size = 8
    seq_len = 8

    key = jax.random.PRNGKey(0)
    k_params, k_x = jax.random.split(key)

    params = init_params(k_params, vocab_size, embedding_dim, hidden_dim,
                         n_layers, output_size)
    x_ids = jax.random.randint(k_x, (batch_size, seq_len), 0, vocab_size,
                               dtype=jnp.int32)
    hidden = init_hidden(batch_size, n_layers, hidden_dim)

    sig_out, new_hidden = hatred_speech_lstm_forward(
        params, x_ids, hidden, n_layers=n_layers, hidden_dim=hidden_dim,
        output_size=output_size)

    jax.block_until_ready(sig_out)
    jax.block_until_ready(new_hidden)

    assert sig_out.shape == (batch_size,)
    assert new_hidden[0].shape == (n_layers, batch_size, hidden_dim)
    assert new_hidden[1].shape == (n_layers, batch_size, hidden_dim)
    assert bool(jnp.all(jnp.isfinite(sig_out)))
    assert bool(jnp.all((sig_out >= 0.0) & (sig_out <= 1.0)))

    print("KERNEL_OK")
</pallas_src>

<mosaic_0001>
module attributes {stable_mosaic.version = 11 : i64} {
  func.func @_fused_lstm_fc_kernel(%arg0: i32, %arg1: memref<64x128xbf16, #tpu.memory_space<vmem>>, %arg2: memref<128x512xbf16, #tpu.memory_space<vmem>>, %arg3: memref<1x128x512xbf16, #tpu.memory_space<vmem>>, %arg4: memref<2x128x512xbf16, #tpu.memory_space<vmem>>, %arg5: memref<2x1x512xf32, #tpu.memory_space<vmem>>, %arg6: memref<2x8x128xf32, #tpu.memory_space<vmem>>, %arg7: memref<2x8x128xf32, #tpu.memory_space<vmem>>, %arg8: memref<128x128xbf16, #tpu.memory_space<vmem>>, %arg9: memref<1x128xf32, #tpu.memory_space<vmem>>, %arg10: memref<2x8x128xf32, #tpu.memory_space<vmem>>, %arg11: memref<2x8x128xf32, #tpu.memory_space<vmem>>, %arg12: memref<8x128xf32, #tpu.memory_space<vmem>>, %arg13: memref<64x128xbf16, #tpu.memory_space<vmem>>, %arg14: memref<64x512xf32, #tpu.memory_space<vmem>>) attributes {dimension_semantics = [#tpu.dimension_semantics<arbitrary>], iteration_bounds = array<i64: 1>, scalar_prefetch = 0 : i64, scratch_operands = 2 : i64, tpu.core_type = #tpu.core_type<tc>, window_params = [{pipeline_mode = #tpu.pipeline_mode<synchronous>, transform_indices = @transform_0, window_bounds = array<i64: 64, 128>}, {pipeline_mode = #tpu.pipeline_mode<synchronous>, transform_indices = @transform_1, window_bounds = array<i64: 128, 512>}, {pipeline_mode = #tpu.pipeline_mode<synchronous>, transform_indices = @transform_2, window_bounds = array<i64: 1, 128, 512>}, {pipeline_mode = #tpu.pipeline_mode<synchronous>, transform_indices = @transform_3, window_bounds = array<i64: 2, 128, 512>}, {pipeline_mode = #tpu.pipeline_mode<synchronous>, transform_indices = @transform_4, window_bounds = array<i64: 2, 1, 512>}, {pipeline_mode = #tpu.pipeline_mode<synchronous>, transform_indices = @transform_5, window_bounds = array<i64: 2, 8, 128>}, {pipeline_mode = #tpu.pipeline_mode<synchronous>, transform_indices = @transform_6, window_bounds = array<i64: 2, 8, 128>}, {pipeline_mode = #tpu.pipeline_mode<synchronous>, transform_indices = @transform_7, window_bounds = array<i64: 128, 128>}, {pipeline_mode = #tpu.pipeline_mode<synchronous>, transform_indices = @transform_8, window_bounds = array<i64: 1, 128>}, {pipeline_mode = #tpu.pipeline_mode<synchronous>, transform_indices = @transform_9, window_bounds = array<i64: 2, 8, 128>}, {pipeline_mode = #tpu.pipeline_mode<synchronous>, transform_indices = @transform_10, window_bounds = array<i64: 2, 8, 128>}, {pipeline_mode = #tpu.pipeline_mode<synchronous>, transform_indices = @transform_11, window_bounds = array<i64: 8, 128>}]} {
    %c0 = arith.constant 0 : index
    %c0_0 = arith.constant 0 : index
    %0 = vector.load %arg1[%c0, %c0_0] : memref<64x128xbf16, #tpu.memory_space<vmem>>, vector<64x128xbf16>
    %c0_1 = arith.constant 0 : index
    %c0_2 = arith.constant 0 : index
    %1 = vector.load %arg2[%c0_1, %c0_2] : memref<128x512xbf16, #tpu.memory_space<vmem>>, vector<128x512xbf16>
    %cst = arith.constant dense<0.000000e+00> : vector<64x512xf32>
    %2 = tpu.matmul %0, %1, %cst {dimension_numbers = #tpu.dot_dimension_numbers<[1], [0], [0], [1], [0, 0, 1, 1], [], []>} : vector<64x128xbf16>, vector<128x512xbf16>, vector<64x512xf32> -> vector<64x512xf32>
    %c0_3 = arith.constant 0 : index
    %c0_4 = arith.constant 0 : index
    %c0_5 = arith.constant 0 : index
    %3 = vector.load %arg5[%c0_3, %c0_4, %c0_5] : memref<2x1x512xf32, #tpu.memory_space<vmem>>, vector<1x1x512xf32>
    %4 = vector.shape_cast %3 : vector<1x1x512xf32> to vector<1x512xf32>
    %5 = vector.broadcast %4 : vector<1x512xf32> to vector<64x512xf32>
    %6 = arith.addf %2, %5 : vector<64x512xf32>
    %c0_6 = arith.constant 0 : index
    %c0_7 = arith.constant 0 : index
    %7 = vector.load %arg14[%c0_6, %c0_7] : memref<64x512xf32, #tpu.memory_space<vmem>>, vector<64x512xf32>
    tpu.vector_store %arg14[%c0_6, %c0_7], %6 {strides = array<i32>} : memref<64x512xf32, #tpu.memory_space<vmem>>, vector<64x512xf32>,
    %c0_8 = arith.constant 0 : index
    %c0_9 = arith.constant 0 : index
    %c0_10 = arith.constant 0 : index
    %8 = vector.load %arg4[%c0_8, %c0_9, %c0_10] : memref<2x128x512xbf16, #tpu.memory_space<vmem>>, vector<1x128x512xbf16>
    %9 = vector.shape_cast %8 : vector<1x128x512xbf16> to vector<128x512xbf16>
    %c0_11 = arith.constant 0 : index
    %c0_12 = arith.constant 0 : index
    %c0_13 = arith.constant 0 : index
    %10 = vector.load %arg6[%c0_11, %c0_12, %c0_13] : memref<2x8x128xf32, #tpu.memory_space<vmem>>, vector<1x8x128xf32>
    %11 = vector.shape_cast %10 : vector<1x8x128xf32> to vector<8x128xf32>
    %c0_14 = arith.constant 0 : index
    %c0_15 = arith.constant 0 : index
    %c0_16 = arith.constant 0 : index
    %12 = vector.load %arg7[%c0_14, %c0_15, %c0_16] : memref<2x8x128xf32, #tpu.memory_space<vmem>>, vector<1x8x128xf32>
    %13 = vector.shape_cast %12 : vector<1x8x128xf32> to vector<8x128xf32>
    %c0_i32 = arith.constant 0 : i32
    %c8_i32 = arith.constant 8 : i32
    %14 = arith.muli %c0_i32, %c8_i32 : i32
    %15 = tpu.assume_multiple %14, 8 : i32
    %16 = arith.index_cast %15 : i32 to index
    %c0_17 = arith.constant 0 : index
    %17 = vector.load %arg14[%16, %c0_17] : memref<64x512xf32, #tpu.memory_space<vmem>>, vector<8x512xf32>
    %18 = arith.truncf %11 : vector<8x128xf32> to vector<8x128xbf16>
    %cst_18 = arith.constant dense<0.000000e+00> : vector<8x512xf32>
    %19 = tpu.matmul %18, %9, %cst_18 {dimension_numbers = #tpu.dot_dimension_numbers<[1], [0], [0], [1], [0, 0, 1, 1], [], []>} : vector<8x128xbf16>, vector<128x512xbf16>, vector<8x512xf32> -> vector<8x512xf32>
    %20 = arith.addf %17, %19 : vector<8x512xf32>
    %21 = vector.extract_strided_slice %20 {offsets = [0, 0], sizes = [8, 128], strides = [1, 1]} : vector<8x512xf32> to vector<8x128xf32>
    %22 = arith.negf %21 : vector<8x128xf32>
    %23 = math.exp %22 : vector<8x128xf32>
    %cst_19 = arith.constant 1.000000e+00 : f32
    %24 = vector.broadcast %cst_19 : f32 to vector<8x128xf32>
    %25 = arith.addf %24, %23 : vector<8x128xf32>
    %26 = arith.divf %24, %25 : vector<8x128xf32>
    %27 = vector.extract_strided_slice %20 {offsets = [0, 128], sizes = [8, 128], strides = [1, 1]} : vector<8x512xf32> to vector<8x128xf32>
    %28 = arith.negf %27 : vector<8x128xf32>
    %29 = math.exp %28 : vector<8x128xf32>
    %cst_20 = arith.constant 1.000000e+00 : f32
    %30 = vector.broadcast %cst_20 : f32 to vector<8x128xf32>
    %31 = arith.addf %30, %29 : vector<8x128xf32>
    %32 = arith.divf %30, %31 : vector<8x128xf32>
    %33 = vector.extract_strided_slice %20 {offsets = [0, 256], sizes = [8, 128], strides = [1, 1]} : vector<8x512xf32> to vector<8x128xf32>
    %34 = math.tanh %33 : vector<8x128xf32>
    %35 = vector.extract_strided_slice %20 {offsets = [0, 384], sizes = [8, 128], strides = [1, 1]} : vector<8x512xf32> to vector<8x128xf32>
    %36 = arith.negf %35 : vector<8x128xf32>
    %37 = math.exp %36 : vector<8x128xf32>
    %cst_21 = arith.constant 1.000000e+00 : f32
    %38 = vector.broadcast %cst_21 : f32 to vector<8x128xf32>
    %39 = arith.addf %38, %37 : vector<8x128xf32>
    %40 = arith.divf %38, %39 : vector<8x128xf32>
    %41 = arith.mulf %32, %13 : vector<8x128xf32>
    %42 = arith.mulf %26, %34 : vector<8x128xf32>
    %43 = arith.addf %41, %42 : vector<8x128xf32>
    %44 = math.tanh %43 : vector<8x128xf32>
    %45 = arith.mulf %40, %44 : vector<8x128xf32>
    %46 = arith.truncf %45 : vector<8x128xf32> to vector<8x128xbf16>
    %47 = arith.index_cast %15 : i32 to index
    %c0_22 = arith.constant 0 : index
    %48 = vector.load %arg13[%47, %c0_22] : memref<64x128xbf16, #tpu.memory_space<vmem>>, vector<8x128xbf16>
    tpu.vector_store %arg13[%47, %c0_22], %46 {strides = array<i32>} : memref<64x128xbf16, #tpu.memory_space<vmem>>, vector<8x128xbf16>,
    %c1_i32 = arith.constant 1 : i32
    %c8_i32_23 = arith.constant 8 : i32
    %49 = arith.muli %c1_i32, %c8_i32_23 : i32
    %50 = tpu.assume_multiple %49, 8 : i32
    %51 = arith.index_cast %50 : i32 to index
    %c0_24 = arith.constant 0 : index
    %52 = vector.load %arg14[%51, %c0_24] : memref<64x512xf32, #tpu.memory_space<vmem>>, vector<8x512xf32>
    %53 = arith.truncf %45 : vector<8x128xf32> to vector<8x128xbf16>
    %cst_25 = arith.constant dense<0.000000e+00> : vector<8x512xf32>
    %54 = tpu.matmul %53, %9, %cst_25 {dimension_numbers = #tpu.dot_dimension_numbers<[1], [0], [0], [1], [0, 0, 1, 1], [], []>} : vector<8x128xbf16>, vector<128x512xbf16>, vector<8x512xf32> -> vector<8x512xf32>
    %55 = arith.addf %52, %54 : vector<8x512xf32>
    %56 = vector.extract_strided_slice %55 {offsets = [0, 0], sizes = [8, 128], strides = [1, 1]} : vector<8x512xf32> to vector<8x128xf32>
    %57 = arith.negf %56 : vector<8x128xf32>
    %58 = math.exp %57 : vector<8x128xf32>
    %cst_26 = arith.constant 1.000000e+00 : f32
    %59 = vector.broadcast %cst_26 : f32 to vector<8x128xf32>
    %60 = arith.addf %59, %58 : vector<8x128xf32>
    %61 = arith.divf %59, %60 : vector<8x128xf32>
    %62 = vector.extract_strided_slice %55 {offsets = [0, 128], sizes = [8, 128], strides = [1, 1]} : vector<8x512xf32> to vector<8x128xf32>
    %63 = arith.negf %62 : vector<8x128xf32>
    %64 = math.exp %63 : vector<8x128xf32>
    %cst_27 = arith.constant 1.000000e+00 : f32
    %65 = vector.broadcast %cst_27 : f32 to vector<8x128xf32>
    %66 = arith.addf %65, %64 : vector<8x128xf32>
    %67 = arith.divf %65, %66 : vector<8x128xf32>
    %68 = vector.extract_strided_slice %55 {offsets = [0, 256], sizes = [8, 128], strides = [1, 1]} : vector<8x512xf32> to vector<8x128xf32>
    %69 = math.tanh %68 : vector<8x128xf32>
    %70 = vector.extract_strided_slice %55 {offsets = [0, 384], sizes = [8, 128], strides = [1, 1]} : vector<8x512xf32> to vector<8x128xf32>
    %71 = arith.negf %70 : vector<8x128xf32>
    %72 = math.exp %71 : vector<8x128xf32>
    %cst_28 = arith.constant 1.000000e+00 : f32
    %73 = vector.broadcast %cst_28 : f32 to vector<8x128xf32>
    %74 = arith.addf %73, %72 : vector<8x128xf32>
    %75 = arith.divf %73, %74 : vector<8x128xf32>
    %76 = arith.mulf %67, %43 : vector<8x128xf32>
    %77 = arith.mulf %61, %69 : vector<8x128xf32>
    %78 = arith.addf %76, %77 : vector<8x128xf32>
    %79 = math.tanh %78 : vector<8x128xf32>
    %80 = arith.mulf %75, %79 : vector<8x128xf32>
    %81 = arith.truncf %80 : vector<8x128xf32> to vector<8x128xbf16>
    %82 = arith.index_cast %50 : i32 to index
    %c0_29 = arith.constant 0 : index
    %83 = vector.load %arg13[%82, %c0_29] : memref<64x128xbf16, #tpu.memory_space<vmem>>, vector<8x128xbf16>
    tpu.vector_store %arg13[%82, %c0_29], %81 {strides = array<i32>} : memref<64x128xbf16, #tpu.memory_space<vmem>>, vector<8x128xbf16>,
    %c2_i32 = arith.constant 2 : i32
    %c8_i32_30 = arith.constant 8 : i32
    %84 = arith.muli %c2_i32, %c8_i32_30 : i32
    %85 = tpu.assume_multiple %84, 8 : i32
    %86 = arith.index_cast %85 : i32 to index
    %c0_31 = arith.constant 0 : index
    %87 = vector.load %arg14[%86, %c0_31] : memref<64x512xf32, #tpu.memory_space<vmem>>, vector<8x512xf32>
    %88 = arith.truncf %80 : vector<8x128xf32> to vector<8x128xbf16>
    %cst_32 = arith.constant dense<0.000000e+00> : vector<8x512xf32>
    %89 = tpu.matmul %88, %9, %cst_32 {dimension_numbers = #tpu.dot_dimension_numbers<[1], [0], [0], [1], [0, 0, 1, 1], [], []>} : vector<8x128xbf16>, vector<128x512xbf16>, vector<8x512xf32> -> vector<8x512xf32>
    %90 = arith.addf %87, %89 : vector<8x512xf32>
    %91 = vector.extract_strided_slice %90 {offsets = [0, 0], sizes = [8, 128], strides = [1, 1]} : vector<8x512xf32> to vector<8x128xf32>
    %92 = arith.negf %91 : vector<8x128xf32>
    %93 = math.exp %92 : vector<8x128xf32>
    %cst_33 = arith.constant 1.000000e+00 : f32
    %94 = vector.broadcast %cst_33 : f32 to vector<8x128xf32>
    %95 = arith.addf %94, %93 : vector<8x128xf32>
    %96 = arith.divf %94, %95 : vector<8x128xf32>
    %97 = vector.extract_strided_slice %90 {offsets = [0, 128], sizes = [8, 128], strides = [1, 1]} : vector<8x512xf32> to vector<8x128xf32>
    %98 = arith.negf %97 : vector<8x128xf32>
    %99 = math.exp %98 : vector<8x128xf32>
    %cst_34 = arith.constant 1.000000e+00 : f32
    %100 = vector.broadcast %cst_34 : f32 to vector<8x128xf32>
    %101 = arith.addf %100, %99 : vector<8x128xf32>
    %102 = arith.divf %100, %101 : vector<8x128xf32>
    %103 = vector.extract_strided_slice %90 {offsets = [0, 256], sizes = [8, 128], strides = [1, 1]} : vector<8x512xf32> to vector<8x128xf32>
    %104 = math.tanh %103 : vector<8x128xf32>
    %105 = vector.extract_strided_slice %90 {offsets = [0, 384], sizes = [8, 128], strides = [1, 1]} : vector<8x512xf32> to vector<8x128xf32>
    %106 = arith.negf %105 : vector<8x128xf32>
    %107 = math.exp %106 : vector<8x128xf32>
    %cst_35 = arith.constant 1.000000e+00 : f32
    %108 = vector.broadcast %cst_35 : f32 to vector<8x128xf32>
    %109 = arith.addf %108, %107 : vector<8x128xf32>
    %110 = arith.divf %108, %109 : vector<8x128xf32>
    %111 = arith.mulf %102, %78 : vector<8x128xf32>
    %112 = arith.mulf %96, %104 : vector<8x128xf32>
    %113 = arith.addf %111, %112 : vector<8x128xf32>
    %114 = math.tanh %113 : vector<8x128xf32>
    %115 = arith.mulf %110, %114 : vector<8x128xf32>
    %116 = arith.truncf %115 : vector<8x128xf32> to vector<8x128xbf16>
    %117 = arith.index_cast %85 : i32 to index
    %c0_36 = arith.constant 0 : index
    %118 = vector.load %arg13[%117, %c0_36] : memref<64x128xbf16, #tpu.memory_space<vmem>>, vector<8x128xbf16>
    tpu.vector_store %arg13[%117, %c0_36], %116 {strides = array<i32>} : memref<64x128xbf16, #tpu.memory_space<vmem>>, vector<8x128xbf16>,
    %c3_i32 = arith.constant 3 : i32
    %c8_i32_37 = arith.constant 8 : i32
    %119 = arith.muli %c3_i32, %c8_i32_37 : i32
    %120 = tpu.assume_multiple %119, 8 : i32
    %121 = arith.index_cast %120 : i32 to index
    %c0_38 = arith.constant 0 : index
    %122 = vector.load %arg14[%121, %c0_38] : memref<64x512xf32, #tpu.memory_space<vmem>>, vector<8x512xf32>
    %123 = arith.truncf %115 : vector<8x128xf32> to vector<8x128xbf16>
    %cst_39 = arith.constant dense<0.000000e+00> : vector<8x512xf32>
    %124 = tpu.matmul %123, %9, %cst_39 {dimension_numbers = #tpu.dot_dimension_numbers<[1], [0], [0], [1], [0, 0, 1, 1], [], []>} : vector<8x128xbf16>, vector<128x512xbf16>, vector<8x512xf32> -> vector<8x512xf32>
    %125 = arith.addf %122, %124 : vector<8x512xf32>
    %126 = vector.extract_strided_slice %125 {offsets = [0, 0], sizes = [8, 128], strides = [1, 1]} : vector<8x512xf32> to vector<8x128xf32>
    %127 = arith.negf %126 : vector<8x128xf32>
    %128 = math.exp %127 : vector<8x128xf32>
    %cst_40 = arith.constant 1.000000e+00 : f32
    %129 = vector.broadcast %cst_40 : f32 to vector<8x128xf32>
    %130 = arith.addf %129, %128 : vector<8x128xf32>
    %131 = arith.divf %129, %130 : vector<8x128xf32>
    %132 = vector.extract_strided_slice %125 {offsets = [0, 128], sizes = [8, 128], strides = [1, 1]} : vector<8x512xf32> to vector<8x128xf32>
    %133 = arith.negf %132 : vector<8x128xf32>
    %134 = math.exp %133 : vector<8x128xf32>
    %cst_41 = arith.constant 1.000000e+00 : f32
    %135 = vector.broadcast %cst_41 : f32 to vector<8x128xf32>
    %136 = arith.addf %135, %134 : vector<8x128xf32>
    %137 = arith.divf %135, %136 : vector<8x128xf32>
    %138 = vector.extract_strided_slice %125 {offsets = [0, 256], sizes = [8, 128], strides = [1, 1]} : vector<8x512xf32> to vector<8x128xf32>
    %139 = math.tanh %138 : vector<8x128xf32>
    %140 = vector.extract_strided_slice %125 {offsets = [0, 384], sizes = [8, 128], strides = [1, 1]} : vector<8x512xf32> to vector<8x128xf32>
    %141 = arith.negf %140 : vector<8x128xf32>
    %142 = math.exp %141 : vector<8x128xf32>
    %cst_42 = arith.constant 1.000000e+00 : f32
    %143 = vector.broadcast %cst_42 : f32 to vector<8x128xf32>
    %144 = arith.addf %143, %142 : vector<8x128xf32>
    %145 = arith.divf %143, %144 : vector<8x128xf32>
    %146 = arith.mulf %137, %113 : vector<8x128xf32>
    %147 = arith.mulf %131, %139 : vector<8x128xf32>
    %148 = arith.addf %146, %147 : vector<8x128xf32>
    %149 = math.tanh %148 : vector<8x128xf32>
    %150 = arith.mulf %145, %149 : vector<8x128xf32>
    %151 = arith.truncf %150 : vector<8x128xf32> to vector<8x128xbf16>
    %152 = arith.index_cast %120 : i32 to index
    %c0_43 = arith.constant 0 : index
    %153 = vector.load %arg13[%152, %c0_43] : memref<64x128xbf16, #tpu.memory_space<vmem>>, vector<8x128xbf16>
    tpu.vector_store %arg13[%152, %c0_43], %151 {strides = array<i32>} : memref<64x128xbf16, #tpu.memory_space<vmem>>, vector<8x128xbf16>,
    %c4_i32 = arith.constant 4 : i32
    %c8_i32_44 = arith.constant 8 : i32
    %154 = arith.muli %c4_i32, %c8_i32_44 : i32
    %155 = tpu.assume_multiple %154, 8 : i32
    %156 = arith.index_cast %155 : i32 to index
    %c0_45 = arith.constant 0 : index
    %157 = vector.load %arg14[%156, %c0_45] : memref<64x512xf32, #tpu.memory_space<vmem>>, vector<8x512xf32>
    %158 = arith.truncf %150 : vector<8x128xf32> to vector<8x128xbf16>
    %cst_46 = arith.constant dense<0.000000e+00> : vector<8x512xf32>
    %159 = tpu.matmul %158, %9, %cst_46 {dimension_numbers = #tpu.dot_dimension_numbers<[1], [0], [0], [1], [0, 0, 1, 1], [], []>} : vector<8x128xbf16>, vector<128x512xbf16>, vector<8x512xf32> -> vector<8x512xf32>
    %160 = arith.addf %157, %159 : vector<8x512xf32>
    %161 = vector.extract_strided_slice %160 {offsets = [0, 0], sizes = [8, 128], strides = [1, 1]} : vector<8x512xf32> to vector<8x128xf32>
    %162 = arith.negf %161 : vector<8x128xf32>
    %163 = math.exp %162 : vector<8x128xf32>
    %cst_47 = arith.constant 1.000000e+00 : f32
    %164 = vector.broadcast %cst_47 : f32 to vector<8x128xf32>
    %165 = arith.addf %164, %163 : vector<8x128xf32>
    %166 = arith.divf %164, %165 : vector<8x128xf32>
    %167 = vector.extract_strided_slice %160 {offsets = [0, 128], sizes = [8, 128], strides = [1, 1]} : vector<8x512xf32> to vector<8x128xf32>
    %168 = arith.negf %167 : vector<8x128xf32>
    %169 = math.exp %168 : vector<8x128xf32>
    %cst_48 = arith.constant 1.000000e+00 : f32
    %170 = vector.broadcast %cst_48 : f32 to vector<8x128xf32>
    %171 = arith.addf %170, %169 : vector<8x128xf32>
    %172 = arith.divf %170, %171 : vector<8x128xf32>
    %173 = vector.extract_strided_slice %160 {offsets = [0, 256], sizes = [8, 128], strides = [1, 1]} : vector<8x512xf32> to vector<8x128xf32>
    %174 = math.tanh %173 : vector<8x128xf32>
    %175 = vector.extract_strided_slice %160 {offsets = [0, 384], sizes = [8, 128], strides = [1, 1]} : vector<8x512xf32> to vector<8x128xf32>
    %176 = arith.negf %175 : vector<8x128xf32>
    %177 = math.exp %176 : vector<8x128xf32>
    %cst_49 = arith.constant 1.000000e+00 : f32
    %178 = vector.broadcast %cst_49 : f32 to vector<8x128xf32>
    %179 = arith.addf %178, %177 : vector<8x128xf32>
    %180 = arith.divf %178, %179 : vector<8x128xf32>
    %181 = arith.mulf %172, %148 : vector<8x128xf32>
    %182 = arith.mulf %166, %174 : vector<8x128xf32>
    %183 = arith.addf %181, %182 : vector<8x128xf32>
    %184 = math.tanh %183 : vector<8x128xf32>
    %185 = arith.mulf %180, %184 : vector<8x128xf32>
    %186 = arith.truncf %185 : vector<8x128xf32> to vector<8x128xbf16>
    %187 = arith.index_cast %155 : i32 to index
    %c0_50 = arith.constant 0 : index
    %188 = vector.load %arg13[%187, %c0_50] : memref<64x128xbf16, #tpu.memory_space<vmem>>, vector<8x128xbf16>
    tpu.vector_store %arg13[%187, %c0_50], %186 {strides = array<i32>} : memref<64x128xbf16, #tpu.memory_space<vmem>>, vector<8x128xbf16>,
    %c5_i32 = arith.constant 5 : i32
    %c8_i32_51 = arith.constant 8 : i32
    %189 = arith.muli %c5_i32, %c8_i32_51 : i32
    %190 = tpu.assume_multiple %189, 8 : i32
    %191 = arith.index_cast %190 : i32 to index
    %c0_52 = arith.constant 0 : index
    %192 = vector.load %arg14[%191, %c0_52] : memref<64x512xf32, #tpu.memory_space<vmem>>, vector<8x512xf32>
    %193 = arith.truncf %185 : vector<8x128xf32> to vector<8x128xbf16>
    %cst_53 = arith.constant dense<0.000000e+00> : vector<8x512xf32>
    %194 = tpu.matmul %193, %9, %cst_53 {dimension_numbers = #tpu.dot_dimension_numbers<[1], [0], [0], [1], [0, 0, 1, 1], [], []>} : vector<8x128xbf16>, vector<128x512xbf16>, vector<8x512xf32> -> vector<8x512xf32>
    %195 = arith.addf %192, %194 : vector<8x512xf32>
    %196 = vector.extract_strided_slice %195 {offsets = [0, 0], sizes = [8, 128], strides = [1, 1]} : vector<8x512xf32> to vector<8x128xf32>
    %197 = arith.negf %196 : vector<8x128xf32>
    %198 = math.exp %197 : vector<8x128xf32>
    %cst_54 = arith.constant 1.000000e+00 : f32
    %199 = vector.broadcast %cst_54 : f32 to vector<8x128xf32>
    %200 = arith.addf %199, %198 : vector<8x128xf32>
    %201 = arith.divf %199, %200 : vector<8x128xf32>
    %202 = vector.extract_strided_slice %195 {offsets = [0, 128], sizes = [8, 128], strides = [1, 1]} : vector<8x512xf32> to vector<8x128xf32>
    %203 = arith.negf %202 : vector<8x128xf32>
    %204 = math.exp %203 : vector<8x128xf32>
    %cst_55 = arith.constant 1.000000e+00 : f32
    %205 = vector.broadcast %cst_55 : f32 to vector<8x128xf32>
    %206 = arith.addf %205, %204 : vector<8x128xf32>
    %207 = arith.divf %205, %206 : vector<8x128xf32>
    %208 = vector.extract_strided_slice %195 {offsets = [0, 256], sizes = [8, 128], strides = [1, 1]} : vector<8x512xf32> to vector<8x128xf32>
    %209 = math.tanh %208 : vector<8x128xf32>
    %210 = vector.extract_strided_slice %195 {offsets = [0, 384], sizes = [8, 128], strides = [1, 1]} : vector<8x512xf32> to vector<8x128xf32>
    %211 = arith.negf %210 : vector<8x128xf32>
    %212 = math.exp %211 : vector<8x128xf32>
    %cst_56 = arith.constant 1.000000e+00 : f32
    %213 = vector.broadcast %cst_56 : f32 to vector<8x128xf32>
    %214 = arith.addf %213, %212 : vector<8x128xf32>
    %215 = arith.divf %213, %214 : vector<8x128xf32>
    %216 = arith.mulf %207, %183 : vector<8x128xf32>
    %217 = arith.mulf %201, %209 : vector<8x128xf32>
    %218 = arith.addf %216, %217 : vector<8x128xf32>
    %219 = math.tanh %218 : vector<8x128xf32>
    %220 = arith.mulf %215, %219 : vector<8x128xf32>
    %221 = arith.truncf %220 : vector<8x128xf32> to vector<8x128xbf16>
    %222 = arith.index_cast %190 : i32 to index
    %c0_57 = arith.constant 0 : index
    %223 = vector.load %arg13[%222, %c0_57] : memref<64x128xbf16, #tpu.memory_space<vmem>>, vector<8x128xbf16>
    tpu.vector_store %arg13[%222, %c0_57], %221 {strides = array<i32>} : memref<64x128xbf16, #tpu.memory_space<vmem>>, vector<8x128xbf16>,
    %c6_i32 = arith.constant 6 : i32
    %c8_i32_58 = arith.constant 8 : i32
    %224 = arith.muli %c6_i32, %c8_i32_58 : i32
    %225 = tpu.assume_multiple %224, 8 : i32
    %226 = arith.index_cast %225 : i32 to index
    %c0_59 = arith.constant 0 : index
    %227 = vector.load %arg14[%226, %c0_59] : memref<64x512xf32, #tpu.memory_space<vmem>>, vector<8x512xf32>
    %228 = arith.truncf %220 : vector<8x128xf32> to vector<8x128xbf16>
    %cst_60 = arith.constant dense<0.000000e+00> : vector<8x512xf32>
    %229 = tpu.matmul %228, %9, %cst_60 {dimension_numbers = #tpu.dot_dimension_numbers<[1], [0], [0], [1], [0, 0, 1, 1], [], []>} : vector<8x128xbf16>, vector<128x512xbf16>, vector<8x512xf32> -> vector<8x512xf32>
    %230 = arith.addf %227, %229 : vector<8x512xf32>
    %231 = vector.extract_strided_slice %230 {offsets = [0, 0], sizes = [8, 128], strides = [1, 1]} : vector<8x512xf32> to vector<8x128xf32>
    %232 = arith.negf %231 : vector<8x128xf32>
    %233 = math.exp %232 : vector<8x128xf32>
    %cst_61 = arith.constant 1.000000e+00 : f32
    %234 = vector.broadcast %cst_61 : f32 to vector<8x128xf32>
    %235 = arith.addf %234, %233 : vector<8x128xf32>
    %236 = arith.divf %234, %235 : vector<8x128xf32>
    %237 = vector.extract_strided_slice %230 {offsets = [0, 128], sizes = [8, 128], strides = [1, 1]} : vector<8x512xf32> to vector<8x128xf32>
    %238 = arith.negf %237 : vector<8x128xf32>
    %239 = math.exp %238 : vector<8x128xf32>
    %cst_62 = arith.constant 1.000000e+00 : f32
    %240 = vector.broadcast %cst_62 : f32 to vector<8x128xf32>
    %241 = arith.addf %240, %239 : vector<8x128xf32>
    %242 = arith.divf %240, %241 : vector<8x128xf32>
    %243 = vector.extract_strided_slice %230 {offsets = [0, 256], sizes = [8, 128], strides = [1, 1]} : vector<8x512xf32> to vector<8x128xf32>
    %244 = math.tanh %243 : vector<8x128xf32>
    %245 = vector.extract_strided_slice %230 {offsets = [0, 384], sizes = [8, 128], strides = [1, 1]} : vector<8x512xf32> to vector<8x128xf32>
    %246 = arith.negf %245 : vector<8x128xf32>
    %247 = math.exp %246 : vector<8x128xf32>
    %cst_63 = arith.constant 1.000000e+00 : f32
    %248 = vector.broadcast %cst_63 : f32 to vector<8x128xf32>
    %249 = arith.addf %248, %247 : vector<8x128xf32>
    %250 = arith.divf %248, %249 : vector<8x128xf32>
    %251 = arith.mulf %242, %218 : vector<8x128xf32>
    %252 = arith.mulf %236, %244 : vector<8x128xf32>
    %253 = arith.addf %251, %252 : vector<8x128xf32>
    %254 = math.tanh %253 : vector<8x128xf32>
    %255 = arith.mulf %250, %254 : vector<8x128xf32>
    %256 = arith.truncf %255 : vector<8x128xf32> to vector<8x128xbf16>
    %257 = arith.index_cast %225 : i32 to index
    %c0_64 = arith.constant 0 : index
    %258 = vector.load %arg13[%257, %c0_64] : memref<64x128xbf16, #tpu.memory_space<vmem>>, vector<8x128xbf16>
    tpu.vector_store %arg13[%257, %c0_64], %256 {strides = array<i32>} : memref<64x128xbf16, #tpu.memory_space<vmem>>, vector<8x128xbf16>,
    %c7_i32 = arith.constant 7 : i32
    %c8_i32_65 = arith.constant 8 : i32
    %259 = arith.muli %c7_i32, %c8_i32_65 : i32
    %260 = tpu.assume_multiple %259, 8 : i32
    %261 = arith.index_cast %260 : i32 to index
    %c0_66 = arith.constant 0 : index
    %262 = vector.load %arg14[%261, %c0_66] : memref<64x512xf32, #tpu.memory_space<vmem>>, vector<8x512xf32>
    %263 = arith.truncf %255 : vector<8x128xf32> to vector<8x128xbf16>
    %cst_67 = arith.constant dense<0.000000e+00> : vector<8x512xf32>
    %264 = tpu.matmul %263, %9, %cst_67 {dimension_numbers = #tpu.dot_dimension_numbers<[1], [0], [0], [1], [0, 0, 1, 1], [], []>} : vector<8x128xbf16>, vector<128x512xbf16>, vector<8x512xf32> -> vector<8x512xf32>
    %265 = arith.addf %262, %264 : vector<8x512xf32>
    %266 = vector.extract_strided_slice %265 {offsets = [0, 0], sizes = [8, 128], strides = [1, 1]} : vector<8x512xf32> to vector<8x128xf32>
    %267 = arith.negf %266 : vector<8x128xf32>
    %268 = math.exp %267 : vector<8x128xf32>
    %cst_68 = arith.constant 1.000000e+00 : f32
    %269 = vector.broadcast %cst_68 : f32 to vector<8x128xf32>
    %270 = arith.addf %269, %268 : vector<8x128xf32>
    %271 = arith.divf %269, %270 : vector<8x128xf32>
    %272 = vector.extract_strided_slice %265 {offsets = [0, 128], sizes = [8, 128], strides = [1, 1]} : vector<8x512xf32> to vector<8x128xf32>
    %273 = arith.negf %272 : vector<8x128xf32>
    %274 = math.exp %273 : vector<8x128xf32>
    %cst_69 = arith.constant 1.000000e+00 : f32
    %275 = vector.broadcast %cst_69 : f32 to vector<8x128xf32>
    %276 = arith.addf %275, %274 : vector<8x128xf32>
    %277 = arith.divf %275, %276 : vector<8x128xf32>
    %278 = vector.extract_strided_slice %265 {offsets = [0, 256], sizes = [8, 128], strides = [1, 1]} : vector<8x512xf32> to vector<8x128xf32>
    %279 = math.tanh %278 : vector<8x128xf32>
    %280 = vector.extract_strided_slice %265 {offsets = [0, 384], sizes = [8, 128], strides = [1, 1]} : vector<8x512xf32> to vector<8x128xf32>
    %281 = arith.negf %280 : vector<8x128xf32>
    %282 = math.exp %281 : vector<8x128xf32>
    %cst_70 = arith.constant 1.000000e+00 : f32
    %283 = vector.broadcast %cst_70 : f32 to vector<8x128xf32>
    %284 = arith.addf %283, %282 : vector<8x128xf32>
    %285 = arith.divf %283, %284 : vector<8x128xf32>
    %286 = arith.mulf %277, %253 : vector<8x128xf32>
    %287 = arith.mulf %271, %279 : vector<8x128xf32>
    %288 = arith.addf %286, %287 : vector<8x128xf32>
    %289 = math.tanh %288 : vector<8x128xf32>
    %290 = arith.mulf %285, %289 : vector<8x128xf32>
    %291 = arith.truncf %290 : vector<8x128xf32> to vector<8x128xbf16>
    %292 = arith.index_cast %260 : i32 to index
    %c0_71 = arith.constant 0 : index
    %293 = vector.load %arg13[%292, %c0_71] : memref<64x128xbf16, #tpu.memory_space<vmem>>, vector<8x128xbf16>
    tpu.vector_store %arg13[%292, %c0_71], %291 {strides = array<i32>} : memref<64x128xbf16, #tpu.memory_space<vmem>>, vector<8x128xbf16>,
    %c8_i32_72 = arith.constant 8 : i32
    %c0_73 = arith.constant 0 : index
    %c0_74 = arith.constant 0 : index
    %c0_75 = arith.constant 0 : index
    %294 = vector.load %arg10[%c0_73, %c0_74, %c0_75] : memref<2x8x128xf32, #tpu.memory_space<vmem>>, vector<1x8x128xf32>
    %295 = vector.shape_cast %294 : vector<1x8x128xf32> to vector<8x128xf32>
    %296 = vector.shape_cast %290 : vector<8x128xf32> to vector<1x8x128xf32>
    tpu.vector_store %arg10[%c0_73, %c0_74, %c0_75], %296 {strides = array<i32>} : memref<2x8x128xf32, #tpu.memory_space<vmem>>, vector<1x8x128xf32>,
    %c0_76 = arith.constant 0 : index
    %c0_77 = arith.constant 0 : index
    %c0_78 = arith.constant 0 : index
    %297 = vector.load %arg11[%c0_76, %c0_77, %c0_78] : memref<2x8x128xf32, #tpu.memory_space<vmem>>, vector<1x8x128xf32>
    %298 = vector.shape_cast %297 : vector<1x8x128xf32> to vector<8x128xf32>
    %299 = vector.shape_cast %288 : vector<8x128xf32> to vector<1x8x128xf32>
    tpu.vector_store %arg11[%c0_76, %c0_77, %c0_78], %299 {strides = array<i32>} : memref<2x8x128xf32, #tpu.memory_space<vmem>>, vector<1x8x128xf32>,
    %c0_79 = arith.constant 0 : index
    %c0_80 = arith.constant 0 : index
    %300 = vector.load %arg13[%c0_79, %c0_80] : memref<64x128xbf16, #tpu.memory_space<vmem>>, vector<64x128xbf16>
    %c0_81 = arith.constant 0 : index
    %c0_82 = arith.constant 0 : index
    %c0_83 = arith.constant 0 : index
    %301 = vector.load %arg3[%c0_81, %c0_82, %c0_83] : memref<1x128x512xbf16, #tpu.memory_space<vmem>>, vector<1x128x512xbf16>
    %302 = vector.shape_cast %301 : vector<1x128x512xbf16> to vector<128x512xbf16>
    %cst_84 = arith.constant dense<0.000000e+00> : vector<64x512xf32>
    %303 = tpu.matmul %300, %302, %cst_84 {dimension_numbers = #tpu.dot_dimension_numbers<[1], [0], [0], [1], [0, 0, 1, 1], [], []>} : vector<64x128xbf16>, vector<128x512xbf16>, vector<64x512xf32> -> vector<64x512xf32>
    %c1 = arith.constant 1 : index
    %c0_85 = arith.constant 0 : index
    %c0_86 = arith.constant 0 : index
    %304 = vector.load %arg5[%c1, %c0_85, %c0_86] : memref<2x1x512xf32, #tpu.memory_space<vmem>>, vector<1x1x512xf32>
    %305 = vector.shape_cast %304 : vector<1x1x512xf32> to vector<1x512xf32>
    %306 = vector.broadcast %305 : vector<1x512xf32> to vector<64x512xf32>
    %307 = arith.addf %303, %306 : vector<64x512xf32>
    %c0_87 = arith.constant 0 : index
    %c0_88 = arith.constant 0 : index
    %308 = vector.load %arg14[%c0_87, %c0_88] : memref<64x512xf32, #tpu.memory_space<vmem>>, vector<64x512xf32>
    tpu.vector_store %arg14[%c0_87, %c0_88], %307 {strides = array<i32>} : memref<64x512xf32, #tpu.memory_space<vmem>>, vector<64x512xf32>,
    %c1_89 = arith.constant 1 : index
    %c0_90 = arith.constant 0 : index
    %c0_91 = arith.constant 0 : index
    %309 = vector.load %arg4[%c1_89, %c0_90, %c0_91] : memref<2x128x512xbf16, #tpu.memory_space<vmem>>, vector<1x128x512xbf16>
    %310 = vector.shape_cast %309 : vector<1x128x512xbf16> to vector<128x512xbf16>
    %c1_92 = arith.constant 1 : index
    %c0_93 = arith.constant 0 : index
    %c0_94 = arith.constant 0 : index
    %311 = vector.load %arg6[%c1_92, %c0_93, %c0_94] : memref<2x8x128xf32, #tpu.memory_space<vmem>>, vector<1x8x128xf32>
    %312 = vector.shape_cast %311 : vector<1x8x128xf32> to vector<8x128xf32>
    %c1_95 = arith.constant 1 : index
    %c0_96 = arith.constant 0 : index
    %c0_97 = arith.constant 0 : index
    %313 = vector.load %arg7[%c1_95, %c0_96, %c0_97] : memref<2x8x128xf32, #tpu.memory_space<vmem>>, vector<1x8x128xf32>
    %314 = vector.shape_cast %313 : vector<1x8x128xf32> to vector<8x128xf32>
    %c0_i32_98 = arith.constant 0 : i32
    %c8_i32_99 = arith.constant 8 : i32
    %315 = arith.muli %c0_i32_98, %c8_i32_99 : i32
    %316 = tpu.assume_multiple %315, 8 : i32
    %317 = arith.index_cast %316 : i32 to index
    %c0_100 = arith.constant 0 : index
    %318 = vector.load %arg14[%317, %c0_100] : memref<64x512xf32, #tpu.memory_space<vmem>>, vector<8x512xf32>
    %319 = arith.truncf %312 : vector<8x128xf32> to vector<8x128xbf16>
    %cst_101 = arith.constant dense<0.000000e+00> : vector<8x512xf32>
    %320 = tpu.matmul %319, %310, %cst_101 {dimension_numbers = #tpu.dot_dimension_numbers<[1], [0], [0], [1], [0, 0, 1, 1], [], []>} : vector<8x128xbf16>, vector<128x512xbf16>, vector<8x512xf32> -> vector<8x512xf32>
    %321 = arith.addf %318, %320 : vector<8x512xf32>
    %322 = vector.extract_strided_slice %321 {offsets = [0, 0], sizes = [8, 128], strides = [1, 1]} : vector<8x512xf32> to vector<8x128xf32>
    %323 = arith.negf %322 : vector<8x128xf32>
    %324 = math.exp %323 : vector<8x128xf32>
    %cst_102 = arith.constant 1.000000e+00 : f32
    %325 = vector.broadcast %cst_102 : f32 to vector<8x128xf32>
    %326 = arith.addf %325, %324 : vector<8x128xf32>
    %327 = arith.divf %325, %326 : vector<8x128xf32>
    %328 = vector.extract_strided_slice %321 {offsets = [0, 128], sizes = [8, 128], strides = [1, 1]} : vector<8x512xf32> to vector<8x128xf32>
    %329 = arith.negf %328 : vector<8x128xf32>
    %330 = math.exp %329 : vector<8x128xf32>
    %cst_103 = arith.constant 1.000000e+00 : f32
    %331 = vector.broadcast %cst_103 : f32 to vector<8x128xf32>
    %332 = arith.addf %331, %330 : vector<8x128xf32>
    %333 = arith.divf %331, %332 : vector<8x128xf32>
    %334 = vector.extract_strided_slice %321 {offsets = [0, 256], sizes = [8, 128], strides = [1, 1]} : vector<8x512xf32> to vector<8x128xf32>
    %335 = math.tanh %334 : vector<8x128xf32>
    %336 = vector.extract_strided_slice %321 {offsets = [0, 384], sizes = [8, 128], strides = [1, 1]} : vector<8x512xf32> to vector<8x128xf32>
    %337 = arith.negf %336 : vector<8x128xf32>
    %338 = math.exp %337 : vector<8x128xf32>
    %cst_104 = arith.constant 1.000000e+00 : f32
    %339 = vector.broadcast %cst_104 : f32 to vector<8x128xf32>
    %340 = arith.addf %339, %338 : vector<8x128xf32>
    %341 = arith.divf %339, %340 : vector<8x128xf32>
    %342 = arith.mulf %333, %314 : vector<8x128xf32>
    %343 = arith.mulf %327, %335 : vector<8x128xf32>
    %344 = arith.addf %342, %343 : vector<8x128xf32>
    %345 = math.tanh %344 : vector<8x128xf32>
    %346 = arith.mulf %341, %345 : vector<8x128xf32>
    %c1_i32_105 = arith.constant 1 : i32
    %c8_i32_106 = arith.constant 8 : i32
    %347 = arith.muli %c1_i32_105, %c8_i32_106 : i32
    %348 = tpu.assume_multiple %347, 8 : i32
    %349 = arith.index_cast %348 : i32 to index
    %c0_107 = arith.constant 0 : index
    %350 = vector.load %arg14[%349, %c0_107] : memref<64x512xf32, #tpu.memory_space<vmem>>, vector<8x512xf32>
    %351 = arith.truncf %346 : vector<8x128xf32> to vector<8x128xbf16>
    %cst_108 = arith.constant dense<0.000000e+00> : vector<8x512xf32>
    %352 = tpu.matmul %351, %310, %cst_108 {dimension_numbers = #tpu.dot_dimension_numbers<[1], [0], [0], [1], [0, 0, 1, 1], [], []>} : vector<8x128xbf16>, vector<128x512xbf16>, vector<8x512xf32> -> vector<8x512xf32>
    %353 = arith.addf %350, %352 : vector<8x512xf32>
    %354 = vector.extract_strided_slice %353 {offsets = [0, 0], sizes = [8, 128], strides = [1, 1]} : vector<8x512xf32> to vector<8x128xf32>
    %355 = arith.negf %354 : vector<8x128xf32>
    %356 = math.exp %355 : vector<8x128xf32>
    %cst_109 = arith.constant 1.000000e+00 : f32
    %357 = vector.broadcast %cst_109 : f32 to vector<8x128xf32>
    %358 = arith.addf %357, %356 : vector<8x128xf32>
    %359 = arith.divf %357, %358 : vector<8x128xf32>
    %360 = vector.extract_strided_slice %353 {offsets = [0, 128], sizes = [8, 128], strides = [1, 1]} : vector<8x512xf32> to vector<8x128xf32>
    %361 = arith.negf %360 : vector<8x128xf32>
    %362 = math.exp %361 : vector<8x128xf32>
    %cst_110 = arith.constant 1.000000e+00 : f32
    %363 = vector.broadcast %cst_110 : f32 to vector<8x128xf32>
    %364 = arith.addf %363, %362 : vector<8x128xf32>
    %365 = arith.divf %363, %364 : vector<8x128xf32>
    %366 = vector.extract_strided_slice %353 {offsets = [0, 256], sizes = [8, 128], strides = [1, 1]} : vector<8x512xf32> to vector<8x128xf32>
    %367 = math.tanh %366 : vector<8x128xf32>
    %368 = vector.extract_strided_slice %353 {offsets = [0, 384], sizes = [8, 128], strides = [1, 1]} : vector<8x512xf32> to vector<8x128xf32>
    %369 = arith.negf %368 : vector<8x128xf32>
    %370 = math.exp %369 : vector<8x128xf32>
    %cst_111 = arith.constant 1.000000e+00 : f32
    %371 = vector.broadcast %cst_111 : f32 to vector<8x128xf32>
    %372 = arith.addf %371, %370 : vector<8x128xf32>
    %373 = arith.divf %371, %372 : vector<8x128xf32>
    %374 = arith.mulf %365, %344 : vector<8x128xf32>
    %375 = arith.mulf %359, %367 : vector<8x128xf32>
    %376 = arith.addf %374, %375 : vector<8x128xf32>
    %377 = math.tanh %376 : vector<8x128xf32>
    %378 = arith.mulf %373, %377 : vector<8x128xf32>
    %c2_i32_112 = arith.constant 2 : i32
    %c8_i32_113 = arith.constant 8 : i32
    %379 = arith.muli %c2_i32_112, %c8_i32_113 : i32
    %380 = tpu.assume_multiple %379, 8 : i32
    %381 = arith.index_cast %380 : i32 to index
    %c0_114 = arith.constant 0 : index
    %382 = vector.load %arg14[%381, %c0_114] : memref<64x512xf32, #tpu.memory_space<vmem>>, vector<8x512xf32>
    %383 = arith.truncf %378 : vector<8x128xf32> to vector<8x128xbf16>
    %cst_115 = arith.constant dense<0.000000e+00> : vector<8x512xf32>
    %384 = tpu.matmul %383, %310, %cst_115 {dimension_numbers = #tpu.dot_dimension_numbers<[1], [0], [0], [1], [0, 0, 1, 1], [], []>} : vector<8x128xbf16>, vector<128x512xbf16>, vector<8x512xf32> -> vector<8x512xf32>
    %385 = arith.addf %382, %384 : vector<8x512xf32>
    %386 = vector.extract_strided_slice %385 {offsets = [0, 0], sizes = [8, 128], strides = [1, 1]} : vector<8x512xf32> to vector<8x128xf32>
    %387 = arith.negf %386 : vector<8x128xf32>
    %388 = math.exp %387 : vector<8x128xf32>
    %cst_116 = arith.constant 1.000000e+00 : f32
    %389 = vector.broadcast %cst_116 : f32 to vector<8x128xf32>
    %390 = arith.addf %389, %388 : vector<8x128xf32>
    %391 = arith.divf %389, %390 : vector<8x128xf32>
    %392 = vector.extract_strided_slice %385 {offsets = [0, 128], sizes = [8, 128], strides = [1, 1]} : vector<8x512xf32> to vector<8x128xf32>
    %393 = arith.negf %392 : vector<8x128xf32>
    %394 = math.exp %393 : vector<8x128xf32>
    %cst_117 = arith.constant 1.000000e+00 : f32
    %395 = vector.broadcast %cst_117 : f32 to vector<8x128xf32>
    %396 = arith.addf %395, %394 : vector<8x128xf32>
    %397 = arith.divf %395, %396 : vector<8x128xf32>
    %398 = vector.extract_strided_slice %385 {offsets = [0, 256], sizes = [8, 128], strides = [1, 1]} : vector<8x512xf32> to vector<8x128xf32>
    %399 = math.tanh %398 : vector<8x128xf32>
    %400 = vector.extract_strided_slice %385 {offsets = [0, 384], sizes = [8, 128], strides = [1, 1]} : vector<8x512xf32> to vector<8x128xf32>
    %401 = arith.negf %400 : vector<8x128xf32>
    %402 = math.exp %401 : vector<8x128xf32>
    %cst_118 = arith.constant 1.000000e+00 : f32
    %403 = vector.broadcast %cst_118 : f32 to vector<8x128xf32>
    %404 = arith.addf %403, %402 : vector<8x128xf32>
    %405 = arith.divf %403, %404 : vector<8x128xf32>
    %406 = arith.mulf %397, %376 : vector<8x128xf32>
    %407 = arith.mulf %391, %399 : vector<8x128xf32>
    %408 = arith.addf %406, %407 : vector<8x128xf32>
    %409 = math.tanh %408 : vector<8x128xf32>
    %410 = arith.mulf %405, %409 : vector<8x128xf32>
    %c3_i32_119 = arith.constant 3 : i32
    %c8_i32_120 = arith.constant 8 : i32
    %411 = arith.muli %c3_i32_119, %c8_i32_120 : i32
    %412 = tpu.assume_multiple %411, 8 : i32
    %413 = arith.index_cast %412 : i32 to index
    %c0_121 = arith.constant 0 : index
    %414 = vector.load %arg14[%413, %c0_121] : memref<64x512xf32, #tpu.memory_space<vmem>>, vector<8x512xf32>
    %415 = arith.truncf %410 : vector<8x128xf32> to vector<8x128xbf16>
    %cst_122 = arith.constant dense<0.000000e+00> : vector<8x512xf32>
    %416 = tpu.matmul %415, %310, %cst_122 {dimension_numbers = #tpu.dot_dimension_numbers<[1], [0], [0], [1], [0, 0, 1, 1], [], []>} : vector<8x128xbf16>, vector<128x512xbf16>, vector<8x512xf32> -> vector<8x512xf32>
    %417 = arith.addf %414, %416 : vector<8x512xf32>
    %418 = vector.extract_strided_slice %417 {offsets = [0, 0], sizes = [8, 128], strides = [1, 1]} : vector<8x512xf32> to vector<8x128xf32>
    %419 = arith.negf %418 : vector<8x128xf32>
    %420 = math.exp %419 : vector<8x128xf32>
    %cst_123 = arith.constant 1.000000e+00 : f32
    %421 = vector.broadcast %cst_123 : f32 to vector<8x128xf32>
    %422 = arith.addf %421, %420 : vector<8x128xf32>
    %423 = arith.divf %421, %422 : vector<8x128xf32>
    %424 = vector.extract_strided_slice %417 {offsets = [0, 128], sizes = [8, 128], strides = [1, 1]} : vector<8x512xf32> to vector<8x128xf32>
    %425 = arith.negf %424 : vector<8x128xf32>
    %426 = math.exp %425 : vector<8x128xf32>
    %cst_124 = arith.constant 1.000000e+00 : f32
    %427 = vector.broadcast %cst_124 : f32 to vector<8x128xf32>
    %428 = arith.addf %427, %426 : vector<8x128xf32>
    %429 = arith.divf %427, %428 : vector<8x128xf32>
    %430 = vector.extract_strided_slice %417 {offsets = [0, 256], sizes = [8, 128], strides = [1, 1]} : vector<8x512xf32> to vector<8x128xf32>
    %431 = math.tanh %430 : vector<8x128xf32>
    %432 = vector.extract_strided_slice %417 {offsets = [0, 384], sizes = [8, 128], strides = [1, 1]} : vector<8x512xf32> to vector<8x128xf32>
    %433 = arith.negf %432 : vector<8x128xf32>
    %434 = math.exp %433 : vector<8x128xf32>
    %cst_125 = arith.constant 1.000000e+00 : f32
    %435 = vector.broadcast %cst_125 : f32 to vector<8x128xf32>
    %436 = arith.addf %435, %434 : vector<8x128xf32>
    %437 = arith.divf %435, %436 : vector<8x128xf32>
    %438 = arith.mulf %429, %408 : vector<8x128xf32>
    %439 = arith.mulf %423, %431 : vector<8x128xf32>
    %440 = arith.addf %438, %439 : vector<8x128xf32>
    %441 = math.tanh %440 : vector<8x128xf32>
    %442 = arith.mulf %437, %441 : vector<8x128xf32>
    %c4_i32_126 = arith.constant 4 : i32
    %c8_i32_127 = arith.constant 8 : i32
    %443 = arith.muli %c4_i32_126, %c8_i32_127 : i32
    %444 = tpu.assume_multiple %443, 8 : i32
    %445 = arith.index_cast %444 : i32 to index
    %c0_128 = arith.constant 0 : index
    %446 = vector.load %arg14[%445, %c0_128] : memref<64x512xf32, #tpu.memory_space<vmem>>, vector<8x512xf32>
    %447 = arith.truncf %442 : vector<8x128xf32> to vector<8x128xbf16>
    %cst_129 = arith.constant dense<0.000000e+00> : vector<8x512xf32>
    %448 = tpu.matmul %447, %310, %cst_129 {dimension_numbers = #tpu.dot_dimension_numbers<[1], [0], [0], [1], [0, 0, 1, 1], [], []>} : vector<8x128xbf16>, vector<128x512xbf16>, vector<8x512xf32> -> vector<8x512xf32>
    %449 = arith.addf %446, %448 : vector<8x512xf32>
    %450 = vector.extract_strided_slice %449 {offsets = [0, 0], sizes = [8, 128], strides = [1, 1]} : vector<8x512xf32> to vector<8x128xf32>
    %451 = arith.negf %450 : vector<8x128xf32>
    %452 = math.exp %451 : vector<8x128xf32>
    %cst_130 = arith.constant 1.000000e+00 : f32
    %453 = vector.broadcast %cst_130 : f32 to vector<8x128xf32>
    %454 = arith.addf %453, %452 : vector<8x128xf32>
    %455 = arith.divf %453, %454 : vector<8x128xf32>
    %456 = vector.extract_strided_slice %449 {offsets = [0, 128], sizes = [8, 128], strides = [1, 1]} : vector<8x512xf32> to vector<8x128xf32>
    %457 = arith.negf %456 : vector<8x128xf32>
    %458 = math.exp %457 : vector<8x128xf32>
    %cst_131 = arith.constant 1.000000e+00 : f32
    %459 = vector.broadcast %cst_131 : f32 to vector<8x128xf32>
    %460 = arith.addf %459, %458 : vector<8x128xf32>
    %461 = arith.divf %459, %460 : vector<8x128xf32>
    %462 = vector.extract_strided_slice %449 {offsets = [0, 256], sizes = [8, 128], strides = [1, 1]} : vector<8x512xf32> to vector<8x128xf32>
    %463 = math.tanh %462 : vector<8x128xf32>
    %464 = vector.extract_strided_slice %449 {offsets = [0, 384], sizes = [8, 128], strides = [1, 1]} : vector<8x512xf32> to vector<8x128xf32>
    %465 = arith.negf %464 : vector<8x128xf32>
    %466 = math.exp %465 : vector<8x128xf32>
    %cst_132 = arith.constant 1.000000e+00 : f32
    %467 = vector.broadcast %cst_132 : f32 to vector<8x128xf32>
    %468 = arith.addf %467, %466 : vector<8x128xf32>
    %469 = arith.divf %467, %468 : vector<8x128xf32>
    %470 = arith.mulf %461, %440 : vector<8x128xf32>
    %471 = arith.mulf %455, %463 : vector<8x128xf32>
    %472 = arith.addf %470, %471 : vector<8x128xf32>
    %473 = math.tanh %472 : vector<8x128xf32>
    %474 = arith.mulf %469, %473 : vector<8x128xf32>
    %c5_i32_133 = arith.constant 5 : i32
    %c8_i32_134 = arith.constant 8 : i32
    %475 = arith.muli %c5_i32_133, %c8_i32_134 : i32
    %476 = tpu.assume_multiple %475, 8 : i32
    %477 = arith.index_cast %476 : i32 to index
    %c0_135 = arith.constant 0 : index
    %478 = vector.load %arg14[%477, %c0_135] : memref<64x512xf32, #tpu.memory_space<vmem>>, vector<8x512xf32>
    %479 = arith.truncf %474 : vector<8x128xf32> to vector<8x128xbf16>
    %cst_136 = arith.constant dense<0.000000e+00> : vector<8x512xf32>
    %480 = tpu.matmul %479, %310, %cst_136 {dimension_numbers = #tpu.dot_dimension_numbers<[1], [0], [0], [1], [0, 0, 1, 1], [], []>} : vector<8x128xbf16>, vector<128x512xbf16>, vector<8x512xf32> -> vector<8x512xf32>
    %481 = arith.addf %478, %480 : vector<8x512xf32>
    %482 = vector.extract_strided_slice %481 {offsets = [0, 0], sizes = [8, 128], strides = [1, 1]} : vector<8x512xf32> to vector<8x128xf32>
    %483 = arith.negf %482 : vector<8x128xf32>
    %484 = math.exp %483 : vector<8x128xf32>
    %cst_137 = arith.constant 1.000000e+00 : f32
    %485 = vector.broadcast %cst_137 : f32 to vector<8x128xf32>
    %486 = arith.addf %485, %484 : vector<8x128xf32>
    %487 = arith.divf %485, %486 : vector<8x128xf32>
    %488 = vector.extract_strided_slice %481 {offsets = [0, 128], sizes = [8, 128], strides = [1, 1]} : vector<8x512xf32> to vector<8x128xf32>
    %489 = arith.negf %488 : vector<8x128xf32>
    %490 = math.exp %489 : vector<8x128xf32>
    %cst_138 = arith.constant 1.000000e+00 : f32
    %491 = vector.broadcast %cst_138 : f32 to vector<8x128xf32>
    %492 = arith.addf %491, %490 : vector<8x128xf32>
    %493 = arith.divf %491, %492 : vector<8x128xf32>
    %494 = vector.extract_strided_slice %481 {offsets = [0, 256], sizes = [8, 128], strides = [1, 1]} : vector<8x512xf32> to vector<8x128xf32>
    %495 = math.tanh %494 : vector<8x128xf32>
    %496 = vector.extract_strided_slice %481 {offsets = [0, 384], sizes = [8, 128], strides = [1, 1]} : vector<8x512xf32> to vector<8x128xf32>
    %497 = arith.negf %496 : vector<8x128xf32>
    %498 = math.exp %497 : vector<8x128xf32>
    %cst_139 = arith.constant 1.000000e+00 : f32
    %499 = vector.broadcast %cst_139 : f32 to vector<8x128xf32>
    %500 = arith.addf %499, %498 : vector<8x128xf32>
    %501 = arith.divf %499, %500 : vector<8x128xf32>
    %502 = arith.mulf %493, %472 : vector<8x128xf32>
    %503 = arith.mulf %487, %495 : vector<8x128xf32>
    %504 = arith.addf %502, %503 : vector<8x128xf32>
    %505 = math.tanh %504 : vector<8x128xf32>
    %506 = arith.mulf %501, %505 : vector<8x128xf32>
    %c6_i32_140 = arith.constant 6 : i32
    %c8_i32_141 = arith.constant 8 : i32
    %507 = arith.muli %c6_i32_140, %c8_i32_141 : i32
    %508 = tpu.assume_multiple %507, 8 : i32
    %509 = arith.index_cast %508 : i32 to index
    %c0_142 = arith.constant 0 : index
    %510 = vector.load %arg14[%509, %c0_142] : memref<64x512xf32, #tpu.memory_space<vmem>>, vector<8x512xf32>
    %511 = arith.truncf %506 : vector<8x128xf32> to vector<8x128xbf16>
    %cst_143 = arith.constant dense<0.000000e+00> : vector<8x512xf32>
    %512 = tpu.matmul %511, %310, %cst_143 {dimension_numbers = #tpu.dot_dimension_numbers<[1], [0], [0], [1], [0, 0, 1, 1], [], []>} : vector<8x128xbf16>, vector<128x512xbf16>, vector<8x512xf32> -> vector<8x512xf32>
    %513 = arith.addf %510, %512 : vector<8x512xf32>
    %514 = vector.extract_strided_slice %513 {offsets = [0, 0], sizes = [8, 128], strides = [1, 1]} : vector<8x512xf32> to vector<8x128xf32>
    %515 = arith.negf %514 : vector<8x128xf32>
    %516 = math.exp %515 : vector<8x128xf32>
    %cst_144 = arith.constant 1.000000e+00 : f32
    %517 = vector.broadcast %cst_144 : f32 to vector<8x128xf32>
    %518 = arith.addf %517, %516 : vector<8x128xf32>
    %519 = arith.divf %517, %518 : vector<8x128xf32>
    %520 = vector.extract_strided_slice %513 {offsets = [0, 128], sizes = [8, 128], strides = [1, 1]} : vector<8x512xf32> to vector<8x128xf32>
    %521 = arith.negf %520 : vector<8x128xf32>
    %522 = math.exp %521 : vector<8x128xf32>
    %cst_145 = arith.constant 1.000000e+00 : f32
    %523 = vector.broadcast %cst_145 : f32 to vector<8x128xf32>
    %524 = arith.addf %523, %522 : vector<8x128xf32>
    %525 = arith.divf %523, %524 : vector<8x128xf32>
    %526 = vector.extract_strided_slice %513 {offsets = [0, 256], sizes = [8, 128], strides = [1, 1]} : vector<8x512xf32> to vector<8x128xf32>
    %527 = math.tanh %526 : vector<8x128xf32>
    %528 = vector.extract_strided_slice %513 {offsets = [0, 384], sizes = [8, 128], strides = [1, 1]} : vector<8x512xf32> to vector<8x128xf32>
    %529 = arith.negf %528 : vector<8x128xf32>
    %530 = math.exp %529 : vector<8x128xf32>
    %cst_146 = arith.constant 1.000000e+00 : f32
    %531 = vector.broadcast %cst_146 : f32 to vector<8x128xf32>
    %532 = arith.addf %531, %530 : vector<8x128xf32>
    %533 = arith.divf %531, %532 : vector<8x128xf32>
    %534 = arith.mulf %525, %504 : vector<8x128xf32>
    %535 = arith.mulf %519, %527 : vector<8x128xf32>
    %536 = arith.addf %534, %535 : vector<8x128xf32>
    %537 = math.tanh %536 : vector<8x128xf32>
    %538 = arith.mulf %533, %537 : vector<8x128xf32>
    %c7_i32_147 = arith.constant 7 : i32
    %c8_i32_148 = arith.constant 8 : i32
    %539 = arith.muli %c7_i32_147, %c8_i32_148 : i32
    %540 = tpu.assume_multiple %539, 8 : i32
    %541 = arith.index_cast %540 : i32 to index
    %c0_149 = arith.constant 0 : index
    %542 = vector.load %arg14[%541, %c0_149] : memref<64x512xf32, #tpu.memory_space<vmem>>, vector<8x512xf32>
    %543 = arith.truncf %538 : vector<8x128xf32> to vector<8x128xbf16>
    %cst_150 = arith.constant dense<0.000000e+00> : vector<8x512xf32>
    %544 = tpu.matmul %543, %310, %cst_150 {dimension_numbers = #tpu.dot_dimension_numbers<[1], [0], [0], [1], [0, 0, 1, 1], [], []>} : vector<8x128xbf16>, vector<128x512xbf16>, vector<8x512xf32> -> vector<8x512xf32>
    %545 = arith.addf %542, %544 : vector<8x512xf32>
    %546 = vector.extract_strided_slice %545 {offsets = [0, 0], sizes = [8, 128], strides = [1, 1]} : vector<8x512xf32> to vector<8x128xf32>
    %547 = arith.negf %546 : vector<8x128xf32>
    %548 = math.exp %547 : vector<8x128xf32>
    %cst_151 = arith.constant 1.000000e+00 : f32
    %549 = vector.broadcast %cst_151 : f32 to vector<8x128xf32>
    %550 = arith.addf %549, %548 : vector<8x128xf32>
    %551 = arith.divf %549, %550 : vector<8x128xf32>
    %552 = vector.extract_strided_slice %545 {offsets = [0, 128], sizes = [8, 128], strides = [1, 1]} : vector<8x512xf32> to vector<8x128xf32>
    %553 = arith.negf %552 : vector<8x128xf32>
    %554 = math.exp %553 : vector<8x128xf32>
    %cst_152 = arith.constant 1.000000e+00 : f32
    %555 = vector.broadcast %cst_152 : f32 to vector<8x128xf32>
    %556 = arith.addf %555, %554 : vector<8x128xf32>
    %557 = arith.divf %555, %556 : vector<8x128xf32>
    %558 = vector.extract_strided_slice %545 {offsets = [0, 256], sizes = [8, 128], strides = [1, 1]} : vector<8x512xf32> to vector<8x128xf32>
    %559 = math.tanh %558 : vector<8x128xf32>
    %560 = vector.extract_strided_slice %545 {offsets = [0, 384], sizes = [8, 128], strides = [1, 1]} : vector<8x512xf32> to vector<8x128xf32>
    %561 = arith.negf %560 : vector<8x128xf32>
    %562 = math.exp %561 : vector<8x128xf32>
    %cst_153 = arith.constant 1.000000e+00 : f32
    %563 = vector.broadcast %cst_153 : f32 to vector<8x128xf32>
    %564 = arith.addf %563, %562 : vector<8x128xf32>
    %565 = arith.divf %563, %564 : vector<8x128xf32>
    %566 = arith.mulf %557, %536 : vector<8x128xf32>
    %567 = arith.mulf %551, %559 : vector<8x128xf32>
    %568 = arith.addf %566, %567 : vector<8x128xf32>
    %569 = math.tanh %568 : vector<8x128xf32>
    %570 = arith.mulf %565, %569 : vector<8x128xf32>
    %c8_i32_154 = arith.constant 8 : i32
    %c1_155 = arith.constant 1 : index
    %c0_156 = arith.constant 0 : index
    %c0_157 = arith.constant 0 : index
    %571 = vector.load %arg10[%c1_155, %c0_156, %c0_157] : memref<2x8x128xf32, #tpu.memory_space<vmem>>, vector<1x8x128xf32>
    %572 = vector.shape_cast %571 : vector<1x8x128xf32> to vector<8x128xf32>
    %573 = vector.shape_cast %570 : vector<8x128xf32> to vector<1x8x128xf32>
    tpu.vector_store %arg10[%c1_155, %c0_156, %c0_157], %573 {strides = array<i32>} : memref<2x8x128xf32, #tpu.memory_space<vmem>>, vector<1x8x128xf32>,
    %c1_158 = arith.constant 1 : index
    %c0_159 = arith.constant 0 : index
    %c0_160 = arith.constant 0 : index
    %574 = vector.load %arg11[%c1_158, %c0_159, %c0_160] : memref<2x8x128xf32, #tpu.memory_space<vmem>>, vector<1x8x128xf32>
    %575 = vector.shape_cast %574 : vector<1x8x128xf32> to vector<8x128xf32>
    %576 = vector.shape_cast %568 : vector<8x128xf32> to vector<1x8x128xf32>
    tpu.vector_store %arg11[%c1_158, %c0_159, %c0_160], %576 {strides = array<i32>} : memref<2x8x128xf32, #tpu.memory_space<vmem>>, vector<1x8x128xf32>,
    %577 = arith.truncf %570 : vector<8x128xf32> to vector<8x128xbf16>
    %c0_161 = arith.constant 0 : index
    %c0_162 = arith.constant 0 : index
    %578 = vector.load %arg8[%c0_161, %c0_162] : memref<128x128xbf16, #tpu.memory_space<vmem>>, vector<128x128xbf16>
    %cst_163 = arith.constant dense<0.000000e+00> : vector<8x128xf32>
    %579 = tpu.matmul %577, %578, %cst_163 {dimension_numbers = #tpu.dot_dimension_numbers<[1], [0], [0], [1], [0, 0, 1, 1], [], []>} : vector<8x128xbf16>, vector<128x128xbf16>, vector<8x128xf32> -> vector<8x128xf32>
    %c0_164 = arith.constant 0 : index
    %c0_165 = arith.constant 0 : index
    %580 = vector.load %arg9[%c0_164, %c0_165] : memref<1x128xf32, #tpu.memory_space<vmem>>, vector<1x128xf32>
    %581 = vector.broadcast %580 : vector<1x128xf32> to vector<8x128xf32>
    %582 = arith.addf %579, %581 : vector<8x128xf32>
    %583 = arith.negf %582 : vector<8x128xf32>
    %584 = math.exp %583 : vector<8x128xf32>
    %cst_166 = arith.constant 1.000000e+00 : f32
    %585 = vector.broadcast %cst_166 : f32 to vector<8x128xf32>
    %586 = arith.addf %585, %584 : vector<8x128xf32>
    %587 = arith.divf %585, %586 : vector<8x128xf32>
    %c0_167 = arith.constant 0 : index
    %c0_168 = arith.constant 0 : index
    %588 = vector.load %arg12[%c0_167, %c0_168] : memref<8x128xf32, #tpu.memory_space<vmem>>, vector<8x128xf32>
    tpu.vector_store %arg12[%c0_167, %c0_168], %587 {strides = array<i32>} : memref<8x128xf32, #tpu.memory_space<vmem>>, vector<8x128xf32>,
    return
  }
  func.func @transform_0(%arg0: i32) -> (i32, i32) {
    %c0_i32 = arith.constant 0 : i32
    %c0_i32_0 = arith.constant 0 : i32
    %c0_i32_1 = arith.constant 0 : i32
    return %c0_i32, %c0_i32_0 : i32, i32
  }
  func.func @transform_1(%arg0: i32) -> (i32, i32) {
    %c0_i32 = arith.constant 0 : i32
    %c0_i32_0 = arith.constant 0 : i32
    %c0_i32_1 = arith.constant 0 : i32
    return %c0_i32, %c0_i32_0 : i32, i32
  }
  func.func @transform_2(%arg0: i32) -> (i32, i32, i32) {
    %c0_i32 = arith.constant 0 : i32
    %c0_i32_0 = arith.constant 0 : i32
    %c0_i32_1 = arith.constant 0 : i32
    %c0_i32_2 = arith.constant 0 : i32
    return %c0_i32, %c0_i32_0, %c0_i32_1 : i32, i32, i32
  }
  func.func @transform_3(%arg0: i32) -> (i32, i32, i32) {
    %c0_i32 = arith.constant 0 : i32
    %c0_i32_0 = arith.constant 0 : i32
    %c0_i32_1 = arith.constant 0 : i32
    %c0_i32_2 = arith.constant 0 : i32
    return %c0_i32, %c0_i32_0, %c0_i32_1 : i32, i32, i32
  }
  func.func @transform_4(%arg0: i32) -> (i32, i32, i32) {
    %c0_i32 = arith.constant 0 : i32
    %c0_i32_0 = arith.constant 0 : i32
    %c0_i32_1 = arith.constant 0 : i32
    %c0_i32_2 = arith.constant 0 : i32
    return %c0_i32, %c0_i32_0, %c0_i32_1 : i32, i32, i32
  }
  func.func @transform_5(%arg0: i32) -> (i32, i32, i32) {
    %c0_i32 = arith.constant 0 : i32
    %c0_i32_0 = arith.constant 0 : i32
    %c0_i32_1 = arith.constant 0 : i32
    %c0_i32_2 = arith.constant 0 : i32
    return %c0_i32, %c0_i32_0, %c0_i32_1 : i32, i32, i32
  }
  func.func @transform_6(%arg0: i32) -> (i32, i32, i32) {
    %c0_i32 = arith.constant 0 : i32
    %c0_i32_0 = arith.constant 0 : i32
    %c0_i32_1 = arith.constant 0 : i32
    %c0_i32_2 = arith.constant 0 : i32
    return %c0_i32, %c0_i32_0, %c0_i32_1 : i32, i32, i32
  }
  func.func @transform_7(%arg0: i32) -> (i32, i32) {
    %c0_i32 = arith.constant 0 : i32
    %c0_i32_0 = arith.constant 0 : i32
    %c0_i32_1 = arith.constant 0 : i32
    return %c0_i32, %c0_i32_0 : i32, i32
  }
  func.func @transform_8(%arg0: i32) -> (i32, i32) {
    %c0_i32 = arith.constant 0 : i32
    %c0_i32_0 = arith.constant 0 : i32
    %c0_i32_1 = arith.constant 0 : i32
    return %c0_i32, %c0_i32_0 : i32, i32
  }
  func.func @transform_9(%arg0: i32) -> (i32, i32, i32) {
    %c0_i32 = arith.constant 0 : i32
    %c0_i32_0 = arith.constant 0 : i32
    %c0_i32_1 = arith.constant 0 : i32
    %c0_i32_2 = arith.constant 0 : i32
    return %c0_i32, %c0_i32_0, %c0_i32_1 : i32, i32, i32
  }
  func.func @transform_10(%arg0: i32) -> (i32, i32, i32) {
    %c0_i32 = arith.constant 0 : i32
    %c0_i32_0 = arith.constant 0 : i32
    %c0_i32_1 = arith.constant 0 : i32
    %c0_i32_2 = arith.constant 0 : i32
    return %c0_i32, %c0_i32_0, %c0_i32_1 : i32, i32, i32
  }
  func.func @transform_11(%arg0: i32) -> (i32, i32) {
    %c0_i32 = arith.constant 0 : i32
    %c0_i32_0 = arith.constant 0 : i32
    %c0_i32_1 = arith.constant 0 : i32
    return %c0_i32, %c0_i32_0 : i32, i32
  }
}

</mosaic_0001>

<bundles_post_ra>
// kernel: tpu_custom_call.1
= control target key start
LH: loop header
LB: loop body
LE: loop exit
PB: predicated region body
PF: predicated region fallthrough
CT: control target
= control target key end

     0   :  { %17 = vsyncpa [#allocation5], 0  ;;  %s6036_s0 = inlined_call_operand.hbm [shape: bf16[64,128], index: 0, kind: input, shape index: {}]   ;;  %s6037_s1 = inlined_call_operand.hbm [shape: bf16[128,512], index: 1, kind: input, shape index: {}]   ;;  %s6038_s2 = inlined_call_operand.hbm [shape: bf16[1,128,512], index: 2, kind: input, shape index: {}]   ;;  %s6039_s3 = inlined_call_operand.hbm [shape: bf16[2,128,512], index: 3, kind: input, shape index: {}]   ;;  %s6040_s4 = inlined_call_operand.hbm [shape: f32[2,1,512], index: 4, kind: input, shape index: {}]   ;;  %s6041_s5 = inlined_call_operand.hbm [shape: f32[2,8,128], index: 5, kind: input, shape index: {}]   ;;  %s6042_s6 = inlined_call_operand.hbm [shape: f32[2,8,128], index: 6, kind: input, shape index: {}]   ;;  %s6043_s7 = inlined_call_operand.hbm [shape: bf16[128,128], index: 7, kind: input, shape index: {}]   ;;  %s6044_s8 = inlined_call_operand.vmem [shape: f32[1,128], index: 8, kind: input, shape index: {}]   ;;  %s6045_s9 = inlined_call_operand.hbm [shape: f32[2,8,128], index: 9, kind: output, shape index: {0}]   ;;  %s6046_s10 = inlined_call_operand.hbm [shape: f32[2,8,128], index: 10, kind: output, shape index: {1}]   ;;  %s6047_s11 = inlined_call_operand.hbm [shape: f32[8,128], index: 11, kind: output, shape index: {2}]  }
   0x1   :  { %18 = vsyncpa [#allocation8], 0 }
   0x2   :  { %19 = vsyncpa [#allocation11], 0 }
   0x3   :  { %20 = vsyncpa [#allocation14], 0 }
   0x4   :  { %21 = vsyncpa [#allocation17], 0 }
   0x5   :  { %22 = vsyncpa [#allocation6], 0  ;;  %s41_s19 = sshll.u32 %s6037_s1, 4  ;;  %s42_s19 = int_to_ptr.hbm [resolvable:$true] %s41_s19 }
   0x6   :  { %23 = vsyncpa [#allocation20], 0  ;;  %s4838_s20 = smov [#allocation7]   ;;  %s67_s24 = sshll.u32 %s6039_s3, 4  ;;  %s68_s24 = int_to_ptr.hbm [resolvable:$true] %s67_s24 }
   0x7   :  { %s43_s21 = sshll.u32 %s4838_s20, 4  ;;  %s4839_s25 = smov 256   ;;  %s44_s21 = int_to_ptr.vmem [resolvable:$true] %s43_s21 }
   0x8   :  { %s4840_s26 = smov 16   ;;  %s4841_s27 = smov [#allocation10]  }
   0x9   :  { %49 = dma.hbm_to_vmem [thread:$0]  %s42_s19, 4096, %s44_s21, [#allocation8], %s4839_s25, %s4839_s25, %s4840_s26  }
   0xa   :  { %s69_s28 = sshll.u32 %s4841_s27, 4  ;;  %s93_s30 = sshll.u32 %s6041_s5, 4  ;;  %s70_s28 = int_to_ptr.vmem [resolvable:$true] %s69_s28  ;;  %s94_s30 = int_to_ptr.hbm [resolvable:$true] %s93_s30 }
   0xb   :  { %75 = dma.hbm_to_vmem [thread:$0]  %s68_s24, 8192, %s70_s28, [#allocation11], %s4839_s25, %s4839_s25, %s4840_s26  }
   0xc   :  { %s4842_s3 = smov [#allocation13]   ;;  %s28_s15 = sshll.u32 %s6036_s0, 4  ;;  %s29_s15 = int_to_ptr.hbm [resolvable:$true] %s28_s15 }
   0xd   :  { %s95_s12 = sshll.u32 %s4842_s3, 4  ;;  %s4843_s16 = smov 128   ;;  %s96_s12 = int_to_ptr.vmem [resolvable:$true] %s95_s12 }
   0xe   :  { %s4844_s17 = smov 8   ;;  %s4845_s5 = smov [#allocation4]  }
   0xf   :  { %101 = dma.hbm_to_vmem [thread:$0]  %s94_s30, 256, %s96_s12, [#allocation14], %s4843_s16, %s4843_s16, %s4844_s17  }
  0x10   :  { %s30_s18 = sshll.u32 %s4845_s5, 4  ;;  %s4846_s19 = smov 64   ;;  %s31_s18 = int_to_ptr.vmem [resolvable:$true] %s30_s18 }
  0x11   :  { %s4847_s20 = smov 4   ;;  %s54_s23 = sshll.u32 %s6038_s2, 4  ;;  %s55_s23 = int_to_ptr.hbm [resolvable:$true] %s54_s23 }
  0x12   :  { %36 = dma.hbm_to_vmem [thread:$0]  %s29_s15, 512, %s31_s18, [#allocation5], %s4846_s19, %s4846_s19, %s4847_s20  }
  0x13   :  { %s4848_s24 = smov [#allocation9]   ;;  %s80_s29 = sshll.u32 %s6040_s4, 4  ;;  %s81_s29 = int_to_ptr.hbm [resolvable:$true] %s80_s29 }
  0x14   :  { %s56_s0 = sshll.u32 %s4848_s24, 4  ;;  %s4849_s1 = smov [#allocation12]   ;;  %s57_s0 = int_to_ptr.vmem [resolvable:$true] %s56_s0 }
  0x15   :  { %62 = dma.hbm_to_vmem [thread:$0]  %s55_s23, 4096, %s57_s0, [#allocation8], %s4839_s25, %s4839_s25, %s4840_s26  }
  0x16   :  { %s82_s30 = sshll.u32 %s4849_s1, 4  ;;  %s106_s13 = sshll.u32 %s6042_s6, 4  ;;  %s83_s30 = int_to_ptr.vmem [resolvable:$true] %s82_s30  ;;  %s107_s13 = int_to_ptr.hbm [resolvable:$true] %s106_s13 }
  0x17   :  { %88 = dma.hbm_to_vmem [thread:$0]  %s81_s29, 128, %s83_s30, [#allocation11], %s4846_s19, %s4846_s19, %s4847_s20  }
  0x18   :  { %s119_s15 = sshll.u32 %s6043_s7, 4  ;;  %s4850_s5 = smov [#allocation15]   ;;  %s120_s15 = int_to_ptr.hbm [resolvable:$true] %s119_s15 }
  0x19   :  { %s108_s4 = sshll.u32 %s4850_s5, 4  ;;  %s4851_s25 = smov [#allocation16]   ;;  %s109_s4 = int_to_ptr.vmem [resolvable:$true] %s108_s4 }
  0x1a   :  { %114 = dma.hbm_to_vmem [thread:$0]  %s107_s13, 256, %s109_s4, [#allocation14], %s4843_s16, %s4843_s16, %s4844_s17  }
  0x1b   :  { %s121_s26 = sshll.u32 %s4851_s25, 4  ;;  %s122_s26 = int_to_ptr.vmem [resolvable:$true] %s121_s26 }
  0x1c   :  { %127 = dma.hbm_to_vmem [thread:$0]  %s120_s15, 1024, %s122_s26, [#allocation17], %s4846_s19, %s4846_s19, %s4847_s20  }
  0x1d   :  { %4824 = dma.done.wait [#allocation5], 512  }
  0x1e   :  { %4825 = vsyncadd [#allocation5], 4294966784 }
  0x1f   :  { %4826 = dma.done.wait [#allocation8], 8192  }
  0x20   :  { %4827 = vsyncadd [#allocation8], 4294959104 }
  0x21   :  { %4828 = dma.done.wait [#allocation11], 8320  }
  0x22   :  { %4829 = vsyncadd [#allocation11], 4294958976 }
  0x23   :  { %4830 = dma.done.wait [#allocation14], 512  }
  0x24   :  { %4831 = vsyncadd [#allocation14], 4294966784 }
  0x25   :  { %4832 = dma.done.wait [#allocation17], 1024  }
  0x26   :  { %4833 = vsyncadd [#allocation17], 4294966272  ;;  %v3643_v0 = vld [vmem:[#allocation7 + $0xe0] sm:$0xf]  ;;  %v4172_v1 = vld [vmem:[#allocation7 + $0xec] sm:$0xf0] }
  0x27   :  { %v4170_v2 = vld [vmem:[#allocation7 + $0xe4] sm:$0xf]  ;;  %v3644_v3 = vor.u32 %v4172_v1, %v3643_v0  ;;  %v3645_v4 = vld [vmem:[#allocation7 + $0xf0] sm:$0xf0]  ;;  %v3651_v5 = vld [vmem:[#allocation7 + $0xe8] sm:$0xf] }
  0x28   :  { %v4173_v6 = vld [vmem:[#allocation7 + $0xf4] sm:$0xf0]  ;;  %v3648_v7 = vor.u32 %v4170_v2, %v3645_v4  ;;  %v4171_v9 = vld [vmem:[#allocation7 + $0xec] sm:$0xf]  ;;  %v3653_v10 = vld [vmem:[#allocation7 + $0xf8] sm:$0xf0] }
  0x29   :  { %v3652_v8 = vor.u32 %v4173_v6, %v3651_v5  ;;  %v3627_v11 = vld [vmem:[#allocation7 + $0xc0] sm:$0xf]  ;;  %396 = vmatpush.bf16.msra.mxu0 %v3644_v3  ;;  %v3656_v12 = vor.u32 %v4171_v9, %v3653_v10  ;;  %v4168_v13 = vld [vmem:[#allocation7 + $0xcc] sm:$0xf0]  ;;  %v4166_v14 = vld [vmem:[#allocation7 + $0xc4] sm:$0xf] }
  0x2a   :  { %v3629_v15 = vld [vmem:[#allocation7 + $0xd0] sm:$0xf0]  ;;  %425 = vmatpush.bf16.msra.mxu1 %v3648_v7  ;;  %v3628_v16 = vor.u32 %v4168_v13, %v3627_v11  ;;  %v3635_v18 = vld [vmem:[#allocation7 + $0xc8] sm:$0xf]  ;;  %v4169_v19 = vld [vmem:[#allocation7 + $0xd4] sm:$0xf0] }
  0x2b   :  { %454 = vmatpush.bf16.msra.mxu2 %v3652_v8  ;;  %v3632_v17 = vor.u32 %v4166_v14, %v3629_v15  ;;  %v4167_v20 = vld [vmem:[#allocation7 + $0xcc] sm:$0xf]  ;;  %483 = vmatpush.bf16.msra.mxu3 %v3656_v12  ;;  %v3636_v21 = vor.u32 %v4169_v19, %v3635_v18  ;;  %v3637_v22 = vld [vmem:[#allocation7 + $0xd8] sm:$0xf0]  ;;  %v3611_v23 = vld [vmem:[#allocation7 + $0xa0] sm:$0xf] }
  0x2c   :  { %v4164_v24 = vld [vmem:[#allocation7 + $0xac] sm:$0xf0]  ;;  %v3640_v25 = vor.u32 %v4167_v20, %v3637_v22  ;;  %v4162_v26 = vld [vmem:[#allocation7 + $0xa4] sm:$0xf]  ;;  %v3613_v27 = vld [vmem:[#allocation7 + $0xb0] sm:$0xf0] }
  0x2d   :  { %v3619_v28 = vld [vmem:[#allocation7 + $0xa8] sm:$0xf]  ;;  %397 = vmatpush.bf16.msra.mxu0 %v3628_v16  ;;  %v3612_v29 = vor.u32 %v4164_v24, %v3611_v23  ;;  %v4165_v30 = vld [vmem:[#allocation7 + $0xb4] sm:$0xf0]  ;;  %v4163_v31 = vld [vmem:[#allocation7 + $0xac] sm:$0xf]  ;;  %v3616_v33 = vor.u32 %v4162_v26, %v3613_v27 }
  0x2e   :  { %v3621_v32 = vld [vmem:[#allocation7 + $0xb8] sm:$0xf0]  ;;  %426 = vmatpush.bf16.msra.mxu1 %v3632_v17  ;;  %v3620_v34 = vor.u32 %v4165_v30, %v3619_v28  ;;  %v3595_v35 = vld [vmem:[#allocation7 + $0x80] sm:$0xf]  ;;  %v4160_v36 = vld [vmem:[#allocation7 + $0x8c] sm:$0xf0] }
  0x2f   :  { %455 = vmatpush.bf16.msra.mxu2 %v3636_v21  ;;  %v4158_v37 = vld [vmem:[#allocation7 + $0x84] sm:$0xf]  ;;  %484 = vmatpush.bf16.msra.mxu3 %v3640_v25  ;;  %v3624_v38 = vor.u32 %v4163_v31, %v3621_v32  ;;  %v3597_v39 = vld [vmem:[#allocation7 + $0x90] sm:$0xf0]  ;;  %v3603_v40 = vld [vmem:[#allocation7 + $0x88] sm:$0xf]  ;;  %v3596_v44 = vor.u32 %v4160_v36, %v3595_v35 }
  0x30   :  { %v4161_v41 = vld [vmem:[#allocation7 + $0x94] sm:$0xf0]  ;;  %v4159_v42 = vld [vmem:[#allocation7 + $0x8c] sm:$0xf]  ;;  %v3605_v43 = vld [vmem:[#allocation7 + $0x98] sm:$0xf0]  ;;  %v3600_v45 = vor.u32 %v4158_v37, %v3597_v39 }
  0x31   :  { %398 = vmatpush.bf16.msra.mxu0 %v3612_v29  ;;  %v3604_v46 = vor.u32 %v4161_v41, %v3603_v40  ;;  %v3579_v47 = vld [vmem:[#allocation7 + $0x60] sm:$0xf]  ;;  %v4156_v48 = vld [vmem:[#allocation7 + $0x6c] sm:$0xf0]  ;;  %v4154_v49 = vld [vmem:[#allocation7 + $0x64] sm:$0xf]  ;;  %v3608_v50 = vor.u32 %v4159_v42, %v3605_v43 }
  0x32   :  { %427 = vmatpush.bf16.msra.mxu1 %v3616_v33  ;;  %v3581_v51 = vld [vmem:[#allocation7 + $0x70] sm:$0xf0]  ;;  %v3587_v52 = vld [vmem:[#allocation7 + $0x68] sm:$0xf]  ;;  %v4157_v53 = vld [vmem:[#allocation7 + $0x74] sm:$0xf0]  ;;  %v3580_v56 = vor.u32 %v4156_v48, %v3579_v47 }
  0x33   :  { %456 = vmatpush.bf16.msra.mxu2 %v3620_v34  ;;  %485 = vmatpush.bf16.msra.mxu3 %v3624_v38  ;;  %v4155_v54 = vld [vmem:[#allocation7 + $0x6c] sm:$0xf]  ;;  %v3589_v55 = vld [vmem:[#allocation7 + $0x78] sm:$0xf0]  ;;  %v3584_v57 = vor.u32 %v4154_v49, %v3581_v51  ;;  %v3588_v58 = vor.u32 %v4157_v53, %v3587_v52  ;;  %v3563_v59 = vld [vmem:[#allocation7 + $0x40] sm:$0xf] }
  0x34   :  { %v4152_v60 = vld [vmem:[#allocation7 + $0x4c] sm:$0xf0]  ;;  %v4150_v61 = vld [vmem:[#allocation7 + $0x44] sm:$0xf]  ;;  %v3592_v62 = vor.u32 %v4155_v54, %v3589_v55  ;;  %v3565_v63 = vld [vmem:[#allocation7 + $0x50] sm:$0xf0] }
  0x35   :  { %399 = vmatpush.bf16.msra.mxu0 %v3596_v44  ;;  %v3571_v0 = vld [vmem:[#allocation7 + $0x48] sm:$0xf]  ;;  %v4153_v1 = vld [vmem:[#allocation7 + $0x54] sm:$0xf0]  ;;  %v4151_v2 = vld [vmem:[#allocation7 + $0x4c] sm:$0xf]  ;;  %v3564_v4 = vor.u32 %v4152_v60, %v3563_v59  ;;  %v3568_v5 = vor.u32 %v4150_v61, %v3565_v63 }
  0x36   :  { %428 = vmatpush.bf16.msra.mxu1 %v3600_v45  ;;  %v3573_v3 = vld [vmem:[#allocation7 + $0x58] sm:$0xf0]  ;;  %v3572_v6 = vor.u32 %v4153_v1, %v3571_v0  ;;  %v3547_v7 = vld [vmem:[#allocation7 + $0x20] sm:$0xf]  ;;  %v4148_v8 = vld [vmem:[#allocation7 + $0x2c] sm:$0xf0] }
  0x37   :  { %457 = vmatpush.bf16.msra.mxu2 %v3604_v46  ;;  %486 = vmatpush.bf16.msra.mxu3 %v3608_v50  ;;  %v4146_v9 = vld [vmem:[#allocation7 + $0x24] sm:$0xf]  ;;  %v3576_v10 = vor.u32 %v4151_v2, %v3573_v3  ;;  %v3549_v11 = vld [vmem:[#allocation7 + $0x30] sm:$0xf0]  ;;  %v3555_v12 = vld [vmem:[#allocation7 + $0x28] sm:$0xf]  ;;  %v3548_v16 = vor.u32 %v4148_v8, %v3547_v7 }
  0x38   :  { %v4149_v13 = vld [vmem:[#allocation7 + $0x34] sm:$0xf0]  ;;  %v4147_v14 = vld [vmem:[#allocation7 + $0x2c] sm:$0xf]  ;;  %v3557_v15 = vld [vmem:[#allocation7 + $0x38] sm:$0xf0]  ;;  %v3552_v18 = vor.u32 %v4146_v9, %v3549_v11 }
  0x39   :  { %400 = vmatpush.bf16.msra.mxu0 %v3580_v56  ;;  %v3531_v17 = vld [vmem:[#allocation7] sm:$0xf]  ;;  %v3556_v19 = vor.u32 %v4149_v13, %v3555_v12  ;;  %v4144_v20 = vld [vmem:[#allocation7 + $0xc] sm:$0xf0]  ;;  %v4142_v21 = vld [vmem:[#allocation7 + $0x4] sm:$0xf]  ;;  %v3560_v23 = vor.u32 %v4147_v14, %v3557_v15 }
  0x3a   :  { %429 = vmatpush.bf16.msra.mxu1 %v3584_v57  ;;  %v3533_v22 = vld [vmem:[#allocation7 + $0x10] sm:$0xf0]  ;;  %v3539_v24 = vld [vmem:[#allocation7 + $0x8] sm:$0xf]  ;;  %v4145_v25 = vld [vmem:[#allocation7 + $0x14] sm:$0xf0]  ;;  %v3532_v30 = vor.u32 %v4144_v20, %v3531_v17 }
  0x3b   :  { %458 = vmatpush.bf16.msra.mxu2 %v3588_v58  ;;  %487 = vmatpush.bf16.msra.mxu3 %v3592_v62  ;;  %v4143_v26 = vld [vmem:[#allocation7 + $0xc] sm:$0xf]  ;;  %v3541_v27 = vld [vmem:[#allocation7 + $0x18] sm:$0xf0]  ;;  %v3771_v28 = vld [vmem:[#allocation10 + $0xe0] sm:$0xf]  ;;  %v3536_v33 = vor.u32 %v4142_v21, %v3533_v22  ;;  %v3540_v34 = vor.u32 %v4145_v25, %v3539_v24 }
  0x3c   :  { %v4204_v29 = vld [vmem:[#allocation10 + $0xec] sm:$0xf0]  ;;  %v4202_v31 = vld [vmem:[#allocation10 + $0xe4] sm:$0xf]  ;;  %v3773_v32 = vld [vmem:[#allocation10 + $0xf0] sm:$0xf0]  ;;  %v3544_v36 = vor.u32 %v4143_v26, %v3541_v27 }
  0x3d   :  { %401 = vmatpush.bf16.msra.mxu0 %v3564_v4  ;;  %v4138_v35 = vld [vmem:[#allocation4] sm:$0xff]  ;;  %v4954_v37 = vor.u32 %v4204_v29, %v3771_v28  ;;  %v4203_v38 = vld [vmem:[#allocation10 + $0xec] sm:$0xf]  ;;  %v3779_v39 = vld [vmem:[#allocation10 + $0xe8] sm:$0xf]  ;;  %v4956_v41 = vor.u32 %v4202_v31, %v3773_v32  ;;  %s3469_s18 = sshll.u32 %s6046_s10, 4  ;;  %s3470_s18 = int_to_ptr.hbm [resolvable:$true] %s3469_s18 }
  0x3e   :  { %430 = vmatpush.bf16.msra.mxu1 %v3568_v5  ;;  %v4205_v40 = vld [vmem:[#allocation10 + $0xf4] sm:$0xf0]  ;;  %v3781_v42 = vld [vmem:[#allocation10 + $0xf8] sm:$0xf0]  ;;  %v3755_v43 = vld [vmem:[#allocation10 + $0xc0] sm:$0xf] }
  0x3f   :  { %459 = vmatpush.bf16.msra.mxu2 %v3572_v6  ;;  %488 = vmatpush.bf16.msra.mxu3 %v3576_v10  ;;  %v4200_v44 = vld [vmem:[#allocation10 + $0xcc] sm:$0xf0]  ;;  %v4198_v45 = vld [vmem:[#allocation10 + $0xc4] sm:$0xf]  ;;  %v3757_v46 = vld [vmem:[#allocation10 + $0xd0] sm:$0xf0]  ;;  %v4958_v47 = vor.u32 %v4205_v40, %v3779_v39  ;;  %v4961_v48 = vor.u32 %v4203_v38, %v3781_v42 }
  0x40   :  { %v4963_v49 = vor.u32 %v4200_v44, %v3755_v43  ;;  %v4199_v50 = vld [vmem:[#allocation10 + $0xcc] sm:$0xf]  ;;  %v3763_v51 = vld [vmem:[#allocation10 + $0xc8] sm:$0xf]  ;;  %v4201_v52 = vld [vmem:[#allocation10 + $0xd4] sm:$0xf0]  ;;  %v4966_v53 = vor.u32 %v4198_v45, %v3757_v46 }
  0x41   :  { %402 = vmatpush.bf16.msra.mxu0 %v3548_v16  ;;  %v3765_v54 = vld [vmem:[#allocation10 + $0xd8] sm:$0xf0]  ;;  %v3739_v55 = vld [vmem:[#allocation10 + $0xa0] sm:$0xf]  ;;  %v4196_v56 = vld [vmem:[#allocation10 + $0xac] sm:$0xf0]  ;;  %v4969_v59 = vor.u32 %v4201_v52, %v3763_v51 }
  0x42   :  { %431 = vmatpush.bf16.msra.mxu1 %v3552_v18  ;;  %v4194_v57 = vld [vmem:[#allocation10 + $0xa4] sm:$0xf]  ;;  %v3741_v58 = vld [vmem:[#allocation10 + $0xb0] sm:$0xf0]  ;;  %v4973_v60 = vor.u32 %v4199_v50, %v3765_v54  ;;  %v4975_v61 = vor.u32 %v4196_v56, %v3739_v55  ;;  %v4195_v62 = vld [vmem:[#allocation10 + $0xac] sm:$0xf] }
  0x43   :  { %460 = vmatpush.bf16.msra.mxu2 %v3556_v19  ;;  %489 = vmatpush.bf16.msra.mxu3 %v3560_v23  ;;  %v3747_v63 = vld [vmem:[#allocation10 + $0xa8] sm:$0xf]  ;;  %v4197_v0 = vld [vmem:[#allocation10 + $0xb4] sm:$0xf0]  ;;  %v4978_v1 = vor.u32 %v4194_v57, %v3741_v58  ;;  %v3749_v2 = vld [vmem:[#allocation10 + $0xb8] sm:$0xf0] }
  0x44   :  { %v3723_v3 = vld [vmem:[#allocation10 + $0x80] sm:$0xf]  ;;  %v4192_v4 = vld [vmem:[#allocation10 + $0x8c] sm:$0xf0]  ;;  %v4190_v5 = vld [vmem:[#allocation10 + $0x84] sm:$0xf]  ;;  %v4981_v7 = vor.u32 %v4197_v0, %v3747_v63  ;;  %v4985_v8 = vor.u32 %v4195_v62, %v3749_v2 }
  0x45   :  { %403 = vmatpush.bf16.msra.mxu0 %v3532_v30  ;;  %v3725_v6 = vld [vmem:[#allocation10 + $0x90] sm:$0xf0]  ;;  %v4987_v9 = vor.u32 %v4192_v4, %v3723_v3  ;;  %v4191_v10 = vld [vmem:[#allocation10 + $0x8c] sm:$0xf]  ;;  %v3731_v11 = vld [vmem:[#allocation10 + $0x88] sm:$0xf] }
  0x46   :  { %432 = vmatpush.bf16.msra.mxu1 %v3536_v33  ;;  %v4193_v12 = vld [vmem:[#allocation10 + $0x94] sm:$0xf0]  ;;  %v4990_v13 = vor.u32 %v4190_v5, %v3725_v6  ;;  %v3733_v14 = vld [vmem:[#allocation10 + $0x98] sm:$0xf0]  ;;  %v3707_v15 = vld [vmem:[#allocation10 + $0x60] sm:$0xf] }
  0x47   :  { %461 = vmatpush.bf16.msra.mxu2 %v3540_v34  ;;  %490 = vmatpush.bf16.msra.mxu3 %v3544_v36  ;;  %v4188_v16 = vld [vmem:[#allocation10 + $0x6c] sm:$0xf0]  ;;  %v4186_v17 = vld [vmem:[#allocation10 + $0x64] sm:$0xf]  ;;  %v3709_v18 = vld [vmem:[#allocation10 + $0x70] sm:$0xf0]  ;;  %v4993_v20 = vor.u32 %v4193_v12, %v3731_v11  ;;  %v4997_v21 = vor.u32 %v4191_v10, %v3733_v14 }
  0x48   :  { %404 = vmatmul.bf16.vlgmr.msra.gmra.mxu0 %v4138_v35  ;;  %v4139_v19 = vld [vmem:[#allocation4 + $0x8] sm:$0xff]  ;;  %v4999_v22 = vor.u32 %v4188_v16, %v3707_v15  ;;  %v4189_v25 = vld [vmem:[#allocation10 + $0x74] sm:$0xf0]  ;;  %v5002_v26 = vor.u32 %v4186_v17, %v3709_v18  ;;  %v3717_v27 = vld [vmem:[#allocation10 + $0x78] sm:$0xf0]  ;;  %s4852_s19 = smov [#allocation19]  }
  0x49   :  { %746 = vmatpush.bf16.msrb.mxu0 %v4954_v37  ;;  %433 = vmatmul.bf16.vlgmr.msra.gmra.mxu1 %v4138_v35  ;;  %v4187_v23 = vld [vmem:[#allocation10 + $0x6c] sm:$0xf]  ;;  %v3715_v24 = vld [vmem:[#allocation10 + $0x68] sm:$0xf]  ;;  %v3691_v28 = vld [vmem:[#allocation10 + $0x40] sm:$0xf] }
  0x4a   :  { %759 = vmatpush.bf16.msrb.mxu1 %v4956_v41  ;;  %462 = vmatmul.bf16.vlgmr.msra.gmra.mxu2 %v4138_v35  ;;  %v4184_v29 = vld [vmem:[#allocation10 + $0x4c] sm:$0xf0]  ;;  %v4182_v30 = vld [vmem:[#allocation10 + $0x44] sm:$0xf]  ;;  %v3693_v31 = vld [vmem:[#allocation10 + $0x50] sm:$0xf0]  ;;  %v5005_v32 = vor.u32 %v4189_v25, %v3715_v24  ;;  %v5009_v33 = vor.u32 %v4187_v23, %v3717_v27 }
  0x4b   :  { %491 = vmatmul.bf16.vlgmr.msra.gmra.mxu3 %v4138_v35  ;;  %772 = vmatpush.bf16.msrb.mxu2 %v4958_v47  ;;  %v5011_v34 = vor.u32 %v4184_v29, %v3691_v28  ;;  %v5014_v35 = vor.u32 %v4182_v30, %v3693_v31  ;;  %v4183_v36 = vld [vmem:[#allocation10 + $0x4c] sm:$0xf]  ;;  %v3701_v38 = vld [vmem:[#allocation10 + $0x58] sm:$0xf0]  ;;  %v3675_v39 = vld [vmem:[#allocation10 + $0x20] sm:$0xf] }
  0x4c   :  { %785 = vmatpush.bf16.msrb.mxu3 %v4961_v48  ;;  %v4180_v40 = vld [vmem:[#allocation10 + $0x2c] sm:$0xf0]  ;;  %v4178_v42 = vld [vmem:[#allocation10 + $0x24] sm:$0xf]  ;;  %v5019_v43 = vor.u32 %v4183_v36, %v3701_v38  ;;  %v3677_v45 = vld [vmem:[#allocation10 + $0x30] sm:$0xf0] }
  0x4d   :  { %747 = vmatpush.bf16.msrb.mxu0 %v4963_v49  ;;  %v5021_v44 = vor.u32 %v4180_v40, %v3675_v39  ;;  %v3699_v46 = vld [vmem:[#allocation10 + $0x48] sm:$0xf]  ;;  %v4185_v50 = vld [vmem:[#allocation10 + $0x54] sm:$0xf0]  ;;  %v5024_v51 = vor.u32 %v4178_v42, %v3677_v45  ;;  %v4179_v54 = vld [vmem:[#allocation10 + $0x2c] sm:$0xf] }
  0x4e   :  { %760 = vmatpush.bf16.msrb.mxu1 %v4966_v53  ;;  %v5026_v52 = vor.u32 %v4185_v50, %v3699_v46  ;;  %v3685_v55 = vld [vmem:[#allocation10 + $0x38] sm:$0xf0]  ;;  %v3659_v56 = vld [vmem:[#allocation10] sm:$0xf]  ;;  %v4176_v57 = vld [vmem:[#allocation10 + $0xc] sm:$0xf0] }
  0x4f   :  { %773 = vmatpush.bf16.msrb.mxu2 %v4969_v59  ;;  %v4174_v58 = vld [vmem:[#allocation10 + $0x4] sm:$0xf]  ;;  %v3661_v62 = vld [vmem:[#allocation10 + $0x10] sm:$0xf0]  ;;  %v3683_v63 = vld [vmem:[#allocation10 + $0x28] sm:$0xf]  ;;  %v5031_v2 = vor.u32 %v4179_v54, %v3685_v55  ;;  %v5033_v3 = vor.u32 %v4176_v57, %v3659_v56 }
  0x50   :  { %786 = vmatpush.bf16.msrb.mxu3 %v4973_v60  ;;  %v4181_v0 = vld [vmem:[#allocation10 + $0x34] sm:$0xf0]  ;;  %v3667_v5 = vld [vmem:[#allocation10 + $0x8] sm:$0xf]  ;;  %v5038_v10 = vor.u32 %v4174_v58, %v3661_v62  ;;  %v4175_v11 = vld [vmem:[#allocation10 + $0xc] sm:$0xf] }
  0x51   :  { %748 = vmatpush.bf16.msrb.mxu0 %v4975_v61  ;;  %v5035_v4 = vor.u32 %v4181_v0, %v3683_v63  ;;  %v4177_v6 = vld [vmem:[#allocation10 + $0x14] sm:$0xf0]  ;;  %v3669_v12 = vld [vmem:[#allocation10 + $0x18] sm:$0xf0]  ;;  %v4140_v16 = vld [vmem:[#allocation4 + $0x10] sm:$0xff]  ;;  %s3467_s20 = sshll.u32 %s4852_s19, 4  ;;  %s3468_s20 = int_to_ptr.vmem [resolvable:$true] %s3467_s20 }
  0x52   :  { %761 = vmatpush.bf16.msrb.mxu1 %v4978_v1  ;;  %v5041_v14 = vor.u32 %v4177_v6, %v3667_v5  ;;  %v5045_v15 = vor.u32 %v4175_v11, %v3669_v12  ;;  %v4141_v17 = vld [vmem:[#allocation4 + $0x18] sm:$0xff]  ;;  %v576_v18 = vld [vmem:[#allocation13] sm:$0xff]  ;;  %v202_v30 = vld [vmem:[#allocation12] sm:$0xf]  ;;  %s4853_s21 = smov [#allocation18]   ;;  %s3456_s0 = sshll.u32 %s6045_s9, 4  ;;  %s3457_s0 = int_to_ptr.hbm [resolvable:$true] %s3456_s0 }
  0x53   :  { %774 = vmatpush.bf16.msrb.mxu2 %v4981_v7  ;;  %v5120_v31 = vperm.slane %v202_v30, 0  ;;  %v5124_v38 = vperm.slane %v202_v30, 1  ;;  %v5134_v50 = vperm.slane %v202_v30, 2  ;;  %v5136_v54 = vperm.slane %v202_v30, 3  ;;  %s3454_s22 = sshll.u32 %s4853_s21, 4  ;;  %s4854_s9 = smov [#allocation21]   ;;  %s3455_s22 = int_to_ptr.vmem [resolvable:$true] %s3454_s22 }
  0x54   :  { %787 = vmatpush.bf16.msrb.mxu3 %v4985_v8 }
  0x55   :  { %749 = vmatpush.bf16.msrb.mxu0 %v4987_v9  ;;  %6055 = vst [vmem:[#allocation32_spill] sm:$0xff] %v5134_v50 }
  0x56   :  { %762 = vmatpush.bf16.msrb.mxu1 %v4990_v13 }
  0x57   :  { %775 = vmatpush.bf16.msrb.mxu2 %v4993_v20 }
  0x58   :  { %788 = vmatpush.bf16.msrb.mxu3 %v4997_v21  ;;  %409 = vmatmul.bf16.gmra.mxu0 %v4139_v19 }
  0x59   :  { %750 = vmatpush.bf16.msrb.mxu0 %v4999_v22  ;;  %438 = vmatmul.bf16.gmra.mxu1 %v4139_v19 }
  0x5a   :  { %763 = vmatpush.bf16.msrb.mxu1 %v5002_v26  ;;  %467 = vmatmul.bf16.gmra.mxu2 %v4139_v19 }
  0x5b   :  { %496 = vmatmul.bf16.gmra.mxu3 %v4139_v19  ;;  %776 = vmatpush.bf16.msrb.mxu2 %v5005_v32  ;;  %v585_v19 = vpack.c.bf16 %v576_v18, %v576_v18 }
  0x5c   :  { %789 = vmatpush.bf16.msrb.mxu3 %v5009_v33 }
  0x5d   :  { %751 = vmatpush.bf16.msrb.mxu0 %v5011_v34 }
  0x5e   :  { %764 = vmatpush.bf16.msrb.mxu1 %v5014_v35 }
  0x5f   :  { %777 = vmatpush.bf16.msrb.mxu2 %v5026_v52 }
  0x60   :  { %790 = vmatpush.bf16.msrb.mxu3 %v5019_v43 }
  0x61   :  { %752 = vmatpush.bf16.msrb.mxu0 %v5021_v44 }
  0x62   :  { %765 = vmatpush.bf16.msrb.mxu1 %v5024_v51 }
  0x63   :  { %778 = vmatpush.bf16.msrb.mxu2 %v5035_v4 }
  0x64   :  { %791 = vmatpush.bf16.msrb.mxu3 %v5031_v2 }
  0x65   :  { %753 = vmatpush.bf16.msrb.mxu0 %v5033_v3 }
  0x66   :  { %766 = vmatpush.bf16.msrb.mxu1 %v5038_v10 }
  0x67   :  { %779 = vmatpush.bf16.msrb.mxu2 %v5041_v14 }
  0x68   :  { %792 = vmatpush.bf16.msrb.mxu3 %v5045_v15  ;;  %414 = vmatmul.bf16.gmra.mxu0 %v4140_v16 }
  0x69   :  { %874 = vmatpush.bf16.msra.mxu0 %v4954_v37  ;;  %443 = vmatmul.bf16.gmra.mxu1 %v4140_v16 }
  0x6a   :  { %887 = vmatpush.bf16.msra.mxu1 %v4956_v41  ;;  %472 = vmatmul.bf16.gmra.mxu2 %v4140_v16 }
  0x6b   :  { %900 = vmatpush.bf16.msra.mxu2 %v4958_v47  ;;  %501 = vmatmul.bf16.gmra.mxu3 %v4140_v16 }
  0x6c   :  { %913 = vmatpush.bf16.msra.mxu3 %v4961_v48 }
  0x6d   :  { %875 = vmatpush.bf16.msra.mxu0 %v4963_v49 }
  0x6e   :  { %888 = vmatpush.bf16.msra.mxu1 %v4966_v53 }
  0x6f   :  { %901 = vmatpush.bf16.msra.mxu2 %v4969_v59 }
  0x70   :  { %914 = vmatpush.bf16.msra.mxu3 %v4973_v60 }
  0x71   :  { %876 = vmatpush.bf16.msra.mxu0 %v4975_v61 }
  0x72   :  { %889 = vmatpush.bf16.msra.mxu1 %v4978_v1 }
  0x73   :  { %902 = vmatpush.bf16.msra.mxu2 %v4981_v7 }
  0x74   :  { %915 = vmatpush.bf16.msra.mxu3 %v4985_v8 }
  0x75   :  { %877 = vmatpush.bf16.msra.mxu0 %v4987_v9 }
  0x76   :  { %890 = vmatpush.bf16.msra.mxu1 %v4990_v13 }
  0x77   :  { %903 = vmatpush.bf16.msra.mxu2 %v4993_v20 }
  0x78   :  { %916 = vmatpush.bf16.msra.mxu3 %v4997_v21  ;;  %419 = vmatmul.bf16.gmra.mxu0 %v4141_v17 }
  0x79   :  { %878 = vmatpush.bf16.msra.mxu0 %v4999_v22  ;;  %448 = vmatmul.bf16.gmra.mxu1 %v4141_v17 }
  0x7a   :  { %891 = vmatpush.bf16.msra.mxu1 %v5002_v26  ;;  %477 = vmatmul.bf16.gmra.mxu2 %v4141_v17 }
  0x7b   :  { %904 = vmatpush.bf16.msra.mxu2 %v5005_v32  ;;  %506 = vmatmul.bf16.gmra.mxu3 %v4141_v17 }
  0x7c   :  { %917 = vmatpush.bf16.msra.mxu3 %v5009_v33 }
  0x7d   :  { %879 = vmatpush.bf16.msra.mxu0 %v5011_v34 }
  0x7e   :  { %892 = vmatpush.bf16.msra.mxu1 %v5014_v35 }
  0x7f   :  { %905 = vmatpush.bf16.msra.mxu2 %v5026_v52 }
  0x80   :  { %918 = vmatpush.bf16.msra.mxu3 %v5019_v43 }
  0x81   :  { %880 = vmatpush.bf16.msra.mxu0 %v5021_v44 }
  0x82   :  { %893 = vmatpush.bf16.msra.mxu1 %v5024_v51 }
  0x83   :  { %906 = vmatpush.bf16.msra.mxu2 %v5035_v4 }
  0x84   :  { %919 = vmatpush.bf16.msra.mxu3 %v5031_v2 }
  0x85   :  { %881 = vmatpush.bf16.msra.mxu0 %v5033_v3 }
  0x86   :  { %894 = vmatpush.bf16.msra.mxu1 %v5038_v10 }
  0x87   :  { %907 = vmatpush.bf16.msra.mxu2 %v5041_v14 }
  0x88   :  { %920 = vmatpush.bf16.msra.mxu3 %v5045_v15  ;;  %754 = vmatmul.bf16.vlgmr.msrb.gmra.mxu0 %v585_v19 }
  0x89   :  { %767 = vmatmul.bf16.vlgmr.msrb.gmra.mxu1 %v585_v19  ;;  %1003 = vmatpush.bf16.msrb.mxu0 %v4954_v37 }
  0x8a   :  { %780 = vmatmul.bf16.vlgmr.msrb.gmra.mxu2 %v585_v19  ;;  %1016 = vmatpush.bf16.msrb.mxu1 %v4956_v41 }
  0x8b   :  { %793 = vmatmul.bf16.vlgmr.msrb.gmra.mxu3 %v585_v19  ;;  %1029 = vmatpush.bf16.msrb.mxu2 %v4958_v47 }
  0x8c   :  { %1042 = vmatpush.bf16.msrb.mxu3 %v4961_v48 }
  0x8d   :  { %1004 = vmatpush.bf16.msrb.mxu0 %v4963_v49 }
  0x8e   :  { %1017 = vmatpush.bf16.msrb.mxu1 %v4966_v53 }
  0x8f   :  { %1030 = vmatpush.bf16.msrb.mxu2 %v4969_v59 }
  0x90   :  { %1043 = vmatpush.bf16.msrb.mxu3 %v4973_v60 }
  0x91   :  { %1005 = vmatpush.bf16.msrb.mxu0 %v4975_v61 }
  0x92   :  { %1018 = vmatpush.bf16.msrb.mxu1 %v4978_v1 }
  0x93   :  { %1031 = vmatpush.bf16.msrb.mxu2 %v4981_v7 }
  0x94   :  { %1044 = vmatpush.bf16.msrb.mxu3 %v4985_v8 }
  0x95   :  { %1006 = vmatpush.bf16.msrb.mxu0 %v4987_v9 }
  0x96   :  { %1019 = vmatpush.bf16.msrb.mxu1 %v4990_v13 }
  0x97   :  { %1032 = vmatpush.bf16.msrb.mxu2 %v4993_v20 }
  0x98   :  { %1045 = vmatpush.bf16.msrb.mxu3 %v4997_v21 }
  0x99   :  { %1007 = vmatpush.bf16.msrb.mxu0 %v4999_v22 }
  0x9a   :  { %1020 = vmatpush.bf16.msrb.mxu1 %v5002_v26 }
  0x9b   :  { %1033 = vmatpush.bf16.msrb.mxu2 %v5005_v32 }
  0x9c   :  { %1046 = vmatpush.bf16.msrb.mxu3 %v5009_v33 }
  0x9d   :  { %1008 = vmatpush.bf16.msrb.mxu0 %v5011_v34 }
  0x9e   :  { %1021 = vmatpush.bf16.msrb.mxu1 %v5014_v35 }
  0x9f   :  { %1034 = vmatpush.bf16.msrb.mxu2 %v5026_v52 }
  0xa0   :  { %1047 = vmatpush.bf16.msrb.mxu3 %v5019_v43 }
  0xa1   :  { %1009 = vmatpush.bf16.msrb.mxu0 %v5021_v44 }
  0xa2   :  { %1022 = vmatpush.bf16.msrb.mxu1 %v5024_v51 }
  0xa3   :  { %1035 = vmatpush.bf16.msrb.mxu2 %v5035_v4 }
  0xa4   :  { %1048 = vmatpush.bf16.msrb.mxu3 %v5031_v2 }
  0xa5   :  { %1010 = vmatpush.bf16.msrb.mxu0 %v5033_v3 }
  0xa6   :  { %1023 = vmatpush.bf16.msrb.mxu1 %v5038_v10 }
  0xa7   :  { %1036 = vmatpush.bf16.msrb.mxu2 %v5041_v14 }
  0xa8   :  { %1049 = vmatpush.bf16.msrb.mxu3 %v5045_v15 }
  0xc5   :  { %v405_v23 = vpop.f32.mrf.mxu0 }
  0xc6   :  { %v434_v24 = vpop.f32.mrf.mxu1 }
  0xcd   :  { %v5114_v25 = vpop.f32.mrf.mxu2  ;;  %v5116_v28 = vpop.f32.mrf.mxu0 }
  0xce   :  { %v492_v27 = vpop.f32.mrf.mxu3  ;;  %v5118_v29 = vpop.f32.mrf.mxu1 }
  0xd5   :  { %v5122_v36 = vpop.f32.mrf.mxu2  ;;  %v410_v40 = vpop.f32.mrf.mxu0 }
  0xd6   :  { %6052 = vst [vmem:[#allocation29_spill] sm:$0xff] %v5122_v36  ;;  %v5126_v39 = vpop.f32.mrf.mxu3  ;;  %v5129_v42 = vadd.f32 %v410_v40, %v5120_v31  ;;  %v439_v45 = vpop.f32.mrf.mxu1 }
  0xd7   :  { %v5132_v46 = vadd.f32 %v439_v45, %v5124_v38 }
  0xd8   :  { %6053 = vst [vmem:[#allocation30_spill] sm:$0xff] %v5129_v42 }
  0xd9   :  { %6054 = vst [vmem:[#allocation31_spill] sm:$0xff] %v5132_v46 }
  0xdd   :  { %v468_v55 = vpop.f32.mrf.mxu2  ;;  %v5141_v58 = vpop.f32.mrf.mxu0 }
  0xde   :  { %v5139_v56 = vadd.f32 %v468_v55, %v5134_v50  ;;  %v497_v57 = vpop.f32.mrf.mxu3  ;;  %6057 = vst [vmem:[#allocation34_spill] sm:$0xff] %v5141_v58  ;;  %v5146_v63 = vpop.f32.mrf.mxu1 }
  0xdf   :  { %v5144_v62 = vadd.f32 %v497_v57, %v5136_v54  ;;  %6059 = vst [vmem:[#allocation36_spill] sm:$0xff] %v5146_v63 }
  0xe0   :  { %6056 = vst [vmem:[#allocation33_spill] sm:$0xff] %v5139_v56 }
  0xe1   :  { %6058 = vst [vmem:[#allocation35_spill] sm:$0xff] %v5144_v62 }
  0xe5   :  { %v5148_v0 = vpop.f32.mrf.mxu2  ;;  %v415_v6 = vpop.f32.mrf.mxu0 }
  0xe6   :  { %6060 = vst [vmem:[#allocation37_spill] sm:$0xff] %v5148_v0  ;;  %v5150_v5 = vpop.f32.mrf.mxu3  ;;  %v5153_v11 = vadd.f32 %v415_v6, %v5120_v31  ;;  %v444_v12 = vpop.f32.mrf.mxu1 }
  0xe7   :  { %6061 = vst [vmem:[#allocation38_spill] sm:$0xff] %v5150_v5  ;;  %v5156_v16 = vadd.f32 %v444_v12, %v5124_v38 }
  0xe8   :  { %6062 = vst [vmem:[#allocation39_spill] sm:$0xff] %v5153_v11 }
  0xe9   :  { %6063 = vst [vmem:[#allocation40_spill] sm:$0xff] %v5156_v16 }
  0xed   :  { %v473_v17 = vpop.f32.mrf.mxu2  ;;  %v5161_v30 = vpop.f32.mrf.mxu0 }
  0xee   :  { %v5159_v18 = vadd.f32 %v473_v17, %v5134_v50  ;;  %v502_v19 = vpop.f32.mrf.mxu3  ;;  %6065 = vst [vmem:[#allocation42_spill] sm:$0xff] %v5161_v30  ;;  %v5166_v45 = vpop.f32.mrf.mxu1 }
  0xef   :  { %v5164_v40 = vadd.f32 %v502_v19, %v5136_v54  ;;  %6067 = vst [vmem:[#allocation44_spill] sm:$0xff] %v5166_v45 }
  0xf0   :  { %6064 = vst [vmem:[#allocation41_spill] sm:$0xff] %v5159_v18 }
  0xf1   :  { %6066 = vst [vmem:[#allocation43_spill] sm:$0xff] %v5164_v40 }
  0xf5   :  { %v5168_v55 = vpop.f32.mrf.mxu2  ;;  %v420_v6 = vpop.f32.mrf.mxu0 }
  0xf6   :  { %6068 = vst [vmem:[#allocation45_spill] sm:$0xff] %v5168_v55  ;;  %v5170_v57 = vpop.f32.mrf.mxu3  ;;  %v5173_v12 = vadd.f32 %v420_v6, %v5120_v31  ;;  %v449_v16 = vpop.f32.mrf.mxu1 }
  0xf7   :  { %6069 = vst [vmem:[#allocation46_spill] sm:$0xff] %v5170_v57  ;;  %v5176_v17 = vadd.f32 %v449_v16, %v5124_v38  ;;  %v406_v57 = vadd.f32 %v405_v23, %v5120_v31 }
  0xf8   :  { %6070 = vst [vmem:[#allocation47_spill] sm:$0xff] %v5173_v12  ;;  %v435_v12 = vadd.f32 %v434_v24, %v5124_v38 }
  0xf9   :  { %6071 = vst [vmem:[#allocation48_spill] sm:$0xff] %v5176_v17 }
  0xfd   :  { %v478_v18 = vpop.f32.mrf.mxu2  ;;  %v5181_v40 = vpop.f32.mrf.mxu0 }
  0xfe   :  { %v5179_v30 = vadd.f32 %v478_v18, %v5134_v50  ;;  %v507_v19 = vpop.f32.mrf.mxu3  ;;  %6073 = vst [vmem:[#allocation50_spill] sm:$0xff] %v5181_v40  ;;  %v5186_v55 = vpop.f32.mrf.mxu1 }
  0xff   :  { %v5184_v45 = vadd.f32 %v507_v19, %v5136_v54  ;;  %6075 = vst [vmem:[#allocation52_spill] sm:$0xff] %v5186_v55  ;;  %v493_v19 = vadd.f32 %v492_v27, %v5136_v54 }
 0x100   :  { %6072 = vst [vmem:[#allocation49_spill] sm:$0xff] %v5179_v30 }
 0x101   :  { %6074 = vst [vmem:[#allocation51_spill] sm:$0xff] %v5184_v45 }
 0x105   :  { %v5189_v6 = vpop.f32.mrf.mxu2  ;;  %v755_v17 = vpop.f32.mrf.mxu0 }
 0x106   :  { %6076 = vst [vmem:[#allocation53_spill] sm:$0xff] %v5189_v6  ;;  %v5192_v16 = vpop.f32.mrf.mxu3  ;;  %v798_v11 = vadd.f32 %v755_v17, %v406_v57  ;;  %v768_v18 = vpop.f32.mrf.mxu1 }
 0x107   :  { %6077 = vst [vmem:[#allocation54_spill] sm:$0xff] %v5192_v16  ;;  %v799_v30 = vadd.f32 %v768_v18, %v435_v12 }
 0x108   :  { %v3785_v0 = vmul.f32 -1.442695, %v798_v11 }
 0x109   :  { %v3786_v5 = vmul.f32 -1.442695, %v799_v30 }
 0x10a   :  { %4300 = vpow2.f32 %v3785_v0  ;;  %v464_v0 = vadd.f32 %v5114_v25, %v5134_v50 }
 0x10b   :  { %4302 = vpow2.f32 %v3786_v5 }
 0x10d   :  { %v781_v40 = vpop.f32.mrf.mxu2  ;;  %v757_v45 = vpop.f32.mrf.mxu0 }
 0x10e   :  { %v794_v55 = vpop.f32.mrf.mxu3  ;;  %v770_v63 = vpop.f32.mrf.mxu1  ;;  %v800_v30 = vadd.f32 %v781_v40, %v464_v0 }
 0x10f   :  { %v801_v23 = vadd.f32 %v794_v55, %v493_v19 }
 0x110   :  { %v4301_v6 = vpop.eup %4300 }
 0x111   :  { %v3787_v58 = vmul.f32 -1.442695, %v801_v23  ;;  %v4303_v24 = vpop.eup %4302  ;;  %v805_v56 = vadd.f32 1.0, %v4301_v6 }
 0x112   :  { %v824_v16 = vadd.f32 1.0, %v4303_v24 }
 0x113   :  { %4304 = vpow2.f32 %v3787_v58  ;;  %v817_v6 = vand.u32 2147483648, %v805_v56  ;;  %v815_v23 = vand.u32 2147483647, %v805_v56  ;;  %vm811_vm2 = vweird.f32 %v805_v56 }
 0x114   :  { %4306 = vrcp.f32 %v805_v56  ;;  %v836_v58 = vand.u32 2147483648, %v824_v16  ;;  %vm830_vm3 = vweird.f32 %v824_v16 }
 0x115   :  { %4308 = vrcp.f32 %v824_v16  ;;  %v783_v57 = vpop.f32.mrf.mxu2  ;;  %v818_v40 = vor.u32 1.1754944e-38, %v817_v6  ;;  %vm816_vm6 = vcmp.eq.f32.partialorder %v815_v23, 8.507059e+37 }
 0x116   :  { %v796_v11 = vpop.f32.mrf.mxu3  ;;  %v834_v57 = vand.u32 2147483647, %v824_v16 }
 0x118   :  { %vm835_vm7 = vcmp.eq.f32.partialorder %v834_v57, 8.507059e+37 }
 0x119   :  { %v4305_v5 = vpop.eup %4304 }
 0x11a   :  { %v4307_v27 = vpop.eup %4306  ;;  %v844_v12 = vadd.f32 1.0, %v4305_v5  ;;  %v837_v5 = vor.u32 1.1754944e-38, %v836_v58 }
 0x11b   :  { %v4309_v45 = vpop.eup %4308  ;;  %v807_v55 = vmul.f32 %v4307_v27, %v805_v56  ;;  %vm812_vm0 = vweird.f32 %v4307_v27 }
 0x11c   :  { %v826_v63 = vmul.f32 %v4309_v45, %v824_v16  ;;  %4310 = vrcp.f32 %v844_v12  ;;  %vm831_vm1 = vweird.f32 %v4309_v45  ;;  %vm813_vm4 = vmor %vm811_vm2, %vm812_vm0  ;;  %v856_v6 = vand.u32 2147483648, %v844_v12 }
 0x11d   :  { %v808_v17 = vsub.f32 1.0, %v807_v55  ;;  %4312 = vtanh.f32 %v800_v30  ;;  %vm832_vm5 = vmor %vm830_vm3, %vm831_vm1  ;;  %v577_v55 = vld [vmem:[#allocation15] sm:$0xff]  ;;  %vm850_vm9 = vweird.f32 %v844_v12 }
 0x11e   :  { %v827_v18 = vsub.f32 1.0, %v826_v63  ;;  %v857_v23 = vor.u32 1.1754944e-38, %v856_v6 }
 0x11f   :  { %v809_v19 = vmul.f32 %v4307_v27, %v808_v17 }
 0x120   :  { %v828_v24 = vmul.f32 %v4309_v45, %v827_v18 }
 0x121   :  { %v810_v25 = vadd.f32 %v4307_v27, %v809_v19 }
 0x122   :  { %v4311_v11 = vpop.eup %4310  ;;  %v829_v0 = vadd.f32 %v4309_v45, %v828_v24 }
 0x123   :  { %v814_v63 = vsel %vm813_vm4, %v4307_v27, %v810_v25  ;;  %v846_v30 = vmul.f32 %v4311_v11, %v844_v12  ;;  %v4313_v62 = vpop.eup %4312  ;;  %vm851_vm8 = vweird.f32 %v4311_v11  ;;  %v854_v27 = vand.u32 2147483647, %v844_v12 }
 0x124   :  { %v819_v17 = vsel %vm816_vm6, %v818_v40, %v814_v63  ;;  %v833_v46 = vsel %vm832_vm5, %v4309_v45, %v829_v0  ;;  %vm852_vm10 = vmor %vm850_vm9, %vm851_vm8 }
 0x125   :  { %v838_v18 = vsel %vm835_vm7, %v837_v5, %v833_v46  ;;  %v861_v42 = vmul.f32 %v4313_v62, %v819_v17  ;;  %v847_v36 = vsub.f32 1.0, %v846_v30  ;;  %vm855_vm11 = vcmp.eq.f32.partialorder %v854_v27, 8.507059e+37 }
 0x126   :  { %v860_v19 = vmul.f32 %v838_v18, %v577_v55  ;;  %v495_v5 = vadd.f32 %v5126_v39, %v5136_v54 }
 0x127   :  { %v848_v56 = vmul.f32 %v4311_v11, %v847_v36  ;;  %v408_v36 = vadd.f32 %v5116_v28, %v5120_v31 }
 0x128   :  { %v5197_v50 = vadd.f32 %v861_v42, %v860_v19  ;;  %v437_v42 = vadd.f32 %v5118_v29, %v5124_v38 }
 0x129   :  { %v849_v16 = vadd.f32 %v4311_v11, %v848_v56 }
 0x12a   :  { %4314 = vtanh.f32 %v5197_v50 }
 0x12b   :  { %v853_v58 = vsel %vm852_vm10, %v4311_v11, %v849_v16 }
 0x12c   :  { %v858_v24 = vsel %vm855_vm11, %v857_v23, %v853_v58  ;;  %v6078_v23 = vld [vmem:[#allocation32_spill] sm:$0xff] }
 0x130   :  { %v4315_v45 = vpop.eup %4314 }
 0x131   :  { %v864_v46 = vmul.f32 %v4315_v45, %v858_v24  ;;  %v6079_v45 = vld [vmem:[#allocation29_spill] sm:$0xff] }
 0x132   :  { %v466_v39 = vadd.f32 %v6079_v45, %v6078_v23 }
 0x133   :  { %v865_v62 = vpack.c.bf16 %v864_v46, %v864_v46 }
 0x135   :  { %866 = vst [vmem:[#allocation2] sm:$0xf] %v865_v62  ;;  %882 = vmatmul.bf16.vlgmr.msra.gmra.mxu0 %v865_v62  ;;  %895 = vmatmul.bf16.vlgmr.msra.gmra.mxu1 %v865_v62 }
 0x136   :  { %908 = vmatmul.bf16.vlgmr.msra.gmra.mxu2 %v865_v62  ;;  %921 = vmatmul.bf16.vlgmr.msra.gmra.mxu3 %v865_v62 }
 0x137   :  { %1132 = vmatpush.bf16.msra.mxu0 %v4954_v37  ;;  %1145 = vmatpush.bf16.msra.mxu1 %v4956_v41 }
 0x138   :  { %1158 = vmatpush.bf16.msra.mxu2 %v4958_v47  ;;  %1171 = vmatpush.bf16.msra.mxu3 %v4961_v48 }
 0x13b   :  { %1133 = vmatpush.bf16.msra.mxu0 %v4963_v49  ;;  %1146 = vmatpush.bf16.msra.mxu1 %v4966_v53 }
 0x13c   :  { %1159 = vmatpush.bf16.msra.mxu2 %v4969_v59  ;;  %1172 = vmatpush.bf16.msra.mxu3 %v4973_v60 }
 0x13f   :  { %1134 = vmatpush.bf16.msra.mxu0 %v4975_v61  ;;  %1147 = vmatpush.bf16.msra.mxu1 %v4978_v1 }
 0x140   :  { %1160 = vmatpush.bf16.msra.mxu2 %v4981_v7  ;;  %1173 = vmatpush.bf16.msra.mxu3 %v4985_v8 }
 0x143   :  { %1135 = vmatpush.bf16.msra.mxu0 %v4987_v9  ;;  %1148 = vmatpush.bf16.msra.mxu1 %v4990_v13 }
 0x144   :  { %1161 = vmatpush.bf16.msra.mxu2 %v4993_v20  ;;  %1174 = vmatpush.bf16.msra.mxu3 %v4997_v21 }
 0x147   :  { %1136 = vmatpush.bf16.msra.mxu0 %v4999_v22  ;;  %1149 = vmatpush.bf16.msra.mxu1 %v5002_v26 }
 0x148   :  { %1162 = vmatpush.bf16.msra.mxu2 %v5005_v32  ;;  %1175 = vmatpush.bf16.msra.mxu3 %v5009_v33 }
 0x14b   :  { %1137 = vmatpush.bf16.msra.mxu0 %v5011_v34  ;;  %1150 = vmatpush.bf16.msra.mxu1 %v5014_v35 }
 0x14c   :  { %1163 = vmatpush.bf16.msra.mxu2 %v5026_v52  ;;  %1176 = vmatpush.bf16.msra.mxu3 %v5019_v43 }
 0x14f   :  { %1138 = vmatpush.bf16.msra.mxu0 %v5021_v44  ;;  %1151 = vmatpush.bf16.msra.mxu1 %v5024_v51 }
 0x150   :  { %1164 = vmatpush.bf16.msra.mxu2 %v5035_v4  ;;  %1177 = vmatpush.bf16.msra.mxu3 %v5031_v2 }
 0x153   :  { %1139 = vmatpush.bf16.msra.mxu0 %v5033_v3  ;;  %1152 = vmatpush.bf16.msra.mxu1 %v5038_v10 }
 0x154   :  { %1165 = vmatpush.bf16.msra.mxu2 %v5041_v14  ;;  %1178 = vmatpush.bf16.msra.mxu3 %v5045_v15 }
 0x1b2   :  { %v883_v12 = vpop.f32.mrf.mxu0  ;;  %v896_v57 = vpop.f32.mrf.mxu1 }
 0x1b3   :  { %v926_v25 = vadd.f32 %v883_v12, %v408_v36  ;;  %v927_v11 = vadd.f32 %v896_v57, %v437_v42 }
 0x1b5   :  { %v3788_v40 = vmul.f32 -1.442695, %v926_v25  ;;  %v3789_v0 = vmul.f32 -1.442695, %v927_v11 }
 0x1b7   :  { %4316 = vpow2.f32 %v3788_v40 }
 0x1b8   :  { %4318 = vpow2.f32 %v3789_v0 }
 0x1b9   :  { %v909_v55 = vpop.f32.mrf.mxu2  ;;  %v922_v63 = vpop.f32.mrf.mxu3 }
 0x1ba   :  { %v929_v30 = vadd.f32 %v922_v63, %v495_v5  ;;  %v885_v17 = vpop.f32.mrf.mxu0  ;;  %v898_v18 = vpop.f32.mrf.mxu1  ;;  %v928_v62 = vadd.f32 %v909_v55, %v466_v39 }
 0x1bc   :  { %v3790_v28 = vmul.f32 -1.442695, %v929_v30 }
 0x1bd   :  { %v4317_v19 = vpop.eup %4316 }
 0x1be   :  { %v4319_v56 = vpop.eup %4318  ;;  %v933_v29 = vadd.f32 1.0, %v4317_v19  ;;  %4320 = vpow2.f32 %v3790_v28 }
 0x1bf   :  { %v952_v16 = vadd.f32 1.0, %v4319_v56 }
 0x1c0   :  { %4322 = vrcp.f32 %v933_v29  ;;  %v945_v11 = vand.u32 2147483648, %v933_v29  ;;  %v943_v5 = vand.u32 2147483647, %v933_v29  ;;  %vm939_vm14 = vweird.f32 %v933_v29 }
 0x1c1   :  { %4324 = vrcp.f32 %v952_v16  ;;  %v911_v6 = vpop.f32.mrf.mxu2  ;;  %v924_v27 = vpop.f32.mrf.mxu3  ;;  %v964_v40 = vand.u32 2147483648, %v952_v16  ;;  %v962_v30 = vand.u32 2147483647, %v952_v16  ;;  %vm958_vm15 = vweird.f32 %v952_v16 }
 0x1c2   :  { %v946_v55 = vor.u32 1.1754944e-38, %v945_v11  ;;  %vm944_vm2 = vcmp.eq.f32.partialorder %v943_v5, 8.507059e+37 }
 0x1c3   :  { %v965_v56 = vor.u32 1.1754944e-38, %v964_v40  ;;  %vm963_vm3 = vcmp.eq.f32.partialorder %v962_v30, 8.507059e+37  ;;  %v6080_v30 = vld [vmem:[#allocation30_spill] sm:$0xff] }
 0x1c4   :  { %v4321_v58 = vpop.eup %4320 }
 0x1c5   :  { %v972_v24 = vadd.f32 1.0, %v4321_v58 }
 0x1c6   :  { %v4323_v46 = vpop.eup %4322 }
 0x1c7   :  { %v4325_v36 = vpop.eup %4324  ;;  %v935_v42 = vmul.f32 %v4323_v46, %v933_v29  ;;  %4326 = vrcp.f32 %v972_v24  ;;  %vm940_vm12 = vweird.f32 %v4323_v46  ;;  %vm978_vm5 = vweird.f32 %v972_v24 }
 0x1c8   :  { %v954_v12 = vmul.f32 %v4325_v36, %v952_v16  ;;  %4328 = vtanh.f32 %v928_v62  ;;  %vm959_vm13 = vweird.f32 %v4325_v36  ;;  %vm941_vm0 = vmor %vm939_vm14, %vm940_vm12 }
 0x1c9   :  { %v936_v57 = vsub.f32 1.0, %v935_v42  ;;  %vm960_vm1 = vmor %vm958_vm15, %vm959_vm13 }
 0x1ca   :  { %v955_v25 = vsub.f32 1.0, %v954_v12 }
 0x1cb   :  { %v937_v0 = vmul.f32 %v4323_v46, %v936_v57 }
 0x1cc   :  { %v956_v63 = vmul.f32 %v4325_v36, %v955_v25  ;;  %v984_v25 = vand.u32 2147483648, %v972_v24 }
 0x1cd   :  { %v4327_v17 = vpop.eup %4326  ;;  %v938_v18 = vadd.f32 %v4323_v46, %v937_v0 }
 0x1ce   :  { %v957_v28 = vadd.f32 %v4325_v36, %v956_v63  ;;  %v974_v19 = vmul.f32 %v4327_v17, %v972_v24  ;;  %v4329_v27 = vpop.eup %4328  ;;  %vm979_vm4 = vweird.f32 %v4327_v17  ;;  %v985_v40 = vor.u32 1.1754944e-38, %v984_v25 }
 0x1cf   :  { %v942_v6 = vsel %vm941_vm0, %v4323_v46, %v938_v18  ;;  %v982_v46 = vand.u32 2147483647, %v972_v24  ;;  %vm980_vm6 = vmor %vm978_vm5, %vm979_vm4  ;;  %v6081_v18 = vld [vmem:[#allocation31_spill] sm:$0xff] }
 0x1d0   :  { %v947_v58 = vsel %vm944_vm2, %v946_v55, %v942_v6  ;;  %v961_v45 = vsel %vm960_vm1, %v4325_v36, %v957_v28  ;;  %v975_v39 = vsub.f32 1.0, %v974_v19 }
 0x1d1   :  { %v966_v62 = vsel %vm963_vm3, %v965_v56, %v961_v45  ;;  %v989_v42 = vmul.f32 %v4329_v27, %v947_v58  ;;  %vm983_vm7 = vcmp.eq.f32.partialorder %v982_v46, 8.507059e+37  ;;  %v6082_v27 = vld [vmem:[#allocation35_spill] sm:$0xff] }
 0x1d2   :  { %v988_v12 = vmul.f32 %v966_v62, %v5197_v50  ;;  %v976_v57 = vmul.f32 %v4327_v17, %v975_v39 }
 0x1d4   :  { %v5241_v29 = vadd.f32 %v989_v42, %v988_v12  ;;  %v977_v16 = vadd.f32 %v4327_v17, %v976_v57 }
 0x1d6   :  { %4330 = vtanh.f32 %v5241_v29  ;;  %v981_v11 = vsel %vm980_vm6, %v4327_v17, %v977_v16 }
 0x1d7   :  { %v986_v0 = vsel %vm983_vm7, %v985_v40, %v981_v11 }
 0x1dc   :  { %v4331_v36 = vpop.eup %4330 }
 0x1dd   :  { %v992_v5 = vmul.f32 %v4331_v36, %v986_v0  ;;  %v6083_v0 = vld [vmem:[#allocation33_spill] sm:$0xff] }
 0x1df   :  { %v993_v63 = vpack.c.bf16 %v992_v5, %v992_v5 }
 0x1e1   :  { %995 = vst [vmem:[#allocation2 + $0x4] sm:$0xf] %v993_v63  ;;  %1011 = vmatmul.bf16.vlgmr.msrb.gmra.mxu0 %v993_v63  ;;  %1024 = vmatmul.bf16.vlgmr.msrb.gmra.mxu1 %v993_v63 }
 0x1e2   :  { %1037 = vmatmul.bf16.vlgmr.msrb.gmra.mxu2 %v993_v63  ;;  %1050 = vmatmul.bf16.vlgmr.msrb.gmra.mxu3 %v993_v63 }
 0x1e3   :  { %1261 = vmatpush.bf16.msrb.mxu0 %v4954_v37  ;;  %1274 = vmatpush.bf16.msrb.mxu1 %v4956_v41 }
 0x1e4   :  { %1287 = vmatpush.bf16.msrb.mxu2 %v4958_v47  ;;  %1300 = vmatpush.bf16.msrb.mxu3 %v4961_v48 }
 0x1e7   :  { %1262 = vmatpush.bf16.msrb.mxu0 %v4963_v49  ;;  %1275 = vmatpush.bf16.msrb.mxu1 %v4966_v53 }
 0x1e8   :  { %1288 = vmatpush.bf16.msrb.mxu2 %v4969_v59  ;;  %1301 = vmatpush.bf16.msrb.mxu3 %v4973_v60 }
 0x1eb   :  { %1263 = vmatpush.bf16.msrb.mxu0 %v4975_v61  ;;  %1276 = vmatpush.bf16.msrb.mxu1 %v4978_v1 }
 0x1ec   :  { %1289 = vmatpush.bf16.msrb.mxu2 %v4981_v7  ;;  %1302 = vmatpush.bf16.msrb.mxu3 %v4985_v8 }
 0x1ef   :  { %1264 = vmatpush.bf16.msrb.mxu0 %v4987_v9  ;;  %1277 = vmatpush.bf16.msrb.mxu1 %v4990_v13 }
 0x1f0   :  { %1290 = vmatpush.bf16.msrb.mxu2 %v4993_v20  ;;  %1303 = vmatpush.bf16.msrb.mxu3 %v4997_v21 }
 0x1f3   :  { %1265 = vmatpush.bf16.msrb.mxu0 %v4999_v22  ;;  %1278 = vmatpush.bf16.msrb.mxu1 %v5002_v26 }
 0x1f4   :  { %1291 = vmatpush.bf16.msrb.mxu2 %v5005_v32  ;;  %1304 = vmatpush.bf16.msrb.mxu3 %v5009_v33 }
 0x1f7   :  { %1266 = vmatpush.bf16.msrb.mxu0 %v5011_v34  ;;  %1279 = vmatpush.bf16.msrb.mxu1 %v5014_v35 }
 0x1f8   :  { %1292 = vmatpush.bf16.msrb.mxu2 %v5026_v52  ;;  %1305 = vmatpush.bf16.msrb.mxu3 %v5019_v43 }
 0x1fb   :  { %1267 = vmatpush.bf16.msrb.mxu0 %v5021_v44  ;;  %1280 = vmatpush.bf16.msrb.mxu1 %v5024_v51 }
 0x1fc   :  { %1293 = vmatpush.bf16.msrb.mxu2 %v5035_v4  ;;  %1306 = vmatpush.bf16.msrb.mxu3 %v5031_v2 }
 0x1ff   :  { %1268 = vmatpush.bf16.msrb.mxu0 %v5033_v3  ;;  %1281 = vmatpush.bf16.msrb.mxu1 %v5038_v10 }
 0x200   :  { %1294 = vmatpush.bf16.msrb.mxu2 %v5041_v14  ;;  %1307 = vmatpush.bf16.msrb.mxu3 %v5045_v15 }
 0x25e   :  { %v1012_v50 = vpop.f32.mrf.mxu0  ;;  %v1025_v24 = vpop.f32.mrf.mxu1 }
 0x25f   :  { %v1055_v17 = vadd.f32 %v1012_v50, %v6080_v30  ;;  %v1056_v55 = vadd.f32 %v1025_v24, %v6081_v18 }
 0x261   :  { %v3791_v28 = vmul.f32 -1.442695, %v1055_v17  ;;  %v3792_v19 = vmul.f32 -1.442695, %v1056_v55 }
 0x263   :  { %4332 = vpow2.f32 %v3791_v28 }
 0x264   :  { %4334 = vpow2.f32 %v3792_v19 }
 0x265   :  { %v1038_v56 = vpop.f32.mrf.mxu2  ;;  %v1051_v6 = vpop.f32.mrf.mxu3 }
 0x266   :  { %v1058_v58 = vadd.f32 %v1051_v6, %v6082_v27  ;;  %v1014_v45 = vpop.f32.mrf.mxu0  ;;  %v1027_v39 = vpop.f32.mrf.mxu1  ;;  %v1057_v5 = vadd.f32 %v1038_v56, %v6083_v0 }
 0x268   :  { %v3793_v62 = vmul.f32 -1.442695, %v1058_v58 }
 0x269   :  { %v4333_v42 = vpop.eup %4332 }
 0x26a   :  { %v4335_v12 = vpop.eup %4334  ;;  %v1062_v57 = vadd.f32 1.0, %v4333_v42  ;;  %4336 = vpow2.f32 %v3793_v62 }
 0x26b   :  { %v1081_v16 = vadd.f32 1.0, %v4335_v12 }
 0x26c   :  { %4338 = vrcp.f32 %v1062_v57  ;;  %v1074_v18 = vand.u32 2147483648, %v1062_v57  ;;  %v1072_v19 = vand.u32 2147483647, %v1062_v57  ;;  %vm1068_vm10 = vweird.f32 %v1062_v57 }
 0x26d   :  { %4340 = vrcp.f32 %v1081_v16  ;;  %v1040_v25 = vpop.f32.mrf.mxu2  ;;  %v1053_v46 = vpop.f32.mrf.mxu3  ;;  %v1093_v55 = vand.u32 2147483648, %v1081_v16  ;;  %v1091_v27 = vand.u32 2147483647, %v1081_v16  ;;  %vm1087_vm11 = vweird.f32 %v1081_v16 }
 0x26e   :  { %v1075_v56 = vor.u32 1.1754944e-38, %v1074_v18  ;;  %vm1073_vm14 = vcmp.eq.f32.partialorder %v1072_v19, 8.507059e+37 }
 0x26f   :  { %v1094_v42 = vor.u32 1.1754944e-38, %v1093_v55  ;;  %vm1092_vm15 = vcmp.eq.f32.partialorder %v1091_v27, 8.507059e+37  ;;  %v6085_v27 = vld [vmem:[#allocation36_spill] sm:$0xff] }
 0x270   :  { %v4337_v11 = vpop.eup %4336 }
 0x271   :  { %v1101_v40 = vadd.f32 1.0, %v4337_v11 }
 0x272   :  { %v4339_v36 = vpop.eup %4338 }
 0x273   :  { %v4341_v63 = vpop.eup %4340  ;;  %v1064_v50 = vmul.f32 %v4339_v36, %v1062_v57  ;;  %4342 = vrcp.f32 %v1101_v40  ;;  %vm1069_vm8 = vweird.f32 %v4339_v36  ;;  %vm1107_vm1 = vweird.f32 %v1101_v40 }
 0x274   :  { %v1083_v24 = vmul.f32 %v4341_v63, %v1081_v16  ;;  %4344 = vtanh.f32 %v1057_v5  ;;  %vm1088_vm9 = vweird.f32 %v4341_v63  ;;  %vm1070_vm12 = vmor %vm1068_vm10, %vm1069_vm8 }
 0x275   :  { %v1065_v30 = vsub.f32 1.0, %v1064_v50  ;;  %vm1089_vm13 = vmor %vm1087_vm11, %vm1088_vm9 }
 0x276   :  { %v1084_v17 = vsub.f32 1.0, %v1083_v24 }
 0x277   :  { %v1066_v28 = vmul.f32 %v4339_v36, %v1065_v30 }
 0x278   :  { %v1085_v6 = vmul.f32 %v4341_v63, %v1084_v17  ;;  %v1113_v17 = vand.u32 2147483648, %v1101_v40 }
 0x279   :  { %v4343_v58 = vpop.eup %4342  ;;  %v1067_v45 = vadd.f32 %v4339_v36, %v1066_v28 }
 0x27a   :  { %v1086_v39 = vadd.f32 %v4341_v63, %v1085_v6  ;;  %v1103_v62 = vmul.f32 %v4343_v58, %v1101_v40  ;;  %v4345_v25 = vpop.eup %4344  ;;  %vm1108_vm0 = vweird.f32 %v4343_v58  ;;  %v1114_v55 = vor.u32 1.1754944e-38, %v1113_v17 }
 0x27b   :  { %v1071_v12 = vsel %vm1070_vm12, %v4339_v36, %v1067_v45  ;;  %v1111_v36 = vand.u32 2147483647, %v1101_v40  ;;  %vm1109_vm2 = vmor %vm1107_vm1, %vm1108_vm0 }
 0x27c   :  { %v1076_v46 = vsel %vm1073_vm14, %v1075_v56, %v1071_v12  ;;  %v1090_v11 = vsel %vm1089_vm13, %v4341_v63, %v1086_v39  ;;  %v1104_v0 = vsub.f32 1.0, %v1103_v62 }
 0x27d   :  { %v1095_v5 = vsel %vm1092_vm15, %v1094_v42, %v1090_v11  ;;  %v1118_v50 = vmul.f32 %v4345_v25, %v1076_v46  ;;  %vm1112_vm3 = vcmp.eq.f32.partialorder %v1111_v36, 8.507059e+37  ;;  %v6086_v25 = vld [vmem:[#allocation38_spill] sm:$0xff] }
 0x27e   :  { %v1117_v24 = vmul.f32 %v1095_v5, %v5241_v29  ;;  %v1105_v30 = vmul.f32 %v4343_v58, %v1104_v0  ;;  %v6084_v29 = vld [vmem:[#allocation34_spill] sm:$0xff]  ;;  %v500_v46 = vadd.f32 %v6086_v25, %v5136_v54 }
 0x27f   :  { %v413_v40 = vadd.f32 %v6084_v29, %v5120_v31 }
 0x280   :  { %v5281_v57 = vadd.f32 %v1118_v50, %v1117_v24  ;;  %v1106_v16 = vadd.f32 %v4343_v58, %v1105_v30 }
 0x282   :  { %4346 = vtanh.f32 %v5281_v57  ;;  %v1110_v18 = vsel %vm1109_vm2, %v4343_v58, %v1106_v16  ;;  %v442_v58 = vadd.f32 %v6085_v27, %v5124_v38 }
 0x283   :  { %v1115_v28 = vsel %vm1112_vm3, %v1114_v55, %v1110_v18 }
 0x288   :  { %v4347_v63 = vpop.eup %4346 }
 0x289   :  { %v1121_v19 = vmul.f32 %v4347_v63, %v1115_v28 }
 0x28b   :  { %v1122_v6 = vpack.c.bf16 %v1121_v19, %v1121_v19  ;;  %v6087_v19 = vld [vmem:[#allocation37_spill] sm:$0xff] }
 0x28d   :  { %1124 = vst [vmem:[#allocation2 + $0x8] sm:$0xf] %v1122_v6  ;;  %1140 = vmatmul.bf16.vlgmr.msra.gmra.mxu0 %v1122_v6  ;;  %1153 = vmatmul.bf16.vlgmr.msra.gmra.mxu1 %v1122_v6 }
 0x28e   :  { %1166 = vmatmul.bf16.vlgmr.msra.gmra.mxu2 %v1122_v6  ;;  %1179 = vmatmul.bf16.vlgmr.msra.gmra.mxu3 %v1122_v6  ;;  %v471_v6 = vadd.f32 %v6087_v19, %v6078_v23 }
 0x28f   :  { %1390 = vmatpush.bf16.msra.mxu0 %v4954_v37  ;;  %1403 = vmatpush.bf16.msra.mxu1 %v4956_v41 }
 0x290   :  { %1416 = vmatpush.bf16.msra.mxu2 %v4958_v47  ;;  %1429 = vmatpush.bf16.msra.mxu3 %v4961_v48 }
 0x293   :  { %1391 = vmatpush.bf16.msra.mxu0 %v4963_v49  ;;  %1404 = vmatpush.bf16.msra.mxu1 %v4966_v53 }
 0x294   :  { %1417 = vmatpush.bf16.msra.mxu2 %v4969_v59  ;;  %1430 = vmatpush.bf16.msra.mxu3 %v4973_v60 }
 0x297   :  { %1392 = vmatpush.bf16.msra.mxu0 %v4975_v61  ;;  %1405 = vmatpush.bf16.msra.mxu1 %v4978_v1 }
 0x298   :  { %1418 = vmatpush.bf16.msra.mxu2 %v4981_v7  ;;  %1431 = vmatpush.bf16.msra.mxu3 %v4985_v8 }
 0x29b   :  { %1393 = vmatpush.bf16.msra.mxu0 %v4987_v9  ;;  %1406 = vmatpush.bf16.msra.mxu1 %v4990_v13 }
 0x29c   :  { %1419 = vmatpush.bf16.msra.mxu2 %v4993_v20  ;;  %1432 = vmatpush.bf16.msra.mxu3 %v4997_v21 }
 0x29f   :  { %1394 = vmatpush.bf16.msra.mxu0 %v4999_v22  ;;  %1407 = vmatpush.bf16.msra.mxu1 %v5002_v26 }
 0x2a0   :  { %1420 = vmatpush.bf16.msra.mxu2 %v5005_v32  ;;  %1433 = vmatpush.bf16.msra.mxu3 %v5009_v33 }
 0x2a3   :  { %1395 = vmatpush.bf16.msra.mxu0 %v5011_v34  ;;  %1408 = vmatpush.bf16.msra.mxu1 %v5014_v35 }
 0x2a4   :  { %1421 = vmatpush.bf16.msra.mxu2 %v5026_v52  ;;  %1434 = vmatpush.bf16.msra.mxu3 %v5019_v43 }
 0x2a7   :  { %1396 = vmatpush.bf16.msra.mxu0 %v5021_v44  ;;  %1409 = vmatpush.bf16.msra.mxu1 %v5024_v51 }
 0x2a8   :  { %1422 = vmatpush.bf16.msra.mxu2 %v5035_v4  ;;  %1435 = vmatpush.bf16.msra.mxu3 %v5031_v2 }
 0x2ab   :  { %1397 = vmatpush.bf16.msra.mxu0 %v5033_v3  ;;  %1410 = vmatpush.bf16.msra.mxu1 %v5038_v10 }
 0x2ac   :  { %1423 = vmatpush.bf16.msra.mxu2 %v5041_v14  ;;  %1436 = vmatpush.bf16.msra.mxu3 %v5045_v15 }
 0x30a   :  { %v1141_v45 = vpop.f32.mrf.mxu0  ;;  %v1154_v56 = vpop.f32.mrf.mxu1 }
 0x30b   :  { %v1184_v39 = vadd.f32 %v1141_v45, %v413_v40  ;;  %v1185_v62 = vadd.f32 %v1154_v56, %v442_v58 }
 0x30d   :  { %v3794_v42 = vmul.f32 -1.442695, %v1184_v39  ;;  %v3795_v12 = vmul.f32 -1.442695, %v1185_v62 }
 0x30f   :  { %4348 = vpow2.f32 %v3794_v42 }
 0x310   :  { %4350 = vpow2.f32 %v3795_v12 }
 0x311   :  { %v1167_v11 = vpop.f32.mrf.mxu2  ;;  %v1180_v0 = vpop.f32.mrf.mxu3 }
 0x312   :  { %v1187_v5 = vadd.f32 %v1180_v0, %v500_v46  ;;  %v1143_v50 = vpop.f32.mrf.mxu0  ;;  %v1156_v24 = vpop.f32.mrf.mxu1  ;;  %v1186_v27 = vadd.f32 %v1167_v11, %v471_v6 }
 0x314   :  { %v3796_v30 = vmul.f32 -1.442695, %v1187_v5 }
 0x315   :  { %v4349_v16 = vpop.eup %4348 }
 0x316   :  { %v4351_v17 = vpop.eup %4350  ;;  %v1191_v36 = vadd.f32 1.0, %v4349_v16  ;;  %4352 = vpow2.f32 %v3796_v30 }
 0x317   :  { %v1210_v18 = vadd.f32 1.0, %v4351_v17 }
 0x318   :  { %4354 = vrcp.f32 %v1191_v36  ;;  %v1203_v42 = vand.u32 2147483648, %v1191_v36  ;;  %v1201_v46 = vand.u32 2147483647, %v1191_v36  ;;  %vm1197_vm6 = vweird.f32 %v1191_v36 }
 0x319   :  { %4356 = vrcp.f32 %v1210_v18  ;;  %v1169_v55 = vpop.f32.mrf.mxu2  ;;  %v1182_v63 = vpop.f32.mrf.mxu3  ;;  %v1222_v12 = vand.u32 2147483648, %v1210_v18  ;;  %v1220_v5 = vand.u32 2147483647, %v1210_v18  ;;  %vm1216_vm7 = vweird.f32 %v1210_v18 }
 0x31a   :  { %v1204_v11 = vor.u32 1.1754944e-38, %v1203_v42  ;;  %vm1202_vm10 = vcmp.eq.f32.partialorder %v1201_v46, 8.507059e+37 }
 0x31b   :  { %v1223_v17 = vor.u32 1.1754944e-38, %v1222_v12  ;;  %vm1221_vm11 = vcmp.eq.f32.partialorder %v1220_v5, 8.507059e+37  ;;  %v6088_v5 = vld [vmem:[#allocation39_spill] sm:$0xff] }
 0x31c   :  { %v4353_v28 = vpop.eup %4352 }
 0x31d   :  { %v1230_v29 = vadd.f32 1.0, %v4353_v28 }
 0x31e   :  { %v4355_v40 = vpop.eup %4354 }
 0x31f   :  { %v4357_v58 = vpop.eup %4356  ;;  %v1193_v45 = vmul.f32 %v4355_v40, %v1191_v36  ;;  %4358 = vrcp.f32 %v1230_v29  ;;  %vm1198_vm4 = vweird.f32 %v4355_v40  ;;  %vm1236_vm13 = vweird.f32 %v1230_v29 }
 0x320   :  { %v1212_v56 = vmul.f32 %v4357_v58, %v1210_v18  ;;  %4360 = vtanh.f32 %v1186_v27  ;;  %vm1217_vm5 = vweird.f32 %v4357_v58  ;;  %vm1199_vm8 = vmor %vm1197_vm6, %vm1198_vm4 }
 0x321   :  { %v1194_v39 = vsub.f32 1.0, %v1193_v45  ;;  %vm1218_vm9 = vmor %vm1216_vm7, %vm1217_vm5 }
 0x322   :  { %v1213_v62 = vsub.f32 1.0, %v1212_v56 }
 0x323   :  { %v1195_v25 = vmul.f32 %v4355_v40, %v1194_v39 }
 0x324   :  { %v1214_v0 = vmul.f32 %v4357_v58, %v1213_v62  ;;  %v1242_v62 = vand.u32 2147483648, %v1230_v29 }
 0x325   :  { %v4359_v50 = vpop.eup %4358  ;;  %v1196_v24 = vadd.f32 %v4355_v40, %v1195_v25 }
 0x326   :  { %v1215_v30 = vadd.f32 %v4357_v58, %v1214_v0  ;;  %v1232_v16 = vmul.f32 %v4359_v50, %v1230_v29  ;;  %v4361_v63 = vpop.eup %4360  ;;  %vm1237_vm12 = vweird.f32 %v4359_v50  ;;  %v1243_v12 = vor.u32 1.1754944e-38, %v1242_v62 }
 0x327   :  { %v1200_v55 = vsel %vm1199_vm8, %v4355_v40, %v1196_v24  ;;  %v1240_v40 = vand.u32 2147483647, %v1230_v29  ;;  %vm1238_vm14 = vmor %vm1236_vm13, %vm1237_vm12  ;;  %v6089_v24 = vld [vmem:[#allocation40_spill] sm:$0xff] }
 0x328   :  { %v1205_v28 = vsel %vm1202_vm10, %v1204_v11, %v1200_v55  ;;  %v1219_v19 = vsel %vm1218_vm9, %v4357_v58, %v1215_v30  ;;  %v1233_v6 = vsub.f32 1.0, %v1232_v16 }
 0x329   :  { %v1224_v27 = vsel %vm1221_vm11, %v1223_v17, %v1219_v19  ;;  %v1247_v45 = vmul.f32 %v4361_v63, %v1205_v28  ;;  %vm1241_vm15 = vcmp.eq.f32.partialorder %v1240_v40, 8.507059e+37  ;;  %v6090_v63 = vld [vmem:[#allocation43_spill] sm:$0xff] }
 0x32a   :  { %v1246_v56 = vmul.f32 %v1224_v27, %v5281_v57  ;;  %v1234_v39 = vmul.f32 %v4359_v50, %v1233_v6 }
 0x32c   :  { %v5325_v36 = vadd.f32 %v1247_v45, %v1246_v56  ;;  %v1235_v18 = vadd.f32 %v4359_v50, %v1234_v39 }
 0x32e   :  { %4362 = vtanh.f32 %v5325_v36  ;;  %v1239_v42 = vsel %vm1238_vm14, %v4359_v50, %v1235_v18 }
 0x32f   :  { %v1244_v25 = vsel %vm1241_vm15, %v1243_v12, %v1239_v42 }
 0x334   :  { %v4363_v58 = vpop.eup %4362 }
 0x335   :  { %v1250_v46 = vmul.f32 %v4363_v58, %v1244_v25  ;;  %v6091_v25 = vld [vmem:[#allocation41_spill] sm:$0xff] }
 0x337   :  { %v1251_v0 = vpack.c.bf16 %v1250_v46, %v1250_v46 }
 0x339   :  { %1253 = vst [vmem:[#allocation2 + $0xc] sm:$0xf] %v1251_v0  ;;  %1269 = vmatmul.bf16.vlgmr.msrb.gmra.mxu0 %v1251_v0  ;;  %1282 = vmatmul.bf16.vlgmr.msrb.gmra.mxu1 %v1251_v0 }
 0x33a   :  { %1295 = vmatmul.bf16.vlgmr.msrb.gmra.mxu2 %v1251_v0  ;;  %1308 = vmatmul.bf16.vlgmr.msrb.gmra.mxu3 %v1251_v0 }
 0x33b   :  { %1519 = vmatpush.bf16.msrb.mxu0 %v4954_v37  ;;  %1532 = vmatpush.bf16.msrb.mxu1 %v4956_v41 }
 0x33c   :  { %1545 = vmatpush.bf16.msrb.mxu2 %v4958_v47  ;;  %1558 = vmatpush.bf16.msrb.mxu3 %v4961_v48 }
 0x33f   :  { %1520 = vmatpush.bf16.msrb.mxu0 %v4963_v49  ;;  %1533 = vmatpush.bf16.msrb.mxu1 %v4966_v53 }
 0x340   :  { %1546 = vmatpush.bf16.msrb.mxu2 %v4969_v59  ;;  %1559 = vmatpush.bf16.msrb.mxu3 %v4973_v60 }
 0x343   :  { %1521 = vmatpush.bf16.msrb.mxu0 %v4975_v61  ;;  %1534 = vmatpush.bf16.msrb.mxu1 %v4978_v1 }
 0x344   :  { %1547 = vmatpush.bf16.msrb.mxu2 %v4981_v7  ;;  %1560 = vmatpush.bf16.msrb.mxu3 %v4985_v8 }
 0x347   :  { %1522 = vmatpush.bf16.msrb.mxu0 %v4987_v9  ;;  %1535 = vmatpush.bf16.msrb.mxu1 %v4990_v13 }
 0x348   :  { %1548 = vmatpush.bf16.msrb.mxu2 %v4993_v20  ;;  %1561 = vmatpush.bf16.msrb.mxu3 %v4997_v21 }
 0x34b   :  { %1523 = vmatpush.bf16.msrb.mxu0 %v4999_v22  ;;  %1536 = vmatpush.bf16.msrb.mxu1 %v5002_v26 }
 0x34c   :  { %1549 = vmatpush.bf16.msrb.mxu2 %v5005_v32  ;;  %1562 = vmatpush.bf16.msrb.mxu3 %v5009_v33 }
 0x34f   :  { %1524 = vmatpush.bf16.msrb.mxu0 %v5011_v34  ;;  %1537 = vmatpush.bf16.msrb.mxu1 %v5014_v35 }
 0x350   :  { %1550 = vmatpush.bf16.msrb.mxu2 %v5026_v52  ;;  %1563 = vmatpush.bf16.msrb.mxu3 %v5019_v43 }
 0x353   :  { %1525 = vmatpush.bf16.msrb.mxu0 %v5021_v44  ;;  %1538 = vmatpush.bf16.msrb.mxu1 %v5024_v51 }
 0x354   :  { %1551 = vmatpush.bf16.msrb.mxu2 %v5035_v4  ;;  %1564 = vmatpush.bf16.msrb.mxu3 %v5031_v2 }
 0x357   :  { %1526 = vmatpush.bf16.msrb.mxu0 %v5033_v3  ;;  %1539 = vmatpush.bf16.msrb.mxu1 %v5038_v10 }
 0x358   :  { %1552 = vmatpush.bf16.msrb.mxu2 %v5041_v14  ;;  %1565 = vmatpush.bf16.msrb.mxu3 %v5045_v15 }
 0x3b6   :  { %v1270_v57 = vpop.f32.mrf.mxu0  ;;  %v1283_v29 = vpop.f32.mrf.mxu1 }
 0x3b7   :  { %v1313_v50 = vadd.f32 %v1270_v57, %v6088_v5  ;;  %v1314_v11 = vadd.f32 %v1283_v29, %v6089_v24 }
 0x3b9   :  { %v3797_v30 = vmul.f32 -1.442695, %v1313_v50  ;;  %v3798_v16 = vmul.f32 -1.442695, %v1314_v11 }
 0x3bb   :  { %4364 = vpow2.f32 %v3797_v30 }
 0x3bc   :  { %4366 = vpow2.f32 %v3798_v16 }
 0x3bd   :  { %v1296_v17 = vpop.f32.mrf.mxu2  ;;  %v1309_v55 = vpop.f32.mrf.mxu3 }
 0x3be   :  { %v1316_v28 = vadd.f32 %v1309_v55, %v6090_v63  ;;  %v1272_v19 = vpop.f32.mrf.mxu0  ;;  %v1285_v6 = vpop.f32.mrf.mxu1  ;;  %v1315_v46 = vadd.f32 %v1296_v17, %v6091_v25 }
 0x3c0   :  { %v3799_v27 = vmul.f32 -1.442695, %v1316_v28 }
 0x3c1   :  { %v4365_v45 = vpop.eup %4364 }
 0x3c2   :  { %v4367_v56 = vpop.eup %4366  ;;  %v1320_v39 = vadd.f32 1.0, %v4365_v45  ;;  %4368 = vpow2.f32 %v3799_v27 }
 0x3c3   :  { %v1339_v18 = vadd.f32 1.0, %v4367_v56 }
 0x3c4   :  { %4370 = vrcp.f32 %v1320_v39  ;;  %v1332_v24 = vand.u32 2147483648, %v1320_v39  ;;  %v1330_v16 = vand.u32 2147483647, %v1320_v39  ;;  %vm1326_vm2 = vweird.f32 %v1320_v39 }
 0x3c5   :  { %4372 = vrcp.f32 %v1339_v18  ;;  %v1298_v62 = vpop.f32.mrf.mxu2  ;;  %v1311_v40 = vpop.f32.mrf.mxu3  ;;  %v1351_v11 = vand.u32 2147483648, %v1339_v18  ;;  %v1349_v63 = vand.u32 2147483647, %v1339_v18  ;;  %vm1345_vm3 = vweird.f32 %v1339_v18 }
 0x3c6   :  { %v1333_v17 = vor.u32 1.1754944e-38, %v1332_v24  ;;  %vm1331_vm6 = vcmp.eq.f32.partialorder %v1330_v16, 8.507059e+37 }
 0x3c7   :  { %v1352_v45 = vor.u32 1.1754944e-38, %v1351_v11  ;;  %vm1350_vm7 = vcmp.eq.f32.partialorder %v1349_v63, 8.507059e+37 }
 0x3c8   :  { %v4369_v42 = vpop.eup %4368 }
 0x3c9   :  { %v1359_v12 = vadd.f32 1.0, %v4369_v42 }
 0x3ca   :  { %v4371_v58 = vpop.eup %4370 }
 0x3cb   :  { %v4373_v0 = vpop.eup %4372  ;;  %v1322_v57 = vmul.f32 %v4371_v58, %v1320_v39  ;;  %4374 = vrcp.f32 %v1359_v12  ;;  %vm1327_vm0 = vweird.f32 %v4371_v58  ;;  %vm1365_vm9 = vweird.f32 %v1359_v12 }
 0x3cc   :  { %v1341_v29 = vmul.f32 %v4373_v0, %v1339_v18  ;;  %4376 = vtanh.f32 %v1315_v46  ;;  %vm1346_vm1 = vweird.f32 %v4373_v0  ;;  %vm1328_vm4 = vmor %vm1326_vm2, %vm1327_vm0 }
 0x3cd   :  { %v1323_v5 = vsub.f32 1.0, %v1322_v57  ;;  %vm1347_vm5 = vmor %vm1345_vm3, %vm1346_vm1 }
 0x3ce   :  { %v1342_v50 = vsub.f32 1.0, %v1341_v29 }
 0x3cf   :  { %v1324_v30 = vmul.f32 %v4371_v58, %v1323_v5 }
 0x3d0   :  { %v1343_v55 = vmul.f32 %v4373_v0, %v1342_v50  ;;  %v1371_v50 = vand.u32 2147483648, %v1359_v12 }
 0x3d1   :  { %v4375_v28 = vpop.eup %4374  ;;  %v1325_v19 = vadd.f32 %v4371_v58, %v1324_v30 }
 0x3d2   :  { %v1344_v6 = vadd.f32 %v4373_v0, %v1343_v55  ;;  %v1361_v27 = vmul.f32 %v4375_v28, %v1359_v12  ;;  %v4377_v62 = vpop.eup %4376  ;;  %vm1366_vm8 = vweird.f32 %v4375_v28  ;;  %v1372_v11 = vor.u32 1.1754944e-38, %v1371_v50 }
 0x3d3   :  { %v1329_v56 = vsel %vm1328_vm4, %v4371_v58, %v1325_v19  ;;  %v1369_v58 = vand.u32 2147483647, %v1359_v12  ;;  %vm1367_vm10 = vmor %vm1365_vm9, %vm1366_vm8 }
 0x3d4   :  { %v1334_v40 = vsel %vm1331_vm6, %v1333_v17, %v1329_v56  ;;  %v1348_v42 = vsel %vm1347_vm5, %v4373_v0, %v1344_v6  ;;  %v1362_v25 = vsub.f32 1.0, %v1361_v27 }
 0x3d5   :  { %v1353_v46 = vsel %vm1350_vm7, %v1352_v45, %v1348_v42  ;;  %v1376_v57 = vmul.f32 %v4377_v62, %v1334_v40  ;;  %vm1370_vm11 = vcmp.eq.f32.partialorder %v1369_v58, 8.507059e+37 }
 0x3d6   :  { %v1375_v29 = vmul.f32 %v1353_v46, %v5325_v36  ;;  %v1363_v5 = vmul.f32 %v4375_v28, %v1362_v25 }
 0x3d8   :  { %v5365_v39 = vadd.f32 %v1376_v57, %v1375_v29  ;;  %v1364_v18 = vadd.f32 %v4375_v28, %v1363_v5 }
 0x3da   :  { %4378 = vtanh.f32 %v5365_v39  ;;  %v1368_v24 = vsel %vm1367_vm10, %v4375_v28, %v1364_v18 }
 0x3db   :  { %v1373_v30 = vsel %vm1370_vm11, %v1372_v11, %v1368_v24 }
 0x3e0   :  { %v4379_v0 = vpop.eup %4378 }
 0x3e1   :  { %v1379_v16 = vmul.f32 %v4379_v0, %v1373_v30 }
 0x3e3   :  { %v1380_v55 = vpack.c.bf16 %v1379_v16, %v1379_v16 }
 0x3e5   :  { %1382 = vst [vmem:[#allocation2 + $0x10] sm:$0xf] %v1380_v55  ;;  %1398 = vmatmul.bf16.vlgmr.msra.gmra.mxu0 %v1380_v55  ;;  %1411 = vmatmul.bf16.vlgmr.msra.gmra.mxu1 %v1380_v55 }
 0x3e6   :  { %1424 = vmatmul.bf16.vlgmr.msra.gmra.mxu2 %v1380_v55  ;;  %1437 = vmatmul.bf16.vlgmr.msra.gmra.mxu3 %v1380_v55 }
 0x3e7   :  { %1648 = vmatpush.bf16.msra.mxu0 %v4954_v37  ;;  %1661 = vmatpush.bf16.msra.mxu1 %v4956_v41  ;;  %v6092_v37 = vld [vmem:[#allocation42_spill] sm:$0xff] }
 0x3e8   :  { %1674 = vmatpush.bf16.msra.mxu2 %v4958_v47  ;;  %1687 = vmatpush.bf16.msra.mxu3 %v4961_v48  ;;  %v418_v41 = vadd.f32 %v6092_v37, %v5120_v31  ;;  %v6093_v47 = vld [vmem:[#allocation44_spill] sm:$0xff] }
 0x3e9   :  { %v447_v48 = vadd.f32 %v6093_v47, %v5124_v38 }
 0x3eb   :  { %1649 = vmatpush.bf16.msra.mxu0 %v4963_v49  ;;  %1662 = vmatpush.bf16.msra.mxu1 %v4966_v53 }
 0x3ec   :  { %1675 = vmatpush.bf16.msra.mxu2 %v4969_v59  ;;  %1688 = vmatpush.bf16.msra.mxu3 %v4973_v60 }
 0x3ef   :  { %1650 = vmatpush.bf16.msra.mxu0 %v4975_v61  ;;  %1663 = vmatpush.bf16.msra.mxu1 %v4978_v1 }
 0x3f0   :  { %1676 = vmatpush.bf16.msra.mxu2 %v4981_v7  ;;  %1689 = vmatpush.bf16.msra.mxu3 %v4985_v8  ;;  %v6094_v7 = vld [vmem:[#allocation46_spill] sm:$0xff] }
 0x3f1   :  { %v505_v8 = vadd.f32 %v6094_v7, %v5136_v54  ;;  %v3941_v7 = vld [vmem:[#allocation9 + $0xf0] sm:$0xf0] }
 0x3f3   :  { %1651 = vmatpush.bf16.msra.mxu0 %v4987_v9  ;;  %1664 = vmatpush.bf16.msra.mxu1 %v4990_v13 }
 0x3f4   :  { %1677 = vmatpush.bf16.msra.mxu2 %v4993_v20  ;;  %1690 = vmatpush.bf16.msra.mxu3 %v4997_v21 }
 0x3f7   :  { %1652 = vmatpush.bf16.msra.mxu0 %v4999_v22  ;;  %1665 = vmatpush.bf16.msra.mxu1 %v5002_v26 }
 0x3f8   :  { %1678 = vmatpush.bf16.msra.mxu2 %v5005_v32  ;;  %1691 = vmatpush.bf16.msra.mxu3 %v5009_v33 }
 0x3fb   :  { %1653 = vmatpush.bf16.msra.mxu0 %v5011_v34  ;;  %1666 = vmatpush.bf16.msra.mxu1 %v5014_v35 }
 0x3fc   :  { %1679 = vmatpush.bf16.msra.mxu2 %v5026_v52  ;;  %1692 = vmatpush.bf16.msra.mxu3 %v5019_v43  ;;  %v6095_v52 = vld [vmem:[#allocation45_spill] sm:$0xff] }
 0x3ff   :  { %1654 = vmatpush.bf16.msra.mxu0 %v5021_v44  ;;  %1667 = vmatpush.bf16.msra.mxu1 %v5024_v51 }
 0x400   :  { %1680 = vmatpush.bf16.msra.mxu2 %v5035_v4  ;;  %1693 = vmatpush.bf16.msra.mxu3 %v5031_v2  ;;  %v476_v2 = vadd.f32 %v6095_v52, %v6078_v23  ;;  %v4236_v52 = vld [vmem:[#allocation9 + $0xcc] sm:$0xf0] }
 0x403   :  { %1655 = vmatpush.bf16.msra.mxu0 %v5033_v3  ;;  %1668 = vmatpush.bf16.msra.mxu1 %v5038_v10 }
 0x404   :  { %1681 = vmatpush.bf16.msra.mxu2 %v5041_v14  ;;  %1694 = vmatpush.bf16.msra.mxu3 %v5045_v15 }
 0x462   :  { %v1399_v49 = vpop.f32.mrf.mxu0  ;;  %v1412_v53 = vpop.f32.mrf.mxu1 }
 0x463   :  { %v1442_v59 = vadd.f32 %v1399_v49, %v418_v41  ;;  %v1443_v60 = vadd.f32 %v1412_v53, %v447_v48 }
 0x465   :  { %v3800_v61 = vmul.f32 -1.442695, %v1442_v59  ;;  %v3801_v1 = vmul.f32 -1.442695, %v1443_v60  ;;  %v4240_v60 = vld [vmem:[#allocation9 + $0xec] sm:$0xf0] }
 0x467   :  { %4380 = vpow2.f32 %v3800_v61  ;;  %v4238_v61 = vld [vmem:[#allocation9 + $0xe4] sm:$0xf] }
 0x468   :  { %4382 = vpow2.f32 %v3801_v1 }
 0x469   :  { %v1425_v9 = vpop.f32.mrf.mxu2  ;;  %v1438_v13 = vpop.f32.mrf.mxu3 }
 0x46a   :  { %v1445_v20 = vadd.f32 %v1438_v13, %v505_v8  ;;  %v1401_v21 = vpop.f32.mrf.mxu0  ;;  %v1414_v22 = vpop.f32.mrf.mxu1  ;;  %v1444_v10 = vadd.f32 %v1425_v9, %v476_v2  ;;  %v3947_v8 = vld [vmem:[#allocation9 + $0xe8] sm:$0xf]  ;;  %v4241_v9 = vld [vmem:[#allocation9 + $0xf4] sm:$0xf0]  ;;  %v4234_v2 = vld [vmem:[#allocation9 + $0xc4] sm:$0xf] }
 0x46b   :  { %v3944_v21 = vor.u32 %v4238_v61, %v3941_v7  ;;  %v3948_v22 = vor.u32 %v4241_v9, %v3947_v8 }
 0x46c   :  { %v3802_v26 = vmul.f32 -1.442695, %v1445_v20 }
 0x46d   :  { %v4381_v32 = vpop.eup %4380 }
 0x46e   :  { %v4383_v33 = vpop.eup %4382  ;;  %v1449_v34 = vadd.f32 1.0, %v4381_v32  ;;  %4384 = vpow2.f32 %v3802_v26  ;;  %v4239_v26 = vld [vmem:[#allocation9 + $0xec] sm:$0xf]  ;;  %v3949_v32 = vld [vmem:[#allocation9 + $0xf8] sm:$0xf0] }
 0x46f   :  { %v1468_v35 = vadd.f32 1.0, %v4383_v33  ;;  %v6096_v33 = vld [vmem:[#allocation47_spill] sm:$0xff] }
 0x470   :  { %4386 = vrcp.f32 %v1449_v34  ;;  %v1461_v28 = vand.u32 2147483648, %v1449_v34  ;;  %v1459_v6 = vand.u32 2147483647, %v1449_v34  ;;  %vm1455_vm14 = vweird.f32 %v1449_v34 }
 0x471   :  { %4388 = vrcp.f32 %v1468_v35  ;;  %v1427_v43 = vpop.f32.mrf.mxu2  ;;  %v1440_v44 = vpop.f32.mrf.mxu3  ;;  %v1480_v19 = vand.u32 2147483648, %v1468_v35  ;;  %v1478_v45 = vand.u32 2147483647, %v1468_v35  ;;  %vm1474_vm15 = vweird.f32 %v1468_v35 }
 0x472   :  { %v1462_v40 = vor.u32 1.1754944e-38, %v1461_v28  ;;  %vm1460_vm2 = vcmp.eq.f32.partialorder %v1459_v6, 8.507059e+37  ;;  %v3952_v44 = vor.u32 %v4239_v26, %v3949_v32  ;;  %v4232_v6 = vld [vmem:[#allocation9 + $0xac] sm:$0xf0] }
 0x473   :  { %v1481_v46 = vor.u32 1.1754944e-38, %v1480_v19  ;;  %vm1479_vm3 = vcmp.eq.f32.partialorder %v1478_v45, 8.507059e+37  ;;  %v3933_v19 = vld [vmem:[#allocation9 + $0xd8] sm:$0xf0]  ;;  %v4224_v26 = vld [vmem:[#allocation9 + $0x6c] sm:$0xf0] }
 0x474   :  { %v4385_v51 = vpop.eup %4384 }
 0x475   :  { %v1488_v3 = vadd.f32 1.0, %v4385_v51  ;;  %v3923_v51 = vld [vmem:[#allocation9 + $0xc0] sm:$0xf] }
 0x476   :  { %v4387_v4 = vpop.eup %4386 }
 0x477   :  { %v4389_v14 = vpop.eup %4388  ;;  %v1451_v15 = vmul.f32 %v4387_v4, %v1449_v34  ;;  %4390 = vrcp.f32 %v1488_v3  ;;  %vm1456_vm12 = vweird.f32 %v4387_v4  ;;  %v1500_v55 = vand.u32 2147483648, %v1488_v3 }
 0x478   :  { %v1470_v36 = vmul.f32 %v4389_v14, %v1468_v35  ;;  %4392 = vtanh.f32 %v1444_v10  ;;  %vm1475_vm13 = vweird.f32 %v4389_v14  ;;  %vm1457_vm0 = vmor %vm1455_vm14, %vm1456_vm12  ;;  %vm1494_vm5 = vweird.f32 %v1488_v3  ;;  %v6097_v35 = vld [vmem:[#allocation48_spill] sm:$0xff] }
 0x479   :  { %v1452_v12 = vsub.f32 1.0, %v1451_v15  ;;  %vm1476_vm1 = vmor %vm1474_vm15, %vm1475_vm13  ;;  %v1498_v37 = vand.u32 2147483647, %v1488_v3  ;;  %v1501_v47 = vor.u32 1.1754944e-38, %v1500_v55  ;;  %v3924_v10 = vor.u32 %v4236_v52, %v3923_v51  ;;  %v4228_v55 = vld [vmem:[#allocation9 + $0x8c] sm:$0xf0] }
 0x47a   :  { %v1471_v63 = vsub.f32 1.0, %v1470_v36  ;;  %v3931_v36 = vld [vmem:[#allocation9 + $0xc8] sm:$0xf]  ;;  %v4225_v51 = vld [vmem:[#allocation9 + $0x74] sm:$0xf0] }
 0x47b   :  { %v1453_v17 = vmul.f32 %v4387_v4, %v1452_v12  ;;  %vm1499_vm7 = vcmp.eq.f32.partialorder %v1498_v37, 8.507059e+37  ;;  %v4237_v12 = vld [vmem:[#allocation9 + $0xd4] sm:$0xf0]  ;;  %v4226_v37 = vld [vmem:[#allocation9 + $0x84] sm:$0xf] }
 0x47c   :  { %v1472_v27 = vmul.f32 %v4389_v14, %v1471_v63  ;;  %v4235_v63 = vld [vmem:[#allocation9 + $0xcc] sm:$0xf]  ;;  %v3932_v28 = vor.u32 %v4237_v12, %v3931_v36 }
 0x47d   :  { %v4391_v56 = vpop.eup %4390  ;;  %v1454_v62 = vadd.f32 %v4387_v4, %v1453_v17  ;;  %v3907_v17 = vld [vmem:[#allocation9 + $0xa0] sm:$0xf] }
 0x47e   :  { %v1473_v42 = vadd.f32 %v4389_v14, %v1472_v27  ;;  %v1490_v25 = vmul.f32 %v4391_v56, %v1488_v3  ;;  %v4393_v29 = vpop.eup %4392  ;;  %vm1495_vm4 = vweird.f32 %v4391_v56  ;;  %v3936_v27 = vor.u32 %v4235_v63, %v3933_v19  ;;  %v4220_v63 = vld [vmem:[#allocation9 + $0x4c] sm:$0xf0] }
 0x47f   :  { %v1458_v57 = vsel %vm1457_vm0, %v4387_v4, %v1454_v62  ;;  %vm1496_vm6 = vmor %vm1494_vm5, %vm1495_vm4  ;;  %v3908_v45 = vor.u32 %v4232_v6, %v3907_v17  ;;  %v3909_v62 = vld [vmem:[#allocation9 + $0xb0] sm:$0xf0] }
 0x480   :  { %v1463_v5 = vsel %vm1460_vm2, %v1462_v40, %v1458_v57  ;;  %v1477_v18 = vsel %vm1476_vm1, %v4389_v14, %v1473_v42  ;;  %v1491_v50 = vsub.f32 1.0, %v1490_v25  ;;  %v3925_v14 = vld [vmem:[#allocation9 + $0xd0] sm:$0xf0]  ;;  %v3915_v40 = vld [vmem:[#allocation9 + $0xa8] sm:$0xf] }
 0x481   :  { %v1482_v58 = vsel %vm1479_vm3, %v1481_v46, %v1477_v18  ;;  %v1505_v24 = vmul.f32 %v4393_v29, %v1463_v5  ;;  %v3928_v15 = vor.u32 %v4234_v2, %v3925_v14  ;;  %v4233_v57 = vld [vmem:[#allocation9 + $0xb4] sm:$0xf0]  ;;  %v4231_v29 = vld [vmem:[#allocation9 + $0xac] sm:$0xf]  ;;  %v3917_v5 = vld [vmem:[#allocation9 + $0xb8] sm:$0xf0] }
 0x482   :  { %v1504_v11 = vmul.f32 %v1482_v58, %v5365_v39  ;;  %v1492_v0 = vmul.f32 %v4391_v56, %v1491_v50  ;;  %v3939_v39 = vld [vmem:[#allocation9 + $0xe0] sm:$0xf]  ;;  %v6099_v2 = vld [vmem:[#allocation49_spill] sm:$0xff]  ;;  %v3885_v14 = vld [vmem:[#allocation9 + $0x78] sm:$0xf0] }
 0x483   :  { %v3940_v1 = vor.u32 %v4240_v60, %v3939_v39  ;;  %v6098_v18 = vld [vmem:[#allocation51_spill] sm:$0xff]  ;;  %v4227_v39 = vld [vmem:[#allocation9 + $0x8c] sm:$0xf]  ;;  %v3901_v60 = vld [vmem:[#allocation9 + $0x98] sm:$0xf0] }
 0x484   :  { %v5409_v30 = vadd.f32 %v1505_v24, %v1504_v11  ;;  %v1493_v16 = vadd.f32 %v4391_v56, %v1492_v0  ;;  %v3916_v11 = vor.u32 %v4233_v57, %v3915_v40  ;;  %v3920_v0 = vor.u32 %v4231_v29, %v3917_v5  ;;  %v3861_v6 = vld [vmem:[#allocation9 + $0x50] sm:$0xf0]  ;;  %v4219_v40 = vld [vmem:[#allocation9 + $0x4c] sm:$0xf]  ;;  %v4216_v5 = vld [vmem:[#allocation9 + $0x2c] sm:$0xf0] }
 0x485   :  { %v3904_v9 = vor.u32 %v4227_v39, %v3901_v60  ;;  %v3853_v39 = vld [vmem:[#allocation9 + $0x38] sm:$0xf0] }
 0x486   :  { %4394 = vtanh.f32 %v5409_v30  ;;  %v1497_v41 = vsel %vm1496_vm6, %v4391_v56, %v1493_v16  ;;  %v4230_v56 = vld [vmem:[#allocation9 + $0xa4] sm:$0xf]  ;;  %v3891_v16 = vld [vmem:[#allocation9 + $0x80] sm:$0xf] }
 0x487   :  { %v1502_v49 = vsel %vm1499_vm7, %v1501_v47, %v1497_v41  ;;  %v3912_v46 = vor.u32 %v4230_v56, %v3909_v62  ;;  %v3892_v41 = vor.u32 %v4228_v55, %v3891_v16  ;;  %v3893_v47 = vld [vmem:[#allocation9 + $0x90] sm:$0xf0] }
 0x48c   :  { %v4395_v48 = vpop.eup %4394 }
 0x48d   :  { %v1508_v53 = vmul.f32 %v4395_v48, %v1502_v49  ;;  %v3899_v48 = vld [vmem:[#allocation9 + $0x88] sm:$0xf]  ;;  %v4229_v49 = vld [vmem:[#allocation9 + $0x94] sm:$0xf0] }
 0x48f   :  { %v1509_v59 = vpack.c.bf16 %v1508_v53, %v1508_v53 }
 0x491   :  { %1511 = vst [vmem:[#allocation2 + $0x14] sm:$0xf] %v1509_v59  ;;  %1527 = vmatmul.bf16.vlgmr.msrb.gmra.mxu0 %v1509_v59  ;;  %1540 = vmatmul.bf16.vlgmr.msrb.gmra.mxu1 %v1509_v59 }
 0x492   :  { %1553 = vmatmul.bf16.vlgmr.msrb.gmra.mxu2 %v1509_v59  ;;  %1566 = vmatmul.bf16.vlgmr.msrb.gmra.mxu3 %v1509_v59  ;;  %v3896_v59 = vor.u32 %v4226_v37, %v3893_v47  ;;  %v3851_v47 = vld [vmem:[#allocation9 + $0x28] sm:$0xf] }
 0x493   :  { %2007 = vmatpush.bf16.msrb.mxu0 %v3940_v1  ;;  %2036 = vmatpush.bf16.msrb.mxu1 %v3944_v21  ;;  %v3900_v1 = vor.u32 %v4229_v49, %v3899_v48 }
 0x494   :  { %2065 = vmatpush.bf16.msrb.mxu2 %v3948_v22  ;;  %2094 = vmatpush.bf16.msrb.mxu3 %v3952_v44  ;;  %v3883_v44 = vld [vmem:[#allocation9 + $0x68] sm:$0xf] }
 0x497   :  { %2008 = vmatpush.bf16.msrb.mxu0 %v3924_v10  ;;  %2037 = vmatpush.bf16.msrb.mxu1 %v3928_v15  ;;  %v4223_v10 = vld [vmem:[#allocation9 + $0x6c] sm:$0xf]  ;;  %v3859_v15 = vld [vmem:[#allocation9 + $0x40] sm:$0xf] }
 0x498   :  { %2066 = vmatpush.bf16.msrb.mxu2 %v3932_v28  ;;  %2095 = vmatpush.bf16.msrb.mxu3 %v3936_v27  ;;  %v3888_v12 = vor.u32 %v4223_v10, %v3885_v14  ;;  %v4218_v28 = vld [vmem:[#allocation9 + $0x44] sm:$0xf]  ;;  %v3860_v17 = vor.u32 %v4220_v63, %v3859_v15  ;;  %v3867_v27 = vld [vmem:[#allocation9 + $0x48] sm:$0xf] }
 0x49b   :  { %2009 = vmatpush.bf16.msrb.mxu0 %v3908_v45  ;;  %2038 = vmatpush.bf16.msrb.mxu1 %v3912_v46  ;;  %v4221_v45 = vld [vmem:[#allocation9 + $0x54] sm:$0xf0] }
 0x49c   :  { %2067 = vmatpush.bf16.msrb.mxu2 %v3916_v11  ;;  %2096 = vmatpush.bf16.msrb.mxu3 %v3920_v0  ;;  %v4214_v11 = vld [vmem:[#allocation9 + $0x24] sm:$0xf]  ;;  %v3845_v0 = vld [vmem:[#allocation9 + $0x30] sm:$0xf0] }
 0x49d   :  { %v3848_v49 = vor.u32 %v4214_v11, %v3845_v0 }
 0x49f   :  { %2010 = vmatpush.bf16.msrb.mxu0 %v3892_v41  ;;  %2039 = vmatpush.bf16.msrb.mxu1 %v3896_v59  ;;  %v4215_v59 = vld [vmem:[#allocation9 + $0x2c] sm:$0xf] }
 0x4a0   :  { %2068 = vmatpush.bf16.msrb.mxu2 %v3900_v1  ;;  %2097 = vmatpush.bf16.msrb.mxu3 %v3904_v9  ;;  %v3856_v1 = vor.u32 %v4215_v59, %v3853_v39  ;;  %v4212_v9 = vld [vmem:[#allocation9 + $0xc] sm:$0xf0]  ;;  %v4270_v39 = vld [vmem:[#allocation10 + $0x1e4] sm:$0xf] }
 0x4a1   :  { %v4272_v59 = vld [vmem:[#allocation10 + $0x1ec] sm:$0xf0] }
 0x4a4   :  { %2098 = vmatpush.bf16.msrb.mxu3 %v3888_v12 }
 0x50e   :  { %v1528_v13 = vpop.f32.mrf.mxu0  ;;  %v1541_v20 = vpop.f32.mrf.mxu1 }
 0x50f   :  { %v1571_v34 = vadd.f32 %v1528_v13, %v6096_v33  ;;  %v1572_v43 = vadd.f32 %v1541_v20, %v6097_v35  ;;  %v3875_v20 = vld [vmem:[#allocation9 + $0x60] sm:$0xf]  ;;  %v4222_v33 = vld [vmem:[#allocation9 + $0x64] sm:$0xf] }
 0x510   :  { %v3876_v32 = vor.u32 %v4224_v26, %v3875_v20  ;;  %v4210_v20 = vld [vmem:[#allocation9 + $0x4] sm:$0xf] }
 0x511   :  { %v3803_v3 = vmul.f32 -1.442695, %v1571_v34  ;;  %v3804_v4 = vmul.f32 -1.442695, %v1572_v43  ;;  %v3877_v34 = vld [vmem:[#allocation9 + $0x70] sm:$0xf0] }
 0x512   :  { %v3880_v43 = vor.u32 %v4222_v33, %v3877_v34  ;;  %2011 = vmatpush.bf16.msrb.mxu0 %v3876_v32  ;;  %v3829_v32 = vld [vmem:[#allocation9 + $0x10] sm:$0xf0]  ;;  %v3835_v33 = vld [vmem:[#allocation9 + $0x8] sm:$0xf]  ;;  %v4213_v34 = vld [vmem:[#allocation9 + $0x14] sm:$0xf0] }
 0x513   :  { %4396 = vpow2.f32 %v3803_v3  ;;  %v3836_v10 = vor.u32 %v4213_v34, %v3835_v33  ;;  %v4051_v34 = vld [vmem:[#allocation10 + $0x1c0] sm:$0xf] }
 0x514   :  { %4398 = vpow2.f32 %v3804_v4  ;;  %v3884_v4 = vor.u32 %v4225_v51, %v3883_v44  ;;  %2040 = vmatpush.bf16.msrb.mxu1 %v3880_v43 }
 0x515   :  { %v1554_v42 = vpop.f32.mrf.mxu2  ;;  %v1567_v25 = vpop.f32.mrf.mxu3 }
 0x516   :  { %v1574_v50 = vadd.f32 %v1567_v25, %v6098_v18  ;;  %v1530_v58 = vpop.f32.mrf.mxu0  ;;  %v1543_v24 = vpop.f32.mrf.mxu1  ;;  %v1573_v3 = vadd.f32 %v1554_v42, %v6099_v2  ;;  %2069 = vmatpush.bf16.msrb.mxu2 %v3884_v4  ;;  %v3869_v42 = vld [vmem:[#allocation9 + $0x58] sm:$0xf0]  ;;  %v3843_v25 = vld [vmem:[#allocation9 + $0x20] sm:$0xf]  ;;  %2012 = vmatpush.bf16.msrb.mxu0 %v3860_v17  ;;  %v4211_v2 = vld [vmem:[#allocation9 + $0xc] sm:$0xf]  ;;  %v3832_v4 = vor.u32 %v4210_v20, %v3829_v32 }
 0x517   :  { %v3868_v58 = vor.u32 %v4221_v45, %v3867_v27  ;;  %v3872_v24 = vor.u32 %v4219_v40, %v3869_v42  ;;  %v3844_v41 = vor.u32 %v4216_v5, %v3843_v25  ;;  %v6102_v5 = vld [vmem:[#allocation50_spill] sm:$0xff] }
 0x518   :  { %v3805_v53 = vmul.f32 -1.442695, %v1574_v50  ;;  %v3864_v50 = vor.u32 %v4218_v28, %v3861_v6 }
 0x519   :  { %v4397_v61 = vpop.eup %4396  ;;  %2099 = vmatpush.bf16.msrb.mxu3 %v3872_v24 }
 0x51a   :  { %v4399_v7 = vpop.eup %4398  ;;  %v5415_v8 = vadd.f32 1.0, %v4397_v61  ;;  %4400 = vpow2.f32 %v3805_v53  ;;  %2041 = vmatpush.bf16.msrb.mxu1 %v3864_v50  ;;  %2070 = vmatpush.bf16.msrb.mxu2 %v3868_v58  ;;  %v4217_v53 = vld [vmem:[#allocation9 + $0x34] sm:$0xf0]  ;;  %v6103_v50 = vld [vmem:[#allocation52_spill] sm:$0xff] }
 0x51b   :  { %v5417_v13 = vadd.f32 1.0, %v4399_v7  ;;  %2013 = vmatpush.bf16.msrb.mxu0 %v3844_v41  ;;  %v3852_v61 = vor.u32 %v4217_v53, %v3851_v47  ;;  %v3827_v7 = vld [vmem:[#allocation9] sm:$0xf]  ;;  %v452_v58 = vadd.f32 %v6103_v50, %v5124_v38  ;;  %v6104_v41 = vld [vmem:[#allocation54_spill] sm:$0xff] }
 0x51c   :  { %4402 = vrcp.f32 %v5415_v8  ;;  %v1588_v35 = vand.u32 2147483647, %v5415_v8  ;;  %v1590_v29 = vand.u32 2147483648, %v5415_v8  ;;  %vm1584_vm12 = vweird.f32 %v5415_v8  ;;  %v4067_v53 = vld [vmem:[#allocation10 + $0x1e0] sm:$0xf] }
 0x51d   :  { %4404 = vrcp.f32 %v5417_v13  ;;  %v1556_v21 = vpop.f32.mrf.mxu2  ;;  %v1569_v22 = vpop.f32.mrf.mxu3  ;;  %v1609_v57 = vand.u32 2147483648, %v5417_v13  ;;  %v1607_v37 = vand.u32 2147483647, %v5417_v13  ;;  %vm1603_vm11 = vweird.f32 %v5417_v13  ;;  %2100 = vmatpush.bf16.msrb.mxu3 %v3856_v1  ;;  %v4069_v1 = vld [vmem:[#allocation10 + $0x1f0] sm:$0xf0] }
 0x51e   :  { %vm5436_vm8 = vcmp.eq.f32.partialorder %v1588_v35, 8.507059e+37  ;;  %v3828_v26 = vor.u32 %v4212_v9, %v3827_v7  ;;  %v1591_v44 = vor.u32 1.1754944e-38, %v1590_v29  ;;  %2042 = vmatpush.bf16.msrb.mxu1 %v3848_v49  ;;  %2071 = vmatpush.bf16.msrb.mxu2 %v3852_v61  ;;  %v4207_v29 = vld [vmem:[#allocation2 + $0x8] sm:$0xff]  ;;  %v510_v47 = vadd.f32 %v6104_v41, %v5136_v54  ;;  %v4077_v9 = vld [vmem:[#allocation10 + $0x1f8] sm:$0xf0] }
 0x51f   :  { %v1610_v43 = vor.u32 1.1754944e-38, %v1609_v57  ;;  %vm1608_vm15 = vcmp.eq.f32.partialorder %v1607_v37, 8.507059e+37  ;;  %v4206_v57 = vld [vmem:[#allocation2] sm:$0xff]  ;;  %v5473_v38 = vor.u32 %v4272_v59, %v4067_v53  ;;  %v4271_v7 = vld [vmem:[#allocation10 + $0x1ec] sm:$0xf]  ;;  %v5475_v20 = vor.u32 %v4270_v39, %v4069_v1 }
 0x520   :  { %v4401_v52 = vpop.eup %4400  ;;  %2014 = vmatpush.bf16.msrb.mxu0 %v3828_v26  ;;  %v4273_v54 = vld [vmem:[#allocation10 + $0x1f4] sm:$0xf0]  ;;  %v4029_v41 = vld [vmem:[#allocation10 + $0x198] sm:$0xf0]  ;;  %v4003_v59 = vld [vmem:[#allocation10 + $0x160] sm:$0xf] }
 0x521   :  { %v5423_v36 = vadd.f32 1.0, %v4401_v52  ;;  %v4265_v53 = vld [vmem:[#allocation10 + $0x1b4] sm:$0xf0]  ;;  %v4256_v39 = vld [vmem:[#allocation10 + $0x16c] sm:$0xf0] }
 0x522   :  { %v5425_v19 = vpop.eup %4402  ;;  %2043 = vmatpush.bf16.msrb.mxu1 %v3832_v4  ;;  %2072 = vmatpush.bf16.msrb.mxu2 %v3836_v10  ;;  %v4061_v10 = vld [vmem:[#allocation10 + $0x1d8] sm:$0xf0] }
 0x523   :  { %v5427_v56 = vpop.eup %4404  ;;  %v1580_v62 = vmul.f32 %v5425_v19, %v5415_v8  ;;  %4406 = vrcp.f32 %v5423_v36  ;;  %vm1585_vm9 = vweird.f32 %v5425_v19  ;;  %v1629_v45 = vand.u32 2147483648, %v5423_v36 }
 0x524   :  { %v1599_v46 = vmul.f32 %v5427_v56, %v5417_v13  ;;  %4408 = vtanh.f32 %v1573_v3  ;;  %vm1604_vm10 = vweird.f32 %v5427_v56  ;;  %vm1586_vm13 = vmor %vm1584_vm12, %vm1585_vm9  ;;  %v3837_v3 = vld [vmem:[#allocation9 + $0x18] sm:$0xf0]  ;;  %vm1623_vm1 = vweird.f32 %v5423_v36 }
 0x525   :  { %v1581_v18 = vsub.f32 1.0, %v1580_v62  ;;  %vm1605_vm14 = vmor %vm1603_vm11, %vm1604_vm10  ;;  %v3840_v63 = vor.u32 %v4211_v2, %v3837_v3  ;;  %v1630_v40 = vor.u32 1.1754944e-38, %v1629_v45  ;;  %v4053_v2 = vld [vmem:[#allocation10 + $0x1d0] sm:$0xf0]  ;;  %v4267_v3 = vld [vmem:[#allocation10 + $0x1cc] sm:$0xf] }
 0x526   :  { %v1600_v16 = vsub.f32 1.0, %v1599_v46  ;;  %v4264_v45 = vld [vmem:[#allocation10 + $0x1ac] sm:$0xf0] }
 0x527   :  { %v1582_v48 = vmul.f32 %v5425_v19, %v1581_v18  ;;  %2101 = vmatpush.bf16.msrb.mxu3 %v3840_v63  ;;  %v423_v18 = vadd.f32 %v6102_v5, %v5120_v31  ;;  %v4260_v5 = vld [vmem:[#allocation10 + $0x18c] sm:$0xf0] }
 0x528   :  { %v1601_v60 = vmul.f32 %v5427_v56, %v1600_v16 }
 0x529   :  { %v4407_v21 = vpop.eup %4406  ;;  %v1583_v22 = vadd.f32 %v5425_v19, %v1582_v48 }
 0x52a   :  { %v4409_v35 = vpop.eup %4408  ;;  %v1602_v51 = vadd.f32 %v5427_v56, %v1601_v60  ;;  %v1619_v52 = vmul.f32 %v4407_v21, %v5423_v36  ;;  %vm1624_vm0 = vweird.f32 %v4407_v21 }
 0x52b   :  { %v1587_v8 = vsel %vm1586_vm13, %v5425_v19, %v1583_v22  ;;  %vm1625_vm2 = vmor %vm1623_vm1, %vm1624_vm0  ;;  %v4075_v22 = vld [vmem:[#allocation10 + $0x1e8] sm:$0xf] }
 0x52c   :  { %v1592_v14 = vsel %vm5436_vm8, %v1591_v44, %v1587_v8  ;;  %v1606_v15 = vsel %vm1605_vm14, %v5427_v56, %v1602_v51  ;;  %v1620_v12 = vsub.f32 1.0, %v1619_v52  ;;  %v1627_v56 = vand.u32 2147483647, %v5423_v36  ;;  %v4208_v36 = vld [vmem:[#allocation2 + $0x10] sm:$0xff] }
 0x52d   :  { %v1611_v28 = vsel %vm1608_vm15, %v1610_v43, %v1606_v15  ;;  %v1634_v17 = vmul.f32 %v4409_v35, %v1592_v14  ;;  %v5480_v32 = vor.u32 %v4273_v54, %v4075_v22  ;;  %v4268_v35 = vld [vmem:[#allocation10 + $0x1cc] sm:$0xf0]  ;;  %v4266_v43 = vld [vmem:[#allocation10 + $0x1c4] sm:$0xf]  ;;  %v4059_v14 = vld [vmem:[#allocation10 + $0x1c8] sm:$0xf] }
 0x52e   :  { %v1633_v13 = vmul.f32 %v1611_v28, %v5409_v30  ;;  %v1621_v6 = vmul.f32 %v4407_v21, %v1620_v12  ;;  %vm1628_vm3 = vcmp.eq.f32.partialorder %v1627_v56, 8.507059e+37  ;;  %v5486_v52 = vor.u32 %v4268_v35, %v4051_v34  ;;  %v4269_v15 = vld [vmem:[#allocation10 + $0x1d4] sm:$0xf0]  ;;  %v4035_v28 = vld [vmem:[#allocation10 + $0x1a0] sm:$0xf] }
 0x52f   :  { %v5491_v4 = vor.u32 %v4266_v43, %v4053_v2  ;;  %v4262_v56 = vld [vmem:[#allocation10 + $0x1a4] sm:$0xf]  ;;  %v4005_v54 = vld [vmem:[#allocation10 + $0x170] sm:$0xf0] }
 0x530   :  { %v5461_v19 = vadd.f32 %v1634_v17, %v1633_v13  ;;  %v1622_v27 = vadd.f32 %v4407_v21, %v1621_v6  ;;  %v6105_v17 = vld [vmem:[#allocation53_spill] sm:$0xff] }
 0x531   :  { %v481_v13 = vadd.f32 %v6105_v17, %v6078_v23  ;;  %v4045_v23 = vld [vmem:[#allocation10 + $0x1b8] sm:$0xf0]  ;;  %v4252_v17 = vld [vmem:[#allocation10 + $0x14c] sm:$0xf0] }
 0x532   :  { %4410 = vtanh.f32 %v5461_v19  ;;  %v1626_v62 = vsel %vm1625_vm2, %v4407_v21, %v1622_v27  ;;  %v5477_v21 = vor.u32 %v4271_v7, %v4077_v9  ;;  %v5500_v27 = vor.u32 %v4267_v3, %v4061_v10  ;;  %v4027_v3 = vld [vmem:[#allocation10 + $0x188] sm:$0xf]  ;;  %v4261_v10 = vld [vmem:[#allocation10 + $0x194] sm:$0xf0] }
 0x533   :  { %v1631_v42 = vsel %vm1628_vm3, %v1630_v40, %v1626_v62  ;;  %v5502_v62 = vor.u32 %v4269_v15, %v4059_v14  ;;  %v3987_v14 = vld [vmem:[#allocation10 + $0x140] sm:$0xf] }
 0x538   :  { %v4411_v30 = vpop.eup %4410 }
 0x539   :  { %v1637_v25 = vmul.f32 %v4411_v30, %v1631_v42  ;;  %v4037_v30 = vld [vmem:[#allocation10 + $0x1b0] sm:$0xf0]  ;;  %v4263_v42 = vld [vmem:[#allocation10 + $0x1ac] sm:$0xf] }
 0x53b   :  { %v1638_v46 = vpack.c.bf16 %v1637_v25, %v1637_v25 }
 0x53d   :  { %1640 = vst [vmem:[#allocation2 + $0x18] sm:$0xf] %v1638_v46  ;;  %1656 = vmatmul.bf16.vlgmr.msra.gmra.mxu0 %v1638_v46  ;;  %1669 = vmatmul.bf16.vlgmr.msra.gmra.mxu1 %v1638_v46 }
 0x53e   :  { %1682 = vmatmul.bf16.vlgmr.msra.gmra.mxu2 %v1638_v46  ;;  %1695 = vmatmul.bf16.vlgmr.msra.gmra.mxu3 %v1638_v46 }
 0x53f   :  { %2357 = vmatpush.bf16.msra.mxu0 %v5473_v38  ;;  %2370 = vmatpush.bf16.msra.mxu1 %v5475_v20 }
 0x540   :  { %2396 = vmatpush.bf16.msra.mxu3 %v5477_v21  ;;  %2383 = vmatpush.bf16.msra.mxu2 %v5480_v32 }
 0x543   :  { %2358 = vmatpush.bf16.msra.mxu0 %v5486_v52  ;;  %2371 = vmatpush.bf16.msra.mxu1 %v5491_v4 }
 0x544   :  { %2397 = vmatpush.bf16.msra.mxu3 %v5500_v27  ;;  %2384 = vmatpush.bf16.msra.mxu2 %v5502_v62 }
 0x54d   :  { %2015 = vmatmul.bf16.vlgmr.msrb.gmra.mxu0 %v4206_v57  ;;  %2044 = vmatmul.bf16.vlgmr.msrb.gmra.mxu1 %v4206_v57 }
 0x54e   :  { %2073 = vmatmul.bf16.vlgmr.msrb.gmra.mxu2 %v4206_v57  ;;  %2102 = vmatmul.bf16.vlgmr.msrb.gmra.mxu3 %v4206_v57  ;;  %v5506_v57 = vor.u32 %v4264_v45, %v4035_v28  ;;  %v5562_v28 = vor.u32 %v4261_v10, %v4027_v3  ;;  %v3979_v3 = vld [vmem:[#allocation10 + $0x128] sm:$0xf] }
 0x550   :  { %2359 = vmatpush.bf16.msra.mxu0 %v5506_v57 }
 0x55d   :  { %2020 = vmatmul.bf16.gmra.mxu0 %v4207_v29  ;;  %2049 = vmatmul.bf16.gmra.mxu1 %v4207_v29 }
 0x55e   :  { %2078 = vmatmul.bf16.gmra.mxu2 %v4207_v29  ;;  %2107 = vmatmul.bf16.gmra.mxu3 %v4207_v29  ;;  %v5508_v29 = vor.u32 %v4262_v56, %v4037_v30  ;;  %v3997_v30 = vld [vmem:[#allocation10 + $0x158] sm:$0xf0] }
 0x560   :  { %2372 = vmatpush.bf16.msra.mxu1 %v5508_v29 }
 0x56d   :  { %2025 = vmatmul.bf16.gmra.mxu0 %v4208_v36  ;;  %2054 = vmatmul.bf16.gmra.mxu1 %v4208_v36 }
 0x56e   :  { %2083 = vmatmul.bf16.gmra.mxu2 %v4208_v36  ;;  %2112 = vmatmul.bf16.gmra.mxu3 %v4208_v36  ;;  %v4019_v36 = vld [vmem:[#allocation10 + $0x180] sm:$0xf] }
 0x5ba   :  { %v1657_v24 = vpop.f32.mrf.mxu0  ;;  %v1670_v11 = vpop.f32.mrf.mxu1 }
 0x5bb   :  { %v1700_v0 = vadd.f32 %v1657_v24, %v423_v18  ;;  %v1701_v16 = vadd.f32 %v1670_v11, %v452_v58  ;;  %v5514_v58 = vor.u32 %v4263_v42, %v4045_v23  ;;  %v4258_v24 = vld [vmem:[#allocation10 + $0x184] sm:$0xf]  ;;  %v4021_v11 = vld [vmem:[#allocation10 + $0x190] sm:$0xf0]  ;;  %v4011_v42 = vld [vmem:[#allocation10 + $0x168] sm:$0xf] }
 0x5bd   :  { %v3806_v55 = vmul.f32 -1.442695, %v1700_v0  ;;  %v3807_v37 = vmul.f32 -1.442695, %v1701_v16  ;;  %v5520_v16 = vor.u32 %v4260_v5, %v4019_v36  ;;  %2398 = vmatpush.bf16.msra.mxu3 %v5514_v58  ;;  %v5583_v5 = vor.u32 %v4252_v17, %v3987_v14  ;;  %v4242_v14 = vld [vmem:[#allocation10 + $0x104] sm:$0xf] }
 0x5be   :  { %v4249_v17 = vld [vmem:[#allocation10 + $0x134] sm:$0xf0] }
 0x5bf   :  { %4412 = vpow2.f32 %v3806_v55  ;;  %v5522_v55 = vor.u32 %v4258_v24, %v4021_v11  ;;  %2360 = vmatpush.bf16.msra.mxu0 %v5520_v16  ;;  %v3971_v24 = vld [vmem:[#allocation10 + $0x120] sm:$0xf]  ;;  %v4245_v36 = vld [vmem:[#allocation10 + $0x114] sm:$0xf0] }
 0x5c0   :  { %4414 = vpow2.f32 %v3807_v37  ;;  %v4259_v37 = vld [vmem:[#allocation10 + $0x18c] sm:$0xf] }
 0x5c1   :  { %v1683_v48 = vpop.f32.mrf.mxu2  ;;  %v1696_v49 = vpop.f32.mrf.mxu3  ;;  %v5539_v9 = vor.u32 %v4259_v37, %v4029_v41  ;;  %2373 = vmatpush.bf16.msra.mxu1 %v5522_v55 }
 0x5c2   :  { %v1703_v31 = vadd.f32 %v1696_v49, %v510_v47  ;;  %v1659_v60 = vpop.f32.mrf.mxu0  ;;  %v1672_v61 = vpop.f32.mrf.mxu1  ;;  %v1702_v46 = vadd.f32 %v1683_v48, %v481_v13  ;;  %v4043_v47 = vld [vmem:[#allocation10 + $0x1a8] sm:$0xf]  ;;  %v4250_v13 = vld [vmem:[#allocation10 + $0x144] sm:$0xf] }
 0x5c3   :  { %v4254_v61 = vld [vmem:[#allocation10 + $0x164] sm:$0xf]  ;;  %v5541_v22 = vor.u32 %v4265_v53, %v4043_v47  ;;  %2399 = vmatpush.bf16.msra.mxu3 %v5539_v9  ;;  %v4248_v47 = vld [vmem:[#allocation10 + $0x12c] sm:$0xf0]  ;;  %v3973_v53 = vld [vmem:[#allocation10 + $0x130] sm:$0xf0] }
 0x5c4   :  { %v3808_v26 = vmul.f32 -1.442695, %v1703_v31 }
 0x5c5   :  { %v4413_v33 = vpop.eup %4412  ;;  %2385 = vmatpush.bf16.msra.mxu2 %v5541_v22 }
 0x5c6   :  { %v4415_v44 = vpop.eup %4414  ;;  %v5484_v51 = vadd.f32 1.0, %v4413_v33  ;;  %4416 = vpow2.f32 %v3808_v26  ;;  %v4255_v26 = vld [vmem:[#allocation10 + $0x16c] sm:$0xf] }
 0x5c7   :  { %v5489_v8 = vadd.f32 1.0, %v4415_v44  ;;  %v5551_v44 = vor.u32 %v4256_v39, %v4003_v59 }
 0x5c8   :  { %4418 = vrcp.f32 %v5484_v51  ;;  %v1717_v6 = vand.u32 2147483647, %v5484_v51  ;;  %v1719_v40 = vand.u32 2147483648, %v5484_v51  ;;  %vm1713_vm5 = vweird.f32 %v5484_v51 }
 0x5c9   :  { %4420 = vrcp.f32 %v5489_v8  ;;  %v1685_v12 = vpop.f32.mrf.mxu2  ;;  %v1698_v63 = vpop.f32.mrf.mxu3  ;;  %v1738_v18 = vand.u32 2147483648, %v5489_v8  ;;  %v1736_v60 = vand.u32 2147483647, %v5489_v8  ;;  %vm1732_vm9 = vweird.f32 %v5489_v8  ;;  %2361 = vmatpush.bf16.msra.mxu0 %v5551_v44  ;;  %2386 = vmatpush.bf16.msra.mxu2 %v5562_v28 }
 0x5ca   :  { %vm5535_vm6 = vcmp.eq.f32.partialorder %v1717_v6, 8.507059e+37  ;;  %v1720_v43 = vor.u32 1.1754944e-38, %v1719_v40  ;;  %v5558_v12 = vor.u32 %v4254_v61, %v4005_v54  ;;  %v3989_v6 = vld [vmem:[#allocation10 + $0x150] sm:$0xf0]  ;;  %v4251_v40 = vld [vmem:[#allocation10 + $0x14c] sm:$0xf] }
 0x5cb   :  { %v1739_v34 = vor.u32 1.1754944e-38, %v1738_v18  ;;  %vm5575_vm11 = vcmp.eq.f32.partialorder %v1736_v60, 8.507059e+37  ;;  %v4257_v18 = vld [vmem:[#allocation10 + $0x174] sm:$0xf0]  ;;  %v5589_v37 = vor.u32 %v4250_v13, %v3989_v6  ;;  %v3995_v60 = vld [vmem:[#allocation10 + $0x148] sm:$0xf] }
 0x5cc   :  { %v4417_v25 = vpop.eup %4416  ;;  %2374 = vmatpush.bf16.msra.mxu1 %v5558_v12  ;;  %v5591_v41 = vor.u32 %v4257_v18, %v4011_v42  ;;  %v4253_v61 = vld [vmem:[#allocation10 + $0x154] sm:$0xf0]  ;;  %v4243_v6 = vld [vmem:[#allocation10 + $0x10c] sm:$0xf] }
 0x5cd   :  { %v5512_v50 = vadd.f32 1.0, %v4417_v25  ;;  %2362 = vmatpush.bf16.msra.mxu0 %v5583_v5 }
 0x5ce   :  { %v5516_v0 = vpop.eup %4418  ;;  %2387 = vmatpush.bf16.msra.mxu2 %v5591_v41 }
 0x5cf   :  { %v5524_v48 = vpop.eup %4420  ;;  %v1709_v49 = vmul.f32 %v5516_v0, %v5484_v51  ;;  %vm1714_vm4 = vweird.f32 %v5516_v0  ;;  %4422 = vrcp.f32 %v5512_v50  ;;  %v4013_v51 = vld [vmem:[#allocation10 + $0x178] sm:$0xf0]  ;;  %vm1752_vm13 = vweird.f32 %v5512_v50 }
 0x5d0   :  { %v1728_v31 = vmul.f32 %v5524_v48, %v5489_v8  ;;  %4424 = vtanh.f32 %v1702_v46  ;;  %vm5545_vm7 = vmor %vm1713_vm5, %vm1714_vm4  ;;  %vm1733_vm8 = vweird.f32 %v5524_v48  ;;  %v5560_v63 = vor.u32 %v4255_v26, %v4013_v51  ;;  %v4247_v26 = vld [vmem:[#allocation10 + $0x12c] sm:$0xf]  ;;  %2375 = vmatpush.bf16.msra.mxu1 %v5589_v37 }
 0x5d1   :  { %v1710_v1 = vsub.f32 1.0, %v1709_v49  ;;  %vm5570_vm10 = vmor %vm1732_vm9, %vm1733_vm8  ;;  %v4246_v49 = vld [vmem:[#allocation10 + $0x124] sm:$0xf]  ;;  %v5612_v51 = vor.u32 %v4253_v61, %v3995_v60  ;;  %v1756_v42 = vand.u32 2147483647, %v5512_v50  ;;  %v5629_v46 = vor.u32 %v4249_v17, %v3979_v3  ;;  %v2045_v60 = vpop.f32.mrf.mxu1  ;;  %v2074_v61 = vpop.f32.mrf.mxu2 }
 0x5d2   :  { %v1729_v33 = vsub.f32 1.0, %v1728_v31  ;;  %2400 = vmatpush.bf16.msra.mxu3 %v5560_v63 }
 0x5d3   :  { %v1711_v2 = vmul.f32 %v5516_v0, %v1710_v1  ;;  %2388 = vmatpush.bf16.msra.mxu2 %v5612_v51  ;;  %vm1757_vm15 = vcmp.eq.f32.partialorder %v1756_v42, 8.507059e+37 }
 0x5d4   :  { %v1730_v15 = vmul.f32 %v5524_v48, %v1729_v33  ;;  %v3981_v33 = vld [vmem:[#allocation10 + $0x138] sm:$0xf0] }
 0x5d5   :  { %v5564_v45 = vpop.eup %4422  ;;  %v1712_v56 = vadd.f32 %v5516_v0, %v1711_v2  ;;  %v4244_v2 = vld [vmem:[#allocation10 + $0x10c] sm:$0xf0] }
 0x5d6   :  { %v4425_v25 = vpop.eup %4424  ;;  %v1731_v23 = vadd.f32 %v5524_v48, %v1730_v15  ;;  %v1748_v8 = vmul.f32 %v5564_v45, %v5512_v50  ;;  %v3957_v15 = vld [vmem:[#allocation10 + $0x110] sm:$0xf0]  ;;  %vm1753_vm12 = vweird.f32 %v5564_v45 }
 0x5d7   :  { %v1716_v11 = vsel %vm5545_vm7, %v5516_v0, %v1712_v56  ;;  %v5599_v0 = vor.u32 %v4251_v40, %v3997_v30  ;;  %v3965_v56 = vld [vmem:[#allocation10 + $0x118] sm:$0xf0]  ;;  %v1758_v40 = vand.u32 2147483648, %v5512_v50  ;;  %vm1754_vm14 = vmor %vm1752_vm13, %vm1753_vm12  ;;  %2389 = vmatpush.bf16.msra.mxu2 %v5629_v46 }
 0x5d8   :  { %v1721_v59 = vsel %vm5535_vm6, %v1720_v43, %v1716_v11  ;;  %v1735_v39 = vsel %vm5570_vm10, %v5524_v48, %v1731_v23  ;;  %v1749_v31 = vsub.f32 1.0, %v1748_v8  ;;  %v5606_v48 = vor.u32 %v4248_v47, %v3971_v24  ;;  %v3963_v23 = vld [vmem:[#allocation10 + $0x108] sm:$0xf] }
 0x5d9   :  { %v1740_v1 = vsel %vm5575_vm11, %v1739_v34, %v1735_v39  ;;  %v1763_v54 = vmul.f32 %v4425_v25, %v1721_v59  ;;  %v5610_v43 = vor.u32 %v4246_v49, %v3973_v53  ;;  %v3955_v34 = vld [vmem:[#allocation10 + $0x100] sm:$0xf]  ;;  %2401 = vmatpush.bf16.msra.mxu3 %v5599_v0  ;;  %v5627_v25 = vor.u32 %v4242_v14, %v3957_v15  ;;  %v2189_v59 = vld [vmem:[#allocation13 + $0x8] sm:$0xff] }
 0x5da   :  { %v1762_v7 = vmul.f32 %v1740_v1, %v5461_v19  ;;  %v1750_v35 = vmul.f32 %v5564_v45, %v1749_v31  ;;  %v5615_v19 = vor.u32 %v4247_v26, %v3981_v33  ;;  %2363 = vmatpush.bf16.msra.mxu0 %v5606_v48  ;;  %v5621_v30 = vor.u32 %v4244_v2, %v3955_v34  ;;  %v2016_v31 = vpop.f32.mrf.mxu0  ;;  %v2103_v1 = vpop.f32.mrf.mxu3 }
 0x5db   :  { %2376 = vmatpush.bf16.msra.mxu1 %v5610_v43  ;;  %v5632_v8 = vor.u32 %v4243_v6, %v3965_v56  ;;  %v1759_v24 = vor.u32 1.1754944e-38, %v1758_v40  ;;  %v5638_v50 = vor.u32 %v4245_v36, %v3963_v23  ;;  %v2196_v39 = vpack.c.bf16 %v2189_v59, %v2189_v59  ;;  %v5708_v26 = vpop.f32.mrf.mxu1  ;;  %v5710_v33 = vpop.f32.mrf.mxu2 }
 0x5dc   :  { %v1764_v10 = vadd.f32 %v1763_v54, %v1762_v7  ;;  %v1751_v13 = vadd.f32 %v5564_v45, %v1750_v35  ;;  %6114 = vst [vmem:[#allocation32_spill] sm:$0xff] %v5710_v33 }
 0x5dd   :  { %2402 = vmatpush.bf16.msra.mxu3 %v5615_v19  ;;  %2390 = vmatpush.bf16.msra.mxu2 %v5638_v50 }
 0x5de   :  { %4426 = vtanh.f32 %v1764_v10  ;;  %1771 = vst [vmem:[#allocation19] sm:$0xff] %v1764_v10  ;;  %v1755_v18 = vsel %vm1754_vm14, %v5564_v45, %v1751_v13  ;;  %2364 = vmatpush.bf16.msra.mxu0 %v5621_v30 }
 0x5df   :  { %2377 = vmatpush.bf16.msra.mxu1 %v5627_v25  ;;  %v1760_v47 = vsel %vm1757_vm15, %v1759_v24, %v1755_v18 }
 0x5e1   :  { %2403 = vmatpush.bf16.msra.mxu3 %v5632_v8  ;;  %2507 = vmatpush.bf16.msrb.mxu2 %v5480_v32 }
 0x5e2   :  { %2481 = vmatpush.bf16.msrb.mxu0 %v5473_v38  ;;  %v5706_v54 = vpop.f32.mrf.mxu0  ;;  %v5712_v7 = vpop.f32.mrf.mxu3 }
 0x5e3   :  { %2494 = vmatpush.bf16.msrb.mxu1 %v5475_v20  ;;  %v5716_v34 = vpop.f32.mrf.mxu1  ;;  %v5718_v2 = vpop.f32.mrf.mxu2 }
 0x5e4   :  { %v4427_v11 = vpop.eup %4426  ;;  %6116 = vst [vmem:[#allocation30_spill] sm:$0xff] %v5716_v34 }
 0x5e5   :  { %v1766_v49 = vmul.f32 %v4427_v11, %v1760_v47  ;;  %2520 = vmatpush.bf16.msrb.mxu3 %v5477_v21  ;;  %2508 = vmatpush.bf16.msrb.mxu2 %v5502_v62  ;;  %6117 = vst [vmem:[#allocation31_spill] sm:$0xff] %v5718_v2 }
 0x5e6   :  { %2482 = vmatpush.bf16.msrb.mxu0 %v5486_v52 }
 0x5e7   :  { %v1767_v45 = vpack.c.bf16 %v1766_v49, %v1766_v49  ;;  %1770 = vst [vmem:[#allocation18] sm:$0xff] %v1766_v49  ;;  %2495 = vmatpush.bf16.msrb.mxu1 %v5491_v4 }
 0x5e9   :  { %1769 = vst [vmem:[#allocation2 + $0x1c] sm:$0xf] %v1767_v45  ;;  %2521 = vmatpush.bf16.msrb.mxu3 %v5500_v27  ;;  %2509 = vmatpush.bf16.msrb.mxu2 %v5541_v22  ;;  %v1813_v45 = vld [vmem:[#allocation12 + $0x4] sm:$0xf] }
 0x5ea   :  { %2483 = vmatpush.bf16.msrb.mxu0 %v5506_v57  ;;  %v5714_v35 = vpop.f32.mrf.mxu0  ;;  %v5720_v3 = vpop.f32.mrf.mxu3 }
 0x5eb   :  { %2496 = vmatpush.bf16.msrb.mxu1 %v5508_v29  ;;  %6115 = vst [vmem:[#allocation29_spill] sm:$0xff] %v5714_v35  ;;  %v5724_v14 = vpop.f32.mrf.mxu1  ;;  %v5726_v15 = vpop.f32.mrf.mxu2 }
 0x5ec   :  { %6118 = vst [vmem:[#allocation35_spill] sm:$0xff] %v5720_v3 }
 0x5ed   :  { %2522 = vmatpush.bf16.msrb.mxu3 %v5514_v58  ;;  %2510 = vmatpush.bf16.msrb.mxu2 %v5562_v28  ;;  %6120 = vst [vmem:[#allocation34_spill] sm:$0xff] %v5724_v14 }
 0x5ee   :  { %2484 = vmatpush.bf16.msrb.mxu0 %v5520_v16  ;;  %6121 = vst [vmem:[#allocation36_spill] sm:$0xff] %v5726_v15 }
 0x5ef   :  { %2497 = vmatpush.bf16.msrb.mxu1 %v5522_v55 }
 0x5f0   :  { %v4209_v53 = vld [vmem:[#allocation2 + $0x18] sm:$0xff] }
 0x5f1   :  { %2523 = vmatpush.bf16.msrb.mxu3 %v5539_v9  ;;  %2030 = vmatmul.bf16.gmra.mxu0 %v4209_v53 }
 0x5f2   :  { %2059 = vmatmul.bf16.gmra.mxu1 %v4209_v53  ;;  %2088 = vmatmul.bf16.gmra.mxu2 %v4209_v53  ;;  %v5722_v10 = vpop.f32.mrf.mxu0  ;;  %v5728_v17 = vpop.f32.mrf.mxu3 }
 0x5f3   :  { %2117 = vmatmul.bf16.gmra.mxu3 %v4209_v53  ;;  %2485 = vmatpush.bf16.msrb.mxu0 %v5551_v44  ;;  %6119 = vst [vmem:[#allocation33_spill] sm:$0xff] %v5722_v10  ;;  %v5732_v6 = vpop.f32.mrf.mxu1  ;;  %v5734_v56 = vpop.f32.mrf.mxu2 }
 0x5f4   :  { %2498 = vmatpush.bf16.msrb.mxu1 %v5558_v12  ;;  %2511 = vmatpush.bf16.msrb.mxu2 %v5591_v41  ;;  %6122 = vst [vmem:[#allocation38_spill] sm:$0xff] %v5728_v17 }
 0x5f5   :  { %2524 = vmatpush.bf16.msrb.mxu3 %v5560_v63  ;;  %6124 = vst [vmem:[#allocation39_spill] sm:$0xff] %v5732_v6 }
 0x5f6   :  { %6125 = vst [vmem:[#allocation40_spill] sm:$0xff] %v5734_v56 }
 0x5f7   :  { %2486 = vmatpush.bf16.msrb.mxu0 %v5583_v5 }
 0x5f8   :  { %2499 = vmatpush.bf16.msrb.mxu1 %v5589_v37  ;;  %2512 = vmatpush.bf16.msrb.mxu2 %v5612_v51 }
 0x5f9   :  { %2525 = vmatpush.bf16.msrb.mxu3 %v5599_v0 }
 0x5fa   :  { %v5730_v13 = vpop.f32.mrf.mxu0  ;;  %v5736_v40 = vpop.f32.mrf.mxu3 }
 0x5fb   :  { %2487 = vmatpush.bf16.msrb.mxu0 %v5606_v48  ;;  %6123 = vst [vmem:[#allocation37_spill] sm:$0xff] %v5730_v13  ;;  %v5740_v23 = vpop.f32.mrf.mxu1  ;;  %v5742_v36 = vpop.f32.mrf.mxu2 }
 0x5fc   :  { %2500 = vmatpush.bf16.msrb.mxu1 %v5610_v43  ;;  %2513 = vmatpush.bf16.msrb.mxu2 %v5629_v46  ;;  %6126 = vst [vmem:[#allocation43_spill] sm:$0xff] %v5736_v40  ;;  %v5768_v40 = vperm.slane %v1813_v45, 3 }
 0x5fd   :  { %2526 = vmatpush.bf16.msrb.mxu3 %v5615_v19  ;;  %6128 = vst [vmem:[#allocation42_spill] sm:$0xff] %v5740_v23  ;;  %v5760_v23 = vperm.slane %v1813_v45, 1 }
 0x5fe   :  { %6129 = vst [vmem:[#allocation44_spill] sm:$0xff] %v5742_v36  ;;  %v2104_v6 = vadd.f32 %v2103_v1, %v5768_v40 }
 0x5ff   :  { %2488 = vmatpush.bf16.msrb.mxu0 %v5621_v30 }
 0x600   :  { %2501 = vmatpush.bf16.msrb.mxu1 %v5627_v25  ;;  %2514 = vmatpush.bf16.msrb.mxu2 %v5638_v50 }
 0x601   :  { %2527 = vmatpush.bf16.msrb.mxu3 %v5632_v8  ;;  %2365 = vmatmul.bf16.vlgmr.msra.gmra.mxu0 %v2196_v39 }
 0x602   :  { %2378 = vmatmul.bf16.vlgmr.msra.gmra.mxu1 %v2196_v39  ;;  %2391 = vmatmul.bf16.vlgmr.msra.gmra.mxu2 %v2196_v39  ;;  %v5738_v42 = vpop.f32.mrf.mxu0  ;;  %v5744_v18 = vpop.f32.mrf.mxu3 }
 0x603   :  { %2404 = vmatmul.bf16.vlgmr.msra.gmra.mxu3 %v2196_v39  ;;  %2605 = vmatpush.bf16.msra.mxu0 %v5473_v38  ;;  %6127 = vst [vmem:[#allocation41_spill] sm:$0xff] %v5738_v42  ;;  %v5758_v39 = vperm.slane %v1813_v45, 0 }
 0x604   :  { %2618 = vmatpush.bf16.msra.mxu1 %v5475_v20  ;;  %2631 = vmatpush.bf16.msra.mxu2 %v5480_v32  ;;  %6130 = vst [vmem:[#allocation46_spill] sm:$0xff] %v5744_v18  ;;  %v2046_v18 = vadd.f32 %v2045_v60, %v5760_v23 }
 0x605   :  { %2644 = vmatpush.bf16.msra.mxu3 %v5477_v21  ;;  %v2017_v36 = vadd.f32 %v2016_v31, %v5758_v39 }
 0x607   :  { %2606 = vmatpush.bf16.msra.mxu0 %v5486_v52 }
 0x608   :  { %2619 = vmatpush.bf16.msra.mxu1 %v5491_v4  ;;  %2632 = vmatpush.bf16.msra.mxu2 %v5502_v62 }
 0x609   :  { %2645 = vmatpush.bf16.msra.mxu3 %v5500_v27 }
 0x60b   :  { %2607 = vmatpush.bf16.msra.mxu0 %v5506_v57 }
 0x60c   :  { %2620 = vmatpush.bf16.msra.mxu1 %v5508_v29  ;;  %2633 = vmatpush.bf16.msra.mxu2 %v5541_v22 }
 0x60d   :  { %2646 = vmatpush.bf16.msra.mxu3 %v5514_v58 }
 0x60f   :  { %2608 = vmatpush.bf16.msra.mxu0 %v5520_v16 }
 0x610   :  { %2621 = vmatpush.bf16.msra.mxu1 %v5522_v55  ;;  %2634 = vmatpush.bf16.msra.mxu2 %v5562_v28 }
 0x611   :  { %2647 = vmatpush.bf16.msra.mxu3 %v5539_v9 }
 0x613   :  { %2609 = vmatpush.bf16.msra.mxu0 %v5551_v44 }
 0x614   :  { %2622 = vmatpush.bf16.msra.mxu1 %v5558_v12  ;;  %2635 = vmatpush.bf16.msra.mxu2 %v5591_v41 }
 0x615   :  { %2648 = vmatpush.bf16.msra.mxu3 %v5560_v63 }
 0x617   :  { %2610 = vmatpush.bf16.msra.mxu0 %v5583_v5 }
 0x618   :  { %2623 = vmatpush.bf16.msra.mxu1 %v5589_v37  ;;  %2636 = vmatpush.bf16.msra.mxu2 %v5612_v51 }
 0x619   :  { %2649 = vmatpush.bf16.msra.mxu3 %v5599_v0 }
 0x61b   :  { %2611 = vmatpush.bf16.msra.mxu0 %v5606_v48 }
 0x61c   :  { %2624 = vmatpush.bf16.msra.mxu1 %v5610_v43  ;;  %2637 = vmatpush.bf16.msra.mxu2 %v5629_v46 }
 0x61d   :  { %2650 = vmatpush.bf16.msra.mxu3 %v5615_v19 }
 0x61f   :  { %2612 = vmatpush.bf16.msra.mxu0 %v5621_v30 }
 0x620   :  { %2625 = vmatpush.bf16.msra.mxu1 %v5627_v25  ;;  %2638 = vmatpush.bf16.msra.mxu2 %v5638_v50 }
 0x621   :  { %2651 = vmatpush.bf16.msra.mxu3 %v5632_v8 }
 0x66e   :  { %v5746_v24 = vpop.f32.mrf.mxu0 }
 0x66f   :  { %6131 = vst [vmem:[#allocation45_spill] sm:$0xff] %v5746_v24  ;;  %v5748_v11 = vpop.f32.mrf.mxu1 }
 0x670   :  { %6132 = vst [vmem:[#allocation47_spill] sm:$0xff] %v5748_v11 }
 0x675   :  { %v5750_v47 = vpop.f32.mrf.mxu2 }
 0x676   :  { %6133 = vst [vmem:[#allocation48_spill] sm:$0xff] %v5750_v47  ;;  %v5752_v49 = vpop.f32.mrf.mxu3  ;;  %v5754_v53 = vpop.f32.mrf.mxu0 }
 0x677   :  { %6134 = vst [vmem:[#allocation51_spill] sm:$0xff] %v5752_v49  ;;  %v5756_v59 = vpop.f32.mrf.mxu1 }
 0x678   :  { %6135 = vst [vmem:[#allocation49_spill] sm:$0xff] %v5754_v53 }
 0x679   :  { %6136 = vst [vmem:[#allocation50_spill] sm:$0xff] %v5756_v59 }
 0x67d   :  { %v5764_v24 = vpop.f32.mrf.mxu2 }
 0x67e   :  { %6137 = vst [vmem:[#allocation52_spill] sm:$0xff] %v5764_v24  ;;  %v5766_v11 = vpop.f32.mrf.mxu3  ;;  %v2366_v47 = vpop.f32.mrf.mxu0 }
 0x67f   :  { %6138 = vst [vmem:[#allocation54_spill] sm:$0xff] %v5766_v11  ;;  %v2379_v42 = vpop.f32.mrf.mxu1  ;;  %v2409_v49 = vadd.f32 %v2366_v47, %v2017_v36 }
 0x680   :  { %v2410_v56 = vadd.f32 %v2379_v42, %v2046_v18  ;;  %v5771_v42 = vperm.slane %v1813_v45, 2 }
 0x681   :  { %v4081_v53 = vmul.f32 -1.442695, %v2409_v49 }
 0x682   :  { %v4082_v59 = vmul.f32 -1.442695, %v2410_v56  ;;  %6139 = vst [vmem:[#allocation53_spill] sm:$0xff] %v5771_v42  ;;  %v2075_v1 = vadd.f32 %v2074_v61, %v5771_v42 }
 0x683   :  { %4428 = vpow2.f32 %v4081_v53 }
 0x684   :  { %4430 = vpow2.f32 %v4082_v59 }
 0x685   :  { %v2392_v13 = vpop.f32.mrf.mxu2 }
 0x686   :  { %v2405_v31 = vpop.f32.mrf.mxu3  ;;  %v2368_v60 = vpop.f32.mrf.mxu0 }
 0x687   :  { %v2412_v15 = vadd.f32 %v2405_v31, %v2104_v6  ;;  %v2381_v17 = vpop.f32.mrf.mxu1  ;;  %v2411_v6 = vadd.f32 %v2392_v13, %v2075_v1 }
 0x689   :  { %v4083_v24 = vmul.f32 -1.442695, %v2412_v15  ;;  %v4429_v14 = vpop.eup %4428 }
 0x68a   :  { %v4431_v11 = vpop.eup %4430  ;;  %v2416_v10 = vadd.f32 1.0, %v4429_v14 }
 0x68b   :  { %4432 = vpow2.f32 %v4083_v24  ;;  %v2435_v36 = vadd.f32 1.0, %v4431_v11 }
 0x68c   :  { %4434 = vrcp.f32 %v2416_v10  ;;  %v2428_v24 = vand.u32 2147483648, %v2416_v10  ;;  %v2426_v60 = vand.u32 2147483647, %v2416_v10  ;;  %vm2422_vm2 = vweird.f32 %v2416_v10 }
 0x68d   :  { %4436 = vrcp.f32 %v2435_v36  ;;  %v2394_v18 = vpop.f32.mrf.mxu2  ;;  %v2447_v11 = vand.u32 2147483648, %v2435_v36  ;;  %vm2441_vm3 = vweird.f32 %v2435_v36 }
 0x68e   :  { %v2407_v56 = vpop.f32.mrf.mxu3  ;;  %v2445_v18 = vand.u32 2147483647, %v2435_v36  ;;  %v2429_v13 = vor.u32 1.1754944e-38, %v2428_v24  ;;  %vm2427_vm6 = vcmp.eq.f32.partialorder %v2426_v60, 8.507059e+37 }
 0x690   :  { %vm2446_vm7 = vcmp.eq.f32.partialorder %v2445_v18, 8.507059e+37 }
 0x691   :  { %v4433_v47 = vpop.eup %4432 }
 0x692   :  { %v2455_v49 = vadd.f32 1.0, %v4433_v47  ;;  %v4435_v53 = vpop.eup %4434 }
 0x693   :  { %v4437_v59 = vpop.eup %4436  ;;  %v2418_v17 = vmul.f32 %v4435_v53, %v2416_v10  ;;  %vm2423_vm0 = vweird.f32 %v4435_v53 }
 0x694   :  { %4438 = vrcp.f32 %v2455_v49  ;;  %v2437_v15 = vmul.f32 %v4437_v59, %v2435_v36  ;;  %vm2442_vm1 = vweird.f32 %v4437_v59  ;;  %vm2424_vm4 = vmor %vm2422_vm2, %vm2423_vm0  ;;  %v2467_v24 = vand.u32 2147483648, %v2455_v49 }
 0x695   :  { %v2419_v31 = vsub.f32 1.0, %v2418_v17  ;;  %4440 = vtanh.f32 %v2411_v6  ;;  %vm2443_vm5 = vmor %vm2441_vm3, %vm2442_vm1  ;;  %v2448_v17 = vor.u32 1.1754944e-38, %v2447_v11  ;;  %vm2461_vm9 = vweird.f32 %v2455_v49 }
 0x696   :  { %v2438_v14 = vsub.f32 1.0, %v2437_v15  ;;  %v2191_v15 = vld [vmem:[#allocation15 + $0x8] sm:$0xff]  ;;  %v2465_v11 = vand.u32 2147483647, %v2455_v49  ;;  %v2468_v60 = vor.u32 1.1754944e-38, %v2467_v24 }
 0x697   :  { %v2420_v45 = vmul.f32 %v4435_v53, %v2419_v31 }
 0x698   :  { %v2439_v56 = vmul.f32 %v4437_v59, %v2438_v14  ;;  %vm2466_vm11 = vcmp.eq.f32.partialorder %v2465_v11, 8.507059e+37 }
 0x699   :  { %v2421_v61 = vadd.f32 %v4435_v53, %v2420_v45 }
 0x69a   :  { %v4439_v2 = vpop.eup %4438  ;;  %v2440_v47 = vadd.f32 %v4437_v59, %v2439_v56 }
 0x69b   :  { %v2457_v1 = vmul.f32 %v4439_v2, %v2455_v49  ;;  %v2425_v3 = vsel %vm2424_vm4, %v4435_v53, %v2421_v61  ;;  %v4441_v6 = vpop.eup %4440  ;;  %vm2462_vm8 = vweird.f32 %v4439_v2 }
 0x69c   :  { %v2430_v31 = vsel %vm2427_vm6, %v2429_v13, %v2425_v3  ;;  %v2444_v34 = vsel %vm2443_vm5, %v4437_v59, %v2440_v47  ;;  %vm2463_vm10 = vmor %vm2461_vm9, %vm2462_vm8  ;;  %v2106_v47 = vadd.f32 %v5712_v7, %v5768_v40 }
 0x69d   :  { %v2458_v14 = vsub.f32 1.0, %v2457_v1  ;;  %v2449_v35 = vsel %vm2446_vm7, %v2448_v17, %v2444_v34  ;;  %v2472_v33 = vmul.f32 %v4441_v6, %v2430_v31 }
 0x69e   :  { %v2471_v42 = vmul.f32 %v2449_v35, %v2191_v15  ;;  %v2048_v35 = vadd.f32 %v5708_v26, %v5760_v23 }
 0x69f   :  { %v2459_v45 = vmul.f32 %v4439_v2, %v2458_v14 }
 0x6a0   :  { %v5774_v10 = vadd.f32 %v2472_v33, %v2471_v42  ;;  %v2019_v33 = vadd.f32 %v5706_v54, %v5758_v39 }
 0x6a1   :  { %v2460_v36 = vadd.f32 %v4439_v2, %v2459_v45 }
 0x6a2   :  { %4442 = vtanh.f32 %v5774_v10 }
 0x6a3   :  { %v2464_v53 = vsel %vm2463_vm10, %v4439_v2, %v2460_v36 }
 0x6a4   :  { %v2469_v59 = vsel %vm2466_vm11, %v2468_v60, %v2464_v53  ;;  %v6140_v60 = vld [vmem:[#allocation53_spill] sm:$0xff] }
 0x6a8   :  { %v4443_v3 = vpop.eup %4442 }
 0x6a9   :  { %v2475_v56 = vmul.f32 %v4443_v3, %v2469_v59  ;;  %v6141_v3 = vld [vmem:[#allocation32_spill] sm:$0xff] }
 0x6aa   :  { %v2077_v7 = vadd.f32 %v6141_v3, %v6140_v60 }
 0x6ab   :  { %v2480_v34 = vpack.c.bf16 %v2475_v56, %v2475_v56 }
 0x6ad   :  { %2489 = vmatmul.bf16.vlgmr.msrb.gmra.mxu0 %v2480_v34  ;;  %2502 = vmatmul.bf16.vlgmr.msrb.gmra.mxu1 %v2480_v34 }
 0x6ae   :  { %2515 = vmatmul.bf16.vlgmr.msrb.gmra.mxu2 %v2480_v34  ;;  %2528 = vmatmul.bf16.vlgmr.msrb.gmra.mxu3 %v2480_v34 }
 0x6af   :  { %2729 = vmatpush.bf16.msrb.mxu0 %v5473_v38  ;;  %2742 = vmatpush.bf16.msrb.mxu1 %v5475_v20 }
 0x6b0   :  { %2755 = vmatpush.bf16.msrb.mxu2 %v5480_v32  ;;  %2768 = vmatpush.bf16.msrb.mxu3 %v5477_v21 }
 0x6b3   :  { %2730 = vmatpush.bf16.msrb.mxu0 %v5486_v52  ;;  %2743 = vmatpush.bf16.msrb.mxu1 %v5491_v4 }
 0x6b4   :  { %2756 = vmatpush.bf16.msrb.mxu2 %v5502_v62  ;;  %2769 = vmatpush.bf16.msrb.mxu3 %v5500_v27 }
 0x6b7   :  { %2731 = vmatpush.bf16.msrb.mxu0 %v5506_v57  ;;  %2744 = vmatpush.bf16.msrb.mxu1 %v5508_v29 }
 0x6b8   :  { %2757 = vmatpush.bf16.msrb.mxu2 %v5541_v22  ;;  %2770 = vmatpush.bf16.msrb.mxu3 %v5514_v58 }
 0x6bb   :  { %2732 = vmatpush.bf16.msrb.mxu0 %v5520_v16  ;;  %2745 = vmatpush.bf16.msrb.mxu1 %v5522_v55 }
 0x6bc   :  { %2758 = vmatpush.bf16.msrb.mxu2 %v5562_v28  ;;  %2771 = vmatpush.bf16.msrb.mxu3 %v5539_v9 }
 0x6bf   :  { %2733 = vmatpush.bf16.msrb.mxu0 %v5551_v44  ;;  %2746 = vmatpush.bf16.msrb.mxu1 %v5558_v12 }
 0x6c0   :  { %2759 = vmatpush.bf16.msrb.mxu2 %v5591_v41  ;;  %2772 = vmatpush.bf16.msrb.mxu3 %v5560_v63 }
 0x6c3   :  { %2734 = vmatpush.bf16.msrb.mxu0 %v5583_v5  ;;  %2747 = vmatpush.bf16.msrb.mxu1 %v5589_v37 }
 0x6c4   :  { %2760 = vmatpush.bf16.msrb.mxu2 %v5612_v51  ;;  %2773 = vmatpush.bf16.msrb.mxu3 %v5599_v0 }
 0x6c7   :  { %2735 = vmatpush.bf16.msrb.mxu0 %v5606_v48  ;;  %2748 = vmatpush.bf16.msrb.mxu1 %v5610_v43 }
 0x6c8   :  { %2761 = vmatpush.bf16.msrb.mxu2 %v5629_v46  ;;  %2774 = vmatpush.bf16.msrb.mxu3 %v5615_v19 }
 0x6cb   :  { %2736 = vmatpush.bf16.msrb.mxu0 %v5621_v30  ;;  %2749 = vmatpush.bf16.msrb.mxu1 %v5627_v25 }
 0x6cc   :  { %2762 = vmatpush.bf16.msrb.mxu2 %v5638_v50  ;;  %2775 = vmatpush.bf16.msrb.mxu3 %v5632_v8 }
 0x72a   :  { %v2490_v2 = vpop.f32.mrf.mxu0  ;;  %v2503_v42 = vpop.f32.mrf.mxu1 }
 0x72b   :  { %v2533_v49 = vadd.f32 %v2490_v2, %v2019_v33  ;;  %v2534_v18 = vadd.f32 %v2503_v42, %v2048_v35 }
 0x72d   :  { %v4084_v61 = vmul.f32 -1.442695, %v2533_v49  ;;  %v4085_v13 = vmul.f32 -1.442695, %v2534_v18 }
 0x72f   :  { %4444 = vpow2.f32 %v4084_v61 }
 0x730   :  { %4446 = vpow2.f32 %v4085_v13 }
 0x731   :  { %v2516_v1 = vpop.f32.mrf.mxu2  ;;  %v2529_v17 = vpop.f32.mrf.mxu3 }
 0x732   :  { %v2536_v15 = vadd.f32 %v2529_v17, %v2106_v47  ;;  %v2492_v6 = vpop.f32.mrf.mxu0  ;;  %v2505_v31 = vpop.f32.mrf.mxu1  ;;  %v2535_v34 = vadd.f32 %v2516_v1, %v2077_v7 }
 0x734   :  { %v4086_v54 = vmul.f32 -1.442695, %v2536_v15 }
 0x735   :  { %v4445_v14 = vpop.eup %4444 }
 0x736   :  { %v4447_v45 = vpop.eup %4446  ;;  %v2540_v26 = vadd.f32 1.0, %v4445_v14  ;;  %4448 = vpow2.f32 %v4086_v54 }
 0x737   :  { %v2559_v36 = vadd.f32 1.0, %v4447_v45 }
 0x738   :  { %4450 = vrcp.f32 %v2540_v26  ;;  %v2552_v18 = vand.u32 2147483648, %v2540_v26  ;;  %v2550_v47 = vand.u32 2147483647, %v2540_v26  ;;  %vm2546_vm14 = vweird.f32 %v2540_v26 }
 0x739   :  { %4452 = vrcp.f32 %v2559_v36  ;;  %v2518_v24 = vpop.f32.mrf.mxu2  ;;  %v2531_v11 = vpop.f32.mrf.mxu3  ;;  %v2571_v61 = vand.u32 2147483648, %v2559_v36  ;;  %v2569_v15 = vand.u32 2147483647, %v2559_v36  ;;  %vm2565_vm15 = vweird.f32 %v2559_v36 }
 0x73a   :  { %v2553_v1 = vor.u32 1.1754944e-38, %v2552_v18  ;;  %vm2551_vm2 = vcmp.eq.f32.partialorder %v2550_v47, 8.507059e+37 }
 0x73b   :  { %v2572_v45 = vor.u32 1.1754944e-38, %v2571_v61  ;;  %vm2570_vm3 = vcmp.eq.f32.partialorder %v2569_v15, 8.507059e+37  ;;  %v6143_v15 = vld [vmem:[#allocation30_spill] sm:$0xff] }
 0x73c   :  { %v4449_v53 = vpop.eup %4448 }
 0x73d   :  { %v2579_v59 = vadd.f32 1.0, %v4449_v53 }
 0x73e   :  { %v4451_v56 = vpop.eup %4450 }
 0x73f   :  { %v4453_v33 = vpop.eup %4452  ;;  %v2542_v35 = vmul.f32 %v4451_v56, %v2540_v26  ;;  %4454 = vrcp.f32 %v2579_v59  ;;  %vm2547_vm12 = vweird.f32 %v4451_v56  ;;  %vm2585_vm5 = vweird.f32 %v2579_v59 }
 0x740   :  { %v2561_v2 = vmul.f32 %v4453_v33, %v2559_v36  ;;  %4456 = vtanh.f32 %v2535_v34  ;;  %vm2566_vm13 = vweird.f32 %v4453_v33  ;;  %vm2548_vm0 = vmor %vm2546_vm14, %vm2547_vm12 }
 0x741   :  { %v2543_v42 = vsub.f32 1.0, %v2542_v35  ;;  %vm2567_vm1 = vmor %vm2565_vm15, %vm2566_vm13 }
 0x742   :  { %v2562_v49 = vsub.f32 1.0, %v2561_v2 }
 0x743   :  { %v2544_v13 = vmul.f32 %v4451_v56, %v2543_v42 }
 0x744   :  { %v2563_v17 = vmul.f32 %v4453_v33, %v2562_v49  ;;  %v2591_v49 = vand.u32 2147483648, %v2579_v59 }
 0x745   :  { %v4455_v6 = vpop.eup %4454  ;;  %v2545_v31 = vadd.f32 %v4451_v56, %v2544_v13 }
 0x746   :  { %v2564_v54 = vadd.f32 %v4453_v33, %v2563_v17  ;;  %v2581_v14 = vmul.f32 %v4455_v6, %v2579_v59  ;;  %v4457_v11 = vpop.eup %4456  ;;  %vm2586_vm4 = vweird.f32 %v4455_v6  ;;  %v2592_v61 = vor.u32 1.1754944e-38, %v2591_v49 }
 0x747   :  { %v2549_v24 = vsel %vm2548_vm0, %v4451_v56, %v2545_v31  ;;  %v2589_v56 = vand.u32 2147483647, %v2579_v59  ;;  %vm2587_vm6 = vmor %vm2585_vm5, %vm2586_vm4 }
 0x748   :  { %v2554_v53 = vsel %vm2551_vm2, %v2553_v1, %v2549_v24  ;;  %v2568_v3 = vsel %vm2567_vm1, %v4453_v33, %v2564_v54  ;;  %v2582_v7 = vsub.f32 1.0, %v2581_v14 }
 0x749   :  { %v2573_v34 = vsel %vm2570_vm3, %v2572_v45, %v2568_v3  ;;  %v2596_v35 = vmul.f32 %v4457_v11, %v2554_v53  ;;  %vm2590_vm7 = vcmp.eq.f32.partialorder %v2589_v56, 8.507059e+37  ;;  %v6144_v11 = vld [vmem:[#allocation35_spill] sm:$0xff] }
 0x74a   :  { %v2595_v2 = vmul.f32 %v2573_v34, %v5774_v10  ;;  %v2583_v42 = vmul.f32 %v4455_v6, %v2582_v7  ;;  %v6142_v10 = vld [vmem:[#allocation29_spill] sm:$0xff]  ;;  %v2109_v53 = vadd.f32 %v6144_v11, %v5768_v40 }
 0x74b   :  { %v2022_v59 = vadd.f32 %v6142_v10, %v5758_v39 }
 0x74c   :  { %v5818_v26 = vadd.f32 %v2596_v35, %v2595_v2  ;;  %v2584_v36 = vadd.f32 %v4455_v6, %v2583_v42 }
 0x74e   :  { %4458 = vtanh.f32 %v5818_v26  ;;  %v2588_v18 = vsel %vm2587_vm6, %v4455_v6, %v2584_v36  ;;  %v2051_v6 = vadd.f32 %v6143_v15, %v5760_v23 }
 0x74f   :  { %v2593_v13 = vsel %vm2590_vm7, %v2592_v61, %v2588_v18 }
 0x754   :  { %v4459_v33 = vpop.eup %4458 }
 0x755   :  { %v2599_v47 = vmul.f32 %v4459_v33, %v2593_v13 }
 0x757   :  { %v2604_v17 = vpack.c.bf16 %v2599_v47, %v2599_v47  ;;  %v6145_v47 = vld [vmem:[#allocation31_spill] sm:$0xff] }
 0x759   :  { %2613 = vmatmul.bf16.vlgmr.msra.gmra.mxu0 %v2604_v17  ;;  %2626 = vmatmul.bf16.vlgmr.msra.gmra.mxu1 %v2604_v17 }
 0x75a   :  { %2639 = vmatmul.bf16.vlgmr.msra.gmra.mxu2 %v2604_v17  ;;  %2652 = vmatmul.bf16.vlgmr.msra.gmra.mxu3 %v2604_v17  ;;  %v2080_v17 = vadd.f32 %v6145_v47, %v6140_v60 }
 0x75b   :  { %2853 = vmatpush.bf16.msra.mxu0 %v5473_v38  ;;  %2866 = vmatpush.bf16.msra.mxu1 %v5475_v20 }
 0x75c   :  { %2879 = vmatpush.bf16.msra.mxu2 %v5480_v32  ;;  %2892 = vmatpush.bf16.msra.mxu3 %v5477_v21 }
 0x75f   :  { %2854 = vmatpush.bf16.msra.mxu0 %v5486_v52  ;;  %2867 = vmatpush.bf16.msra.mxu1 %v5491_v4 }
 0x760   :  { %2880 = vmatpush.bf16.msra.mxu2 %v5502_v62  ;;  %2893 = vmatpush.bf16.msra.mxu3 %v5500_v27 }
 0x763   :  { %2855 = vmatpush.bf16.msra.mxu0 %v5506_v57  ;;  %2868 = vmatpush.bf16.msra.mxu1 %v5508_v29 }
 0x764   :  { %2881 = vmatpush.bf16.msra.mxu2 %v5541_v22  ;;  %2894 = vmatpush.bf16.msra.mxu3 %v5514_v58 }
 0x767   :  { %2856 = vmatpush.bf16.msra.mxu0 %v5520_v16  ;;  %2869 = vmatpush.bf16.msra.mxu1 %v5522_v55 }
 0x768   :  { %2882 = vmatpush.bf16.msra.mxu2 %v5562_v28  ;;  %2895 = vmatpush.bf16.msra.mxu3 %v5539_v9 }
 0x76b   :  { %2857 = vmatpush.bf16.msra.mxu0 %v5551_v44  ;;  %2870 = vmatpush.bf16.msra.mxu1 %v5558_v12 }
 0x76c   :  { %2883 = vmatpush.bf16.msra.mxu2 %v5591_v41  ;;  %2896 = vmatpush.bf16.msra.mxu3 %v5560_v63 }
 0x76f   :  { %2858 = vmatpush.bf16.msra.mxu0 %v5583_v5  ;;  %2871 = vmatpush.bf16.msra.mxu1 %v5589_v37 }
 0x770   :  { %2884 = vmatpush.bf16.msra.mxu2 %v5612_v51  ;;  %2897 = vmatpush.bf16.msra.mxu3 %v5599_v0 }
 0x773   :  { %2859 = vmatpush.bf16.msra.mxu0 %v5606_v48  ;;  %2872 = vmatpush.bf16.msra.mxu1 %v5610_v43 }
 0x774   :  { %2885 = vmatpush.bf16.msra.mxu2 %v5629_v46  ;;  %2898 = vmatpush.bf16.msra.mxu3 %v5615_v19 }
 0x777   :  { %2860 = vmatpush.bf16.msra.mxu0 %v5621_v30  ;;  %2873 = vmatpush.bf16.msra.mxu1 %v5627_v25 }
 0x778   :  { %2886 = vmatpush.bf16.msra.mxu2 %v5638_v50  ;;  %2899 = vmatpush.bf16.msra.mxu3 %v5632_v8 }
 0x7d6   :  { %v2614_v31 = vpop.f32.mrf.mxu0  ;;  %v2627_v1 = vpop.f32.mrf.mxu1 }
 0x7d7   :  { %v2657_v54 = vadd.f32 %v2614_v31, %v2022_v59  ;;  %v2658_v14 = vadd.f32 %v2627_v1, %v2051_v6 }
 0x7d9   :  { %v4087_v45 = vmul.f32 -1.442695, %v2657_v54  ;;  %v4088_v24 = vmul.f32 -1.442695, %v2658_v14 }
 0x7db   :  { %4460 = vpow2.f32 %v4087_v45 }
 0x7dc   :  { %4462 = vpow2.f32 %v4088_v24 }
 0x7dd   :  { %v2640_v3 = vpop.f32.mrf.mxu2  ;;  %v2653_v7 = vpop.f32.mrf.mxu3 }
 0x7de   :  { %v2660_v34 = vadd.f32 %v2653_v7, %v2109_v53  ;;  %v2616_v35 = vpop.f32.mrf.mxu0  ;;  %v2629_v2 = vpop.f32.mrf.mxu1  ;;  %v2659_v15 = vadd.f32 %v2640_v3, %v2080_v17 }
 0x7e0   :  { %v4089_v42 = vmul.f32 -1.442695, %v2660_v34 }
 0x7e1   :  { %v4461_v36 = vpop.eup %4460 }
 0x7e2   :  { %v4463_v49 = vpop.eup %4462  ;;  %v2664_v56 = vadd.f32 1.0, %v4461_v36  ;;  %4464 = vpow2.f32 %v4089_v42 }
 0x7e3   :  { %v2683_v18 = vadd.f32 1.0, %v4463_v49 }
 0x7e4   :  { %4466 = vrcp.f32 %v2664_v56  ;;  %v2676_v45 = vand.u32 2147483648, %v2664_v56  ;;  %v2674_v53 = vand.u32 2147483647, %v2664_v56  ;;  %vm2670_vm10 = vweird.f32 %v2664_v56 }
 0x7e5   :  { %4468 = vrcp.f32 %v2683_v18  ;;  %v2642_v61 = vpop.f32.mrf.mxu2  ;;  %v2655_v33 = vpop.f32.mrf.mxu3  ;;  %v2695_v24 = vand.u32 2147483648, %v2683_v18  ;;  %v2693_v34 = vand.u32 2147483647, %v2683_v18  ;;  %vm2689_vm11 = vweird.f32 %v2683_v18 }
 0x7e6   :  { %v2677_v3 = vor.u32 1.1754944e-38, %v2676_v45  ;;  %vm2675_vm14 = vcmp.eq.f32.partialorder %v2674_v53, 8.507059e+37 }
 0x7e7   :  { %v2696_v49 = vor.u32 1.1754944e-38, %v2695_v24  ;;  %vm2694_vm15 = vcmp.eq.f32.partialorder %v2693_v34, 8.507059e+37  ;;  %v6147_v34 = vld [vmem:[#allocation34_spill] sm:$0xff] }
 0x7e8   :  { %v4465_v13 = vpop.eup %4464 }
 0x7e9   :  { %v2703_v10 = vadd.f32 1.0, %v4465_v13 }
 0x7ea   :  { %v4467_v59 = vpop.eup %4466 }
 0x7eb   :  { %v4469_v6 = vpop.eup %4468  ;;  %v2666_v31 = vmul.f32 %v4467_v59, %v2664_v56  ;;  %4470 = vrcp.f32 %v2703_v10  ;;  %vm2671_vm8 = vweird.f32 %v4467_v59  ;;  %vm2709_vm1 = vweird.f32 %v2703_v10 }
 0x7ec   :  { %v2685_v1 = vmul.f32 %v4469_v6, %v2683_v18  ;;  %4472 = vtanh.f32 %v2659_v15  ;;  %vm2690_vm9 = vweird.f32 %v4469_v6  ;;  %vm2672_vm12 = vmor %vm2670_vm10, %vm2671_vm8 }
 0x7ed   :  { %v2667_v54 = vsub.f32 1.0, %v2666_v31  ;;  %vm2691_vm13 = vmor %vm2689_vm11, %vm2690_vm9 }
 0x7ee   :  { %v2686_v14 = vsub.f32 1.0, %v2685_v1 }
 0x7ef   :  { %v2668_v11 = vmul.f32 %v4467_v59, %v2667_v54 }
 0x7f0   :  { %v2687_v7 = vmul.f32 %v4469_v6, %v2686_v14  ;;  %v2715_v14 = vand.u32 2147483648, %v2703_v10 }
 0x7f1   :  { %v4471_v35 = vpop.eup %4470  ;;  %v2669_v2 = vadd.f32 %v4467_v59, %v2668_v11 }
 0x7f2   :  { %v2688_v42 = vadd.f32 %v4469_v6, %v2687_v7  ;;  %v2705_v36 = vmul.f32 %v4471_v35, %v2703_v10  ;;  %v4473_v33 = vpop.eup %4472  ;;  %vm2710_vm0 = vweird.f32 %v4471_v35  ;;  %v2716_v24 = vor.u32 1.1754944e-38, %v2715_v14 }
 0x7f3   :  { %v2673_v61 = vsel %vm2672_vm12, %v4467_v59, %v2669_v2  ;;  %v2713_v59 = vand.u32 2147483647, %v2703_v10  ;;  %vm2711_vm2 = vmor %vm2709_vm1, %vm2710_vm0 }
 0x7f4   :  { %v2678_v13 = vsel %vm2675_vm14, %v2677_v3, %v2673_v61  ;;  %v2692_v47 = vsel %vm2691_vm13, %v4469_v6, %v2688_v42  ;;  %v2706_v17 = vsub.f32 1.0, %v2705_v36 }
 0x7f5   :  { %v2697_v15 = vsel %vm2694_vm15, %v2696_v49, %v2692_v47  ;;  %v2720_v31 = vmul.f32 %v4473_v33, %v2678_v13  ;;  %vm2714_vm3 = vcmp.eq.f32.partialorder %v2713_v59, 8.507059e+37  ;;  %v6148_v33 = vld [vmem:[#allocation38_spill] sm:$0xff] }
 0x7f6   :  { %v2719_v1 = vmul.f32 %v2697_v15, %v5818_v26  ;;  %v2707_v54 = vmul.f32 %v4471_v35, %v2706_v17  ;;  %v6146_v26 = vld [vmem:[#allocation33_spill] sm:$0xff]  ;;  %v2111_v13 = vadd.f32 %v6148_v33, %v5768_v40 }
 0x7f7   :  { %v2024_v10 = vadd.f32 %v6146_v26, %v5758_v39 }
 0x7f8   :  { %v5862_v56 = vadd.f32 %v2720_v31, %v2719_v1  ;;  %v2708_v18 = vadd.f32 %v4471_v35, %v2707_v54 }
 0x7fa   :  { %4474 = vtanh.f32 %v5862_v56  ;;  %v2712_v45 = vsel %vm2711_vm2, %v4471_v35, %v2708_v18  ;;  %v2053_v35 = vadd.f32 %v6147_v34, %v5760_v23 }
 0x7fb   :  { %v2717_v11 = vsel %vm2714_vm3, %v2716_v24, %v2712_v45 }
 0x800   :  { %v4475_v6 = vpop.eup %4474 }
 0x801   :  { %v2723_v53 = vmul.f32 %v4475_v6, %v2717_v11 }
 0x803   :  { %v2728_v7 = vpack.c.bf16 %v2723_v53, %v2723_v53  ;;  %v6149_v53 = vld [vmem:[#allocation36_spill] sm:$0xff] }
 0x805   :  { %2737 = vmatmul.bf16.vlgmr.msrb.gmra.mxu0 %v2728_v7  ;;  %2750 = vmatmul.bf16.vlgmr.msrb.gmra.mxu1 %v2728_v7 }
 0x806   :  { %2763 = vmatmul.bf16.vlgmr.msrb.gmra.mxu2 %v2728_v7  ;;  %2776 = vmatmul.bf16.vlgmr.msrb.gmra.mxu3 %v2728_v7  ;;  %v2082_v7 = vadd.f32 %v6149_v53, %v6140_v60 }
 0x807   :  { %2977 = vmatpush.bf16.msrb.mxu0 %v5473_v38  ;;  %2990 = vmatpush.bf16.msrb.mxu1 %v5475_v20 }
 0x808   :  { %3003 = vmatpush.bf16.msrb.mxu2 %v5480_v32  ;;  %3016 = vmatpush.bf16.msrb.mxu3 %v5477_v21 }
 0x80b   :  { %2978 = vmatpush.bf16.msrb.mxu0 %v5486_v52  ;;  %2991 = vmatpush.bf16.msrb.mxu1 %v5491_v4 }
 0x80c   :  { %3004 = vmatpush.bf16.msrb.mxu2 %v5502_v62  ;;  %3017 = vmatpush.bf16.msrb.mxu3 %v5500_v27 }
 0x80f   :  { %2979 = vmatpush.bf16.msrb.mxu0 %v5506_v57  ;;  %2992 = vmatpush.bf16.msrb.mxu1 %v5508_v29 }
 0x810   :  { %3005 = vmatpush.bf16.msrb.mxu2 %v5541_v22  ;;  %3018 = vmatpush.bf16.msrb.mxu3 %v5514_v58 }
 0x813   :  { %2980 = vmatpush.bf16.msrb.mxu0 %v5520_v16  ;;  %2993 = vmatpush.bf16.msrb.mxu1 %v5522_v55 }
 0x814   :  { %3006 = vmatpush.bf16.msrb.mxu2 %v5562_v28  ;;  %3019 = vmatpush.bf16.msrb.mxu3 %v5539_v9 }
 0x817   :  { %2981 = vmatpush.bf16.msrb.mxu0 %v5551_v44  ;;  %2994 = vmatpush.bf16.msrb.mxu1 %v5558_v12 }
 0x818   :  { %3007 = vmatpush.bf16.msrb.mxu2 %v5591_v41  ;;  %3020 = vmatpush.bf16.msrb.mxu3 %v5560_v63 }
 0x81b   :  { %2982 = vmatpush.bf16.msrb.mxu0 %v5583_v5  ;;  %2995 = vmatpush.bf16.msrb.mxu1 %v5589_v37 }
 0x81c   :  { %3008 = vmatpush.bf16.msrb.mxu2 %v5612_v51  ;;  %3021 = vmatpush.bf16.msrb.mxu3 %v5599_v0 }
 0x81f   :  { %2983 = vmatpush.bf16.msrb.mxu0 %v5606_v48  ;;  %2996 = vmatpush.bf16.msrb.mxu1 %v5610_v43 }
 0x820   :  { %3009 = vmatpush.bf16.msrb.mxu2 %v5629_v46  ;;  %3022 = vmatpush.bf16.msrb.mxu3 %v5615_v19 }
 0x823   :  { %2984 = vmatpush.bf16.msrb.mxu0 %v5621_v30  ;;  %2997 = vmatpush.bf16.msrb.mxu1 %v5627_v25 }
 0x824   :  { %3010 = vmatpush.bf16.msrb.mxu2 %v5638_v50  ;;  %3023 = vmatpush.bf16.msrb.mxu3 %v5632_v8 }
 0x882   :  { %v2738_v2 = vpop.f32.mrf.mxu0  ;;  %v2751_v3 = vpop.f32.mrf.mxu1 }
 0x883   :  { %v2781_v42 = vadd.f32 %v2738_v2, %v2024_v10  ;;  %v2782_v36 = vadd.f32 %v2751_v3, %v2053_v35 }
 0x885   :  { %v4090_v49 = vmul.f32 -1.442695, %v2781_v42  ;;  %v4091_v61 = vmul.f32 -1.442695, %v2782_v36 }
 0x887   :  { %4476 = vpow2.f32 %v4090_v49 }
 0x888   :  { %4478 = vpow2.f32 %v4091_v61 }
 0x889   :  { %v2764_v47 = vpop.f32.mrf.mxu2  ;;  %v2777_v17 = vpop.f32.mrf.mxu3 }
 0x88a   :  { %v2784_v15 = vadd.f32 %v2777_v17, %v2111_v13  ;;  %v2740_v31 = vpop.f32.mrf.mxu0  ;;  %v2753_v1 = vpop.f32.mrf.mxu1  ;;  %v2783_v34 = vadd.f32 %v2764_v47, %v2082_v7 }
 0x88c   :  { %v4092_v54 = vmul.f32 -1.442695, %v2784_v15 }
 0x88d   :  { %v4477_v18 = vpop.eup %4476 }
 0x88e   :  { %v4479_v14 = vpop.eup %4478  ;;  %v2788_v59 = vadd.f32 1.0, %v4477_v18  ;;  %4480 = vpow2.f32 %v4092_v54 }
 0x88f   :  { %v2807_v45 = vadd.f32 1.0, %v4479_v14 }
 0x890   :  { %4482 = vrcp.f32 %v2788_v59  ;;  %v2800_v49 = vand.u32 2147483648, %v2788_v59  ;;  %v2798_v13 = vand.u32 2147483647, %v2788_v59  ;;  %vm2794_vm6 = vweird.f32 %v2788_v59 }
 0x891   :  { %4484 = vrcp.f32 %v2807_v45  ;;  %v2766_v24 = vpop.f32.mrf.mxu2  ;;  %v2779_v6 = vpop.f32.mrf.mxu3  ;;  %v2819_v61 = vand.u32 2147483648, %v2807_v45  ;;  %v2817_v15 = vand.u32 2147483647, %v2807_v45  ;;  %vm2813_vm7 = vweird.f32 %v2807_v45 }
 0x892   :  { %v2801_v47 = vor.u32 1.1754944e-38, %v2800_v49  ;;  %vm2799_vm10 = vcmp.eq.f32.partialorder %v2798_v13, 8.507059e+37 }
 0x893   :  { %v2820_v14 = vor.u32 1.1754944e-38, %v2819_v61  ;;  %vm2818_vm11 = vcmp.eq.f32.partialorder %v2817_v15, 8.507059e+37  ;;  %v6151_v15 = vld [vmem:[#allocation39_spill] sm:$0xff] }
 0x894   :  { %v4481_v11 = vpop.eup %4480 }
 0x895   :  { %v2827_v26 = vadd.f32 1.0, %v4481_v11 }
 0x896   :  { %v4483_v10 = vpop.eup %4482 }
 0x897   :  { %v4485_v35 = vpop.eup %4484  ;;  %v2790_v2 = vmul.f32 %v4483_v10, %v2788_v59  ;;  %4486 = vrcp.f32 %v2827_v26  ;;  %vm2795_vm4 = vweird.f32 %v4483_v10  ;;  %vm2833_vm13 = vweird.f32 %v2827_v26 }
 0x898   :  { %v2809_v3 = vmul.f32 %v4485_v35, %v2807_v45  ;;  %4488 = vtanh.f32 %v2783_v34  ;;  %vm2814_vm5 = vweird.f32 %v4485_v35  ;;  %vm2796_vm8 = vmor %vm2794_vm6, %vm2795_vm4 }
 0x899   :  { %v2791_v42 = vsub.f32 1.0, %v2790_v2  ;;  %vm2815_vm9 = vmor %vm2813_vm7, %vm2814_vm5 }
 0x89a   :  { %v2810_v36 = vsub.f32 1.0, %v2809_v3 }
 0x89b   :  { %v2792_v33 = vmul.f32 %v4483_v10, %v2791_v42 }
 0x89c   :  { %v2811_v17 = vmul.f32 %v4485_v35, %v2810_v36  ;;  %v2839_v36 = vand.u32 2147483648, %v2827_v26 }
 0x89d   :  { %v4487_v31 = vpop.eup %4486  ;;  %v2793_v1 = vadd.f32 %v4483_v10, %v2792_v33 }
 0x89e   :  { %v2812_v54 = vadd.f32 %v4485_v35, %v2811_v17  ;;  %v2829_v18 = vmul.f32 %v4487_v31, %v2827_v26  ;;  %v4489_v6 = vpop.eup %4488  ;;  %vm2834_vm12 = vweird.f32 %v4487_v31  ;;  %v2840_v61 = vor.u32 1.1754944e-38, %v2839_v36 }
 0x89f   :  { %v2797_v24 = vsel %vm2796_vm8, %v4483_v10, %v2793_v1  ;;  %v2837_v10 = vand.u32 2147483647, %v2827_v26  ;;  %vm2835_vm14 = vmor %vm2833_vm13, %vm2834_vm12 }
 0x8a0   :  { %v2802_v11 = vsel %vm2799_vm10, %v2801_v47, %v2797_v24  ;;  %v2816_v53 = vsel %vm2815_vm9, %v4485_v35, %v2812_v54  ;;  %v2830_v7 = vsub.f32 1.0, %v2829_v18 }
 0x8a1   :  { %v2821_v34 = vsel %vm2818_vm11, %v2820_v14, %v2816_v53  ;;  %v2844_v2 = vmul.f32 %v4489_v6, %v2802_v11  ;;  %vm2838_vm15 = vcmp.eq.f32.partialorder %v2837_v10, 8.507059e+37  ;;  %v6152_v6 = vld [vmem:[#allocation43_spill] sm:$0xff] }
 0x8a2   :  { %v2843_v3 = vmul.f32 %v2821_v34, %v5862_v56  ;;  %v2831_v42 = vmul.f32 %v4487_v31, %v2830_v7  ;;  %v6150_v56 = vld [vmem:[#allocation37_spill] sm:$0xff]  ;;  %v2114_v11 = vadd.f32 %v6152_v6, %v5768_v40 }
 0x8a3   :  { %v2027_v26 = vadd.f32 %v6150_v56, %v5758_v39 }
 0x8a4   :  { %v5906_v59 = vadd.f32 %v2844_v2, %v2843_v3  ;;  %v2832_v45 = vadd.f32 %v4487_v31, %v2831_v42 }
 0x8a6   :  { %4490 = vtanh.f32 %v5906_v59  ;;  %v2836_v49 = vsel %vm2835_vm14, %v4487_v31, %v2832_v45  ;;  %v2056_v31 = vadd.f32 %v6151_v15, %v5760_v23 }
 0x8a7   :  { %v2841_v33 = vsel %vm2838_vm15, %v2840_v61, %v2836_v49 }
 0x8ac   :  { %v4491_v35 = vpop.eup %4490 }
 0x8ad   :  { %v2847_v13 = vmul.f32 %v4491_v35, %v2841_v33 }
 0x8af   :  { %v2852_v17 = vpack.c.bf16 %v2847_v13, %v2847_v13  ;;  %v6153_v13 = vld [vmem:[#allocation40_spill] sm:$0xff] }
 0x8b1   :  { %2861 = vmatmul.bf16.vlgmr.msra.gmra.mxu0 %v2852_v17  ;;  %2874 = vmatmul.bf16.vlgmr.msra.gmra.mxu1 %v2852_v17 }
 0x8b2   :  { %2887 = vmatmul.bf16.vlgmr.msra.gmra.mxu2 %v2852_v17  ;;  %2900 = vmatmul.bf16.vlgmr.msra.gmra.mxu3 %v2852_v17  ;;  %v2085_v17 = vadd.f32 %v6153_v13, %v6140_v60 }
 0x8b3   :  { %3101 = vmatpush.bf16.msra.mxu0 %v5473_v38  ;;  %3114 = vmatpush.bf16.msra.mxu1 %v5475_v20 }
 0x8b4   :  { %3127 = vmatpush.bf16.msra.mxu2 %v5480_v32  ;;  %3140 = vmatpush.bf16.msra.mxu3 %v5477_v21 }
 0x8b7   :  { %3102 = vmatpush.bf16.msra.mxu0 %v5486_v52  ;;  %3115 = vmatpush.bf16.msra.mxu1 %v5491_v4 }
 0x8b8   :  { %3128 = vmatpush.bf16.msra.mxu2 %v5502_v62  ;;  %3141 = vmatpush.bf16.msra.mxu3 %v5500_v27 }
 0x8bb   :  { %3103 = vmatpush.bf16.msra.mxu0 %v5506_v57  ;;  %3116 = vmatpush.bf16.msra.mxu1 %v5508_v29 }
 0x8bc   :  { %3129 = vmatpush.bf16.msra.mxu2 %v5541_v22  ;;  %3142 = vmatpush.bf16.msra.mxu3 %v5514_v58 }
 0x8bf   :  { %3104 = vmatpush.bf16.msra.mxu0 %v5520_v16  ;;  %3117 = vmatpush.bf16.msra.mxu1 %v5522_v55 }
 0x8c0   :  { %3130 = vmatpush.bf16.msra.mxu2 %v5562_v28  ;;  %3143 = vmatpush.bf16.msra.mxu3 %v5539_v9 }
 0x8c3   :  { %3105 = vmatpush.bf16.msra.mxu0 %v5551_v44  ;;  %3118 = vmatpush.bf16.msra.mxu1 %v5558_v12 }
 0x8c4   :  { %3131 = vmatpush.bf16.msra.mxu2 %v5591_v41  ;;  %3144 = vmatpush.bf16.msra.mxu3 %v5560_v63 }
 0x8c7   :  { %3106 = vmatpush.bf16.msra.mxu0 %v5583_v5  ;;  %3119 = vmatpush.bf16.msra.mxu1 %v5589_v37 }
 0x8c8   :  { %3132 = vmatpush.bf16.msra.mxu2 %v5612_v51  ;;  %3145 = vmatpush.bf16.msra.mxu3 %v5599_v0 }
 0x8cb   :  { %3107 = vmatpush.bf16.msra.mxu0 %v5606_v48  ;;  %3120 = vmatpush.bf16.msra.mxu1 %v5610_v43 }
 0x8cc   :  { %3133 = vmatpush.bf16.msra.mxu2 %v5629_v46  ;;  %3146 = vmatpush.bf16.msra.mxu3 %v5615_v19 }
 0x8cf   :  { %3108 = vmatpush.bf16.msra.mxu0 %v5621_v30  ;;  %3121 = vmatpush.bf16.msra.mxu1 %v5627_v25 }
 0x8d0   :  { %3134 = vmatpush.bf16.msra.mxu2 %v5638_v50  ;;  %3147 = vmatpush.bf16.msra.mxu3 %v5632_v8 }
 0x92e   :  { %v2862_v1 = vpop.f32.mrf.mxu0  ;;  %v2875_v47 = vpop.f32.mrf.mxu1 }
 0x92f   :  { %v2905_v54 = vadd.f32 %v2862_v1, %v2027_v26  ;;  %v2906_v18 = vadd.f32 %v2875_v47, %v2056_v31 }
 0x931   :  { %v4093_v14 = vmul.f32 -1.442695, %v2905_v54  ;;  %v4094_v24 = vmul.f32 -1.442695, %v2906_v18 }
 0x933   :  { %4492 = vpow2.f32 %v4093_v14 }
 0x934   :  { %4494 = vpow2.f32 %v4094_v24 }
 0x935   :  { %v2888_v53 = vpop.f32.mrf.mxu2  ;;  %v2901_v7 = vpop.f32.mrf.mxu3 }
 0x936   :  { %v2908_v34 = vadd.f32 %v2901_v7, %v2114_v11  ;;  %v2864_v2 = vpop.f32.mrf.mxu0  ;;  %v2877_v3 = vpop.f32.mrf.mxu1  ;;  %v2907_v15 = vadd.f32 %v2888_v53, %v2085_v17 }
 0x938   :  { %v4095_v42 = vmul.f32 -1.442695, %v2908_v34 }
 0x939   :  { %v4493_v45 = vpop.eup %4492 }
 0x93a   :  { %v4495_v36 = vpop.eup %4494  ;;  %v2912_v10 = vadd.f32 1.0, %v4493_v45  ;;  %4496 = vpow2.f32 %v4095_v42 }
 0x93b   :  { %v2931_v49 = vadd.f32 1.0, %v4495_v36 }
 0x93c   :  { %4498 = vrcp.f32 %v2912_v10  ;;  %v2924_v14 = vand.u32 2147483648, %v2912_v10  ;;  %v2922_v11 = vand.u32 2147483647, %v2912_v10  ;;  %vm2918_vm2 = vweird.f32 %v2912_v10 }
 0x93d   :  { %4500 = vrcp.f32 %v2931_v49  ;;  %v2890_v61 = vpop.f32.mrf.mxu2  ;;  %v2903_v35 = vpop.f32.mrf.mxu3  ;;  %v2943_v24 = vand.u32 2147483648, %v2931_v49  ;;  %v2941_v34 = vand.u32 2147483647, %v2931_v49  ;;  %vm2937_vm3 = vweird.f32 %v2931_v49 }
 0x93e   :  { %v2925_v53 = vor.u32 1.1754944e-38, %v2924_v14  ;;  %vm2923_vm6 = vcmp.eq.f32.partialorder %v2922_v11, 8.507059e+37 }
 0x93f   :  { %v2944_v36 = vor.u32 1.1754944e-38, %v2943_v24  ;;  %vm2942_vm7 = vcmp.eq.f32.partialorder %v2941_v34, 8.507059e+37 }
 0x940   :  { %v4497_v33 = vpop.eup %4496 }
 0x941   :  { %v2951_v56 = vadd.f32 1.0, %v4497_v33 }
 0x942   :  { %v4499_v26 = vpop.eup %4498 }
 0x943   :  { %v4501_v31 = vpop.eup %4500  ;;  %v2914_v1 = vmul.f32 %v4499_v26, %v2912_v10  ;;  %4502 = vrcp.f32 %v2951_v56  ;;  %vm2919_vm0 = vweird.f32 %v4499_v26  ;;  %vm2957_vm9 = vweird.f32 %v2951_v56 }
 0x944   :  { %v2933_v47 = vmul.f32 %v4501_v31, %v2931_v49  ;;  %4504 = vtanh.f32 %v2907_v15  ;;  %vm2938_vm1 = vweird.f32 %v4501_v31  ;;  %vm2920_vm4 = vmor %vm2918_vm2, %vm2919_vm0 }
 0x945   :  { %v2915_v54 = vsub.f32 1.0, %v2914_v1  ;;  %vm2939_vm5 = vmor %vm2937_vm3, %vm2938_vm1 }
 0x946   :  { %v2934_v18 = vsub.f32 1.0, %v2933_v47 }
 0x947   :  { %v2916_v6 = vmul.f32 %v4499_v26, %v2915_v54 }
 0x948   :  { %v2935_v7 = vmul.f32 %v4501_v31, %v2934_v18  ;;  %v2963_v18 = vand.u32 2147483648, %v2951_v56 }
 0x949   :  { %v4503_v2 = vpop.eup %4502  ;;  %v2917_v3 = vadd.f32 %v4499_v26, %v2916_v6 }
 0x94a   :  { %v2936_v42 = vadd.f32 %v4501_v31, %v2935_v7  ;;  %v2953_v45 = vmul.f32 %v4503_v2, %v2951_v56  ;;  %v4505_v35 = vpop.eup %4504  ;;  %vm2958_vm8 = vweird.f32 %v4503_v2  ;;  %v2964_v24 = vor.u32 1.1754944e-38, %v2963_v18 }
 0x94b   :  { %v2921_v61 = vsel %vm2920_vm4, %v4499_v26, %v2917_v3  ;;  %v2961_v26 = vand.u32 2147483647, %v2951_v56  ;;  %vm2959_vm10 = vmor %vm2957_vm9, %vm2958_vm8 }
 0x94c   :  { %v2926_v33 = vsel %vm2923_vm6, %v2925_v53, %v2921_v61  ;;  %v2940_v13 = vsel %vm2939_vm5, %v4501_v31, %v2936_v42  ;;  %v2954_v17 = vsub.f32 1.0, %v2953_v45 }
 0x94d   :  { %v2945_v15 = vsel %vm2942_vm7, %v2944_v36, %v2940_v13  ;;  %v2968_v1 = vmul.f32 %v4505_v35, %v2926_v33  ;;  %vm2962_vm11 = vcmp.eq.f32.partialorder %v2961_v26, 8.507059e+37 }
 0x94e   :  { %v2967_v47 = vmul.f32 %v2945_v15, %v5906_v59  ;;  %v2955_v54 = vmul.f32 %v4503_v2, %v2954_v17 }
 0x950   :  { %v5950_v10 = vadd.f32 %v2968_v1, %v2967_v47  ;;  %v2956_v49 = vadd.f32 %v4503_v2, %v2955_v54 }
 0x952   :  { %4506 = vtanh.f32 %v5950_v10  ;;  %v2960_v14 = vsel %vm2959_vm10, %v4503_v2, %v2956_v49 }
 0x953   :  { %v2965_v6 = vsel %vm2962_vm11, %v2964_v24, %v2960_v14 }
 0x958   :  { %v4507_v31 = vpop.eup %4506 }
 0x959   :  { %v2971_v11 = vmul.f32 %v4507_v31, %v2965_v6 }
 0x95b   :  { %v2976_v7 = vpack.c.bf16 %v2971_v11, %v2971_v11 }
 0x95d   :  { %2985 = vmatmul.bf16.vlgmr.msrb.gmra.mxu0 %v2976_v7  ;;  %2998 = vmatmul.bf16.vlgmr.msrb.gmra.mxu1 %v2976_v7 }
 0x95e   :  { %3011 = vmatmul.bf16.vlgmr.msrb.gmra.mxu2 %v2976_v7  ;;  %3024 = vmatmul.bf16.vlgmr.msrb.gmra.mxu3 %v2976_v7 }
 0x95f   :  { %3225 = vmatpush.bf16.msrb.mxu0 %v5473_v38  ;;  %3238 = vmatpush.bf16.msrb.mxu1 %v5475_v20  ;;  %v6154_v38 = vld [vmem:[#allocation41_spill] sm:$0xff] }
 0x960   :  { %3251 = vmatpush.bf16.msrb.mxu2 %v5480_v32  ;;  %3264 = vmatpush.bf16.msrb.mxu3 %v5477_v21  ;;  %v2029_v20 = vadd.f32 %v6154_v38, %v5758_v39  ;;  %v6155_v21 = vld [vmem:[#allocation42_spill] sm:$0xff] }
 0x961   :  { %v2058_v32 = vadd.f32 %v6155_v21, %v5760_v23 }
 0x963   :  { %3226 = vmatpush.bf16.msrb.mxu0 %v5486_v52  ;;  %3239 = vmatpush.bf16.msrb.mxu1 %v5491_v4 }
 0x964   :  { %3252 = vmatpush.bf16.msrb.mxu2 %v5502_v62  ;;  %3265 = vmatpush.bf16.msrb.mxu3 %v5500_v27 }
 0x967   :  { %3227 = vmatpush.bf16.msrb.mxu0 %v5506_v57  ;;  %3240 = vmatpush.bf16.msrb.mxu1 %v5508_v29 }
 0x968   :  { %3253 = vmatpush.bf16.msrb.mxu2 %v5541_v22  ;;  %3266 = vmatpush.bf16.msrb.mxu3 %v5514_v58  ;;  %v6156_v58 = vld [vmem:[#allocation46_spill] sm:$0xff] }
 0x96b   :  { %3228 = vmatpush.bf16.msrb.mxu0 %v5520_v16  ;;  %3241 = vmatpush.bf16.msrb.mxu1 %v5522_v55  ;;  %v2116_v16 = vadd.f32 %v6156_v58, %v5768_v40 }
 0x96c   :  { %3254 = vmatpush.bf16.msrb.mxu2 %v5562_v28  ;;  %3267 = vmatpush.bf16.msrb.mxu3 %v5539_v9 }
 0x96f   :  { %3229 = vmatpush.bf16.msrb.mxu0 %v5551_v44  ;;  %3242 = vmatpush.bf16.msrb.mxu1 %v5558_v12 }
 0x970   :  { %3255 = vmatpush.bf16.msrb.mxu2 %v5591_v41  ;;  %3268 = vmatpush.bf16.msrb.mxu3 %v5560_v63 }
 0x973   :  { %3230 = vmatpush.bf16.msrb.mxu0 %v5583_v5  ;;  %3243 = vmatpush.bf16.msrb.mxu1 %v5589_v37 }
 0x974   :  { %3256 = vmatpush.bf16.msrb.mxu2 %v5612_v51  ;;  %3269 = vmatpush.bf16.msrb.mxu3 %v5599_v0  ;;  %v6157_v51 = vld [vmem:[#allocation44_spill] sm:$0xff] }
 0x977   :  { %3231 = vmatpush.bf16.msrb.mxu0 %v5606_v48  ;;  %3244 = vmatpush.bf16.msrb.mxu1 %v5610_v43 }
 0x978   :  { %3257 = vmatpush.bf16.msrb.mxu2 %v5629_v46  ;;  %3270 = vmatpush.bf16.msrb.mxu3 %v5615_v19  ;;  %v2087_v19 = vadd.f32 %v6157_v51, %v6140_v60 }
 0x97b   :  { %3232 = vmatpush.bf16.msrb.mxu0 %v5621_v30  ;;  %3245 = vmatpush.bf16.msrb.mxu1 %v5627_v25 }
 0x97c   :  { %3258 = vmatpush.bf16.msrb.mxu2 %v5638_v50  ;;  %3271 = vmatpush.bf16.msrb.mxu3 %v5632_v8 }
 0x9da   :  { %v2986_v52 = vpop.f32.mrf.mxu0  ;;  %v2999_v4 = vpop.f32.mrf.mxu1 }
 0x9db   :  { %v3029_v27 = vadd.f32 %v2986_v52, %v2029_v20  ;;  %v3030_v62 = vadd.f32 %v2999_v4, %v2058_v32 }
 0x9dd   :  { %v4096_v57 = vmul.f32 -1.442695, %v3029_v27  ;;  %v4097_v29 = vmul.f32 -1.442695, %v3030_v62 }
 0x9df   :  { %4508 = vpow2.f32 %v4096_v57  ;;  %v6159_v57 = vld [vmem:[#allocation47_spill] sm:$0xff] }
 0x9e0   :  { %4510 = vpow2.f32 %v4097_v29  ;;  %v2061_v29 = vadd.f32 %v6159_v57, %v5760_v23 }
 0x9e1   :  { %v3012_v55 = vpop.f32.mrf.mxu2  ;;  %v3025_v9 = vpop.f32.mrf.mxu3 }
 0x9e2   :  { %v3032_v22 = vadd.f32 %v3025_v9, %v2116_v16  ;;  %v2988_v44 = vpop.f32.mrf.mxu0  ;;  %v3001_v12 = vpop.f32.mrf.mxu1  ;;  %v3031_v46 = vadd.f32 %v3012_v55, %v2087_v19 }
 0x9e3   :  { %v6160_v12 = vld [vmem:[#allocation51_spill] sm:$0xff] }
 0x9e4   :  { %v4098_v63 = vmul.f32 -1.442695, %v3032_v22 }
 0x9e5   :  { %v4509_v28 = vpop.eup %4508 }
 0x9e6   :  { %v4511_v5 = vpop.eup %4510  ;;  %v3036_v37 = vadd.f32 1.0, %v4509_v28  ;;  %4512 = vpow2.f32 %v4098_v63  ;;  %v2119_v63 = vadd.f32 %v6160_v12, %v5768_v40  ;;  %v6162_v12 = vld [vmem:[#allocation49_spill] sm:$0xff] }
 0x9e7   :  { %v3055_v41 = vadd.f32 1.0, %v4511_v5 }
 0x9e8   :  { %4514 = vrcp.f32 %v3036_v37  ;;  %v3048_v2 = vand.u32 2147483648, %v3036_v37  ;;  %v3046_v42 = vand.u32 2147483647, %v3036_v37  ;;  %vm3042_vm14 = vweird.f32 %v3036_v37 }
 0x9e9   :  { %4516 = vrcp.f32 %v3055_v41  ;;  %v3014_v0 = vpop.f32.mrf.mxu2  ;;  %v3027_v48 = vpop.f32.mrf.mxu3  ;;  %v3067_v3 = vand.u32 2147483648, %v3055_v41  ;;  %v3065_v36 = vand.u32 2147483647, %v3055_v41  ;;  %vm3061_vm15 = vweird.f32 %v3055_v41 }
 0x9ea   :  { %v3049_v33 = vor.u32 1.1754944e-38, %v3048_v2  ;;  %vm3047_vm2 = vcmp.eq.f32.partialorder %v3046_v42, 8.507059e+37 }
 0x9eb   :  { %v3068_v15 = vor.u32 1.1754944e-38, %v3067_v3  ;;  %vm3066_vm3 = vcmp.eq.f32.partialorder %v3065_v36, 8.507059e+37 }
 0x9ec   :  { %v4513_v43 = vpop.eup %4512 }
 0x9ed   :  { %v3075_v30 = vadd.f32 1.0, %v4513_v43 }
 0x9ee   :  { %v4515_v25 = vpop.eup %4514 }
 0x9ef   :  { %v4517_v8 = vpop.eup %4516  ;;  %v3038_v50 = vmul.f32 %v4515_v25, %v3036_v37  ;;  %4518 = vrcp.f32 %v3075_v30  ;;  %vm3043_vm12 = vweird.f32 %v4515_v25  ;;  %v3087_v7 = vand.u32 2147483648, %v3075_v30 }
 0x9f0   :  { %v3057_v59 = vmul.f32 %v4517_v8, %v3055_v41  ;;  %4520 = vtanh.f32 %v3031_v46  ;;  %vm3062_vm13 = vweird.f32 %v4517_v8  ;;  %vm3044_vm0 = vmor %vm3042_vm14, %vm3043_vm12  ;;  %vm3081_vm5 = vweird.f32 %v3075_v30 }
 0x9f1   :  { %v3039_v56 = vsub.f32 1.0, %v3038_v50  ;;  %vm3063_vm1 = vmor %vm3061_vm15, %vm3062_vm13  ;;  %v3085_v38 = vand.u32 2147483647, %v3075_v30  ;;  %v3088_v21 = vor.u32 1.1754944e-38, %v3087_v7  ;;  %v6161_v50 = vld [vmem:[#allocation48_spill] sm:$0xff] }
 0x9f2   :  { %v3058_v34 = vsub.f32 1.0, %v3057_v59  ;;  %v2090_v59 = vadd.f32 %v6161_v50, %v6140_v60 }
 0x9f3   :  { %v3040_v53 = vmul.f32 %v4515_v25, %v3039_v56  ;;  %vm3086_vm7 = vcmp.eq.f32.partialorder %v3085_v38, 8.507059e+37 }
 0x9f4   :  { %v3059_v45 = vmul.f32 %v4517_v8, %v3058_v34 }
 0x9f5   :  { %v4519_v61 = vpop.eup %4518  ;;  %v3041_v35 = vadd.f32 %v4515_v25, %v3040_v53 }
 0x9f6   :  { %v3060_v13 = vadd.f32 %v4517_v8, %v3059_v45  ;;  %v3077_v17 = vmul.f32 %v4519_v61, %v3075_v30  ;;  %v4521_v47 = vpop.eup %4520  ;;  %vm3082_vm4 = vweird.f32 %v4519_v61 }
 0x9f7   :  { %v3045_v1 = vsel %vm3044_vm0, %v4515_v25, %v3041_v35  ;;  %vm3083_vm6 = vmor %vm3081_vm5, %vm3082_vm4 }
 0x9f8   :  { %v3050_v54 = vsel %vm3047_vm2, %v3049_v33, %v3045_v1  ;;  %v3064_v49 = vsel %vm3063_vm1, %v4517_v8, %v3060_v13  ;;  %v3078_v18 = vsub.f32 1.0, %v3077_v17 }
 0x9f9   :  { %v3069_v26 = vsel %vm3066_vm3, %v3068_v15, %v3064_v49  ;;  %v3092_v14 = vmul.f32 %v4521_v47, %v3050_v54 }
 0x9fa   :  { %v3091_v24 = vmul.f32 %v3069_v26, %v5950_v10  ;;  %v3079_v31 = vmul.f32 %v4519_v61, %v3078_v18  ;;  %v6158_v10 = vld [vmem:[#allocation45_spill] sm:$0xff] }
 0x9fb   :  { %v2032_v62 = vadd.f32 %v6158_v10, %v5758_v39 }
 0x9fc   :  { %v5994_v6 = vadd.f32 %v3092_v14, %v3091_v24  ;;  %v3080_v11 = vadd.f32 %v4519_v61, %v3079_v31 }
 0x9fe   :  { %4522 = vtanh.f32 %v5994_v6  ;;  %v3084_v20 = vsel %vm3083_vm6, %v4519_v61, %v3080_v11 }
 0x9ff   :  { %v3089_v52 = vsel %vm3086_vm7, %v3088_v21, %v3084_v20 }
 0xa04   :  { %v4523_v32 = vpop.eup %4522 }
 0xa05   :  { %v3095_v4 = vmul.f32 %v4523_v32, %v3089_v52 }
 0xa07   :  { %v3100_v27 = vpack.c.bf16 %v3095_v4, %v3095_v4 }
 0xa09   :  { %3109 = vmatmul.bf16.vlgmr.msra.gmra.mxu0 %v3100_v27  ;;  %3122 = vmatmul.bf16.vlgmr.msra.gmra.mxu1 %v3100_v27 }
 0xa0a   :  { %3135 = vmatmul.bf16.vlgmr.msra.gmra.mxu2 %v3100_v27  ;;  %3148 = vmatmul.bf16.vlgmr.msra.gmra.mxu3 %v3100_v27 }
 0xa86   :  { %v3110_v58 = vpop.f32.mrf.mxu0  ;;  %v3123_v16 = vpop.f32.mrf.mxu1 }
 0xa87   :  { %v3153_v55 = vadd.f32 %v3110_v58, %v2032_v62  ;;  %v3154_v9 = vadd.f32 %v3123_v16, %v2061_v29 }
 0xa89   :  { %v4099_v22 = vmul.f32 -1.442695, %v3153_v55  ;;  %v4100_v44 = vmul.f32 -1.442695, %v3154_v9  ;;  %v4280_v9 = vld [vmem:[#allocation16 + $0x30] sm:$0xff] }
 0xa8b   :  { %4524 = vpow2.f32 %v4099_v22  ;;  %v4279_v22 = vld [vmem:[#allocation16 + $0x28] sm:$0xff] }
 0xa8c   :  { %4526 = vpow2.f32 %v4100_v44  ;;  %v4278_v44 = vld [vmem:[#allocation16 + $0x20] sm:$0xff] }
 0xa8d   :  { %v3136_v28 = vpop.f32.mrf.mxu2  ;;  %v3149_v5 = vpop.f32.mrf.mxu3 }
 0xa8e   :  { %v3156_v37 = vadd.f32 %v3149_v5, %v2119_v63  ;;  %v3112_v41 = vpop.f32.mrf.mxu0  ;;  %v3125_v0 = vpop.f32.mrf.mxu1  ;;  %v3155_v2 = vadd.f32 %v3136_v28, %v2090_v59  ;;  %v2034_v63 = vadd.f32 %v6162_v12, %v5758_v39  ;;  %v6163_v28 = vld [vmem:[#allocation50_spill] sm:$0xff] }
 0xa8f   :  { %v2063_v5 = vadd.f32 %v6163_v28, %v5760_v23 }
 0xa90   :  { %v4101_v48 = vmul.f32 -1.442695, %v3156_v37  ;;  %v4277_v37 = vld [vmem:[#allocation16 + $0x18] sm:$0xff] }
 0xa91   :  { %v4525_v43 = vpop.eup %4524 }
 0xa92   :  { %v4527_v51 = vpop.eup %4526  ;;  %v3160_v19 = vadd.f32 1.0, %v4525_v43  ;;  %4528 = vpow2.f32 %v4101_v48 }
 0xa93   :  { %v3179_v30 = vadd.f32 1.0, %v4527_v51 }
 0xa94   :  { %4530 = vrcp.f32 %v3160_v19  ;;  %v3172_v61 = vand.u32 2147483648, %v3160_v19  ;;  %v3170_v13 = vand.u32 2147483647, %v3160_v19  ;;  %vm3166_vm10 = vweird.f32 %v3160_v19 }
 0xa95   :  { %4532 = vrcp.f32 %v3179_v30  ;;  %v3138_v25 = vpop.f32.mrf.mxu2  ;;  %v3151_v46 = vpop.f32.mrf.mxu3  ;;  %v3191_v35 = vand.u32 2147483648, %v3179_v30  ;;  %v3189_v15 = vand.u32 2147483647, %v3179_v30  ;;  %vm3185_vm11 = vweird.f32 %v3179_v30 }
 0xa96   :  { %v3173_v54 = vor.u32 1.1754944e-38, %v3172_v61  ;;  %vm3171_vm14 = vcmp.eq.f32.partialorder %v3170_v13, 8.507059e+37  ;;  %v4275_v25 = vld [vmem:[#allocation16 + $0x8] sm:$0xff]  ;;  %v6164_v46 = vld [vmem:[#allocation54_spill] sm:$0xff] }
 0xa97   :  { %v3192_v26 = vor.u32 1.1754944e-38, %v3191_v35  ;;  %vm3190_vm15 = vcmp.eq.f32.partialorder %v3189_v15, 8.507059e+37  ;;  %v6165_v35 = vld [vmem:[#allocation52_spill] sm:$0xff] }
 0xa98   :  { %v4529_v8 = vpop.eup %4528 }
 0xa99   :  { %v3199_v56 = vadd.f32 1.0, %v4529_v8  ;;  %v2121_v8 = vadd.f32 %v6164_v46, %v5768_v40 }
 0xa9a   :  { %v4531_v34 = vpop.eup %4530 }
 0xa9b   :  { %v4533_v3 = vpop.eup %4532  ;;  %v3162_v53 = vmul.f32 %v4531_v34, %v3160_v19  ;;  %4534 = vrcp.f32 %v3199_v56  ;;  %vm3167_vm8 = vweird.f32 %v4531_v34  ;;  %v3211_v27 = vand.u32 2147483648, %v3199_v56 }
 0xa9c   :  { %v3181_v42 = vmul.f32 %v4533_v3, %v3179_v30  ;;  %4536 = vtanh.f32 %v3155_v2  ;;  %vm3186_vm9 = vweird.f32 %v4533_v3  ;;  %vm3168_vm12 = vmor %vm3166_vm10, %vm3167_vm8  ;;  %vm3205_vm1 = vweird.f32 %v3199_v56  ;;  %v4276_v30 = vld [vmem:[#allocation16 + $0x10] sm:$0xff] }
 0xa9d   :  { %v3163_v45 = vsub.f32 1.0, %v3162_v53  ;;  %vm3187_vm13 = vmor %vm3185_vm11, %vm3186_vm9  ;;  %v3209_v10 = vand.u32 2147483647, %v3199_v56  ;;  %v3212_v57 = vor.u32 1.1754944e-38, %v3211_v27 }
 0xa9e   :  { %v3182_v36 = vsub.f32 1.0, %v3181_v42 }
 0xa9f   :  { %v3164_v33 = vmul.f32 %v4531_v34, %v3163_v45  ;;  %vm3210_vm3 = vcmp.eq.f32.partialorder %v3209_v10, 8.507059e+37 }
 0xaa0   :  { %v3183_v17 = vmul.f32 %v4533_v3, %v3182_v36 }
 0xaa1   :  { %v4535_v1 = vpop.eup %4534  ;;  %v3165_v47 = vadd.f32 %v4531_v34, %v3164_v33  ;;  %v2092_v33 = vadd.f32 %v6165_v35, %v6140_v60 }
 0xaa2   :  { %v3184_v49 = vadd.f32 %v4533_v3, %v3183_v17  ;;  %v3201_v18 = vmul.f32 %v4535_v1, %v3199_v56  ;;  %v4537_v24 = vpop.eup %4536  ;;  %vm3206_vm0 = vweird.f32 %v4535_v1 }
 0xaa3   :  { %v3169_v14 = vsel %vm3168_vm12, %v4531_v34, %v3165_v47  ;;  %vm3207_vm2 = vmor %vm3205_vm1, %vm3206_vm0  ;;  %v4274_v34 = vld [vmem:[#allocation16] sm:$0xff] }
 0xaa4   :  { %v3174_v31 = vsel %vm3171_vm14, %v3173_v54, %v3169_v14  ;;  %v3188_v11 = vsel %vm3187_vm13, %v4533_v3, %v3184_v49  ;;  %v3202_v7 = vsub.f32 1.0, %v3201_v18 }
 0xaa5   :  { %v3193_v38 = vsel %vm3190_vm15, %v3192_v26, %v3188_v11  ;;  %v3216_v20 = vmul.f32 %v4537_v24, %v3174_v31 }
 0xaa6   :  { %v3215_v21 = vmul.f32 %v3193_v38, %v5994_v6  ;;  %v3203_v32 = vmul.f32 %v4535_v1, %v3202_v7  ;;  %v4281_v6 = vld [vmem:[#allocation16 + $0x38] sm:$0xff] }
 0xaa7   :  { %3417 = vmatpush.bf16.msra.mxu0 %v4281_v6 }
 0xaa8   :  { %v6006_v52 = vadd.f32 %v3216_v20, %v3215_v21  ;;  %v3204_v4 = vadd.f32 %v4535_v1, %v3203_v32 }
 0xaaa   :  { %4538 = vtanh.f32 %v6006_v52  ;;  %v3208_v62 = vsel %vm3207_vm2, %v4535_v1, %v3204_v4 }
 0xaab   :  { %v3213_v58 = vsel %vm3210_vm3, %v3212_v57, %v3208_v62  ;;  %3418 = vmatpush.bf16.msra.mxu0 %v4280_v9 }
 0xaaf   :  { %3419 = vmatpush.bf16.msra.mxu0 %v4279_v22 }
 0xab0   :  { %v4539_v29 = vpop.eup %4538 }
 0xab1   :  { %v3219_v16 = vmul.f32 %v4539_v29, %v3213_v58 }
 0xab3   :  { %v3224_v55 = vpack.c.bf16 %v3219_v16, %v3219_v16  ;;  %3420 = vmatpush.bf16.msra.mxu0 %v4278_v44 }
 0xab5   :  { %3233 = vmatmul.bf16.vlgmr.msrb.gmra.mxu0 %v3224_v55  ;;  %3246 = vmatmul.bf16.vlgmr.msrb.gmra.mxu1 %v3224_v55 }
 0xab6   :  { %3259 = vmatmul.bf16.vlgmr.msrb.gmra.mxu2 %v3224_v55  ;;  %3272 = vmatmul.bf16.vlgmr.msrb.gmra.mxu3 %v3224_v55 }
 0xab7   :  { %3421 = vmatpush.bf16.msra.mxu0 %v4277_v37 }
 0xabb   :  { %3422 = vmatpush.bf16.msra.mxu0 %v4276_v30 }
 0xabf   :  { %3423 = vmatpush.bf16.msra.mxu0 %v4275_v25 }
 0xac3   :  { %3424 = vmatpush.bf16.msra.mxu0 %v4274_v34 }
 0xb32   :  { %v3234_v41 = vpop.f32.mrf.mxu0  ;;  %v3247_v0 = vpop.f32.mrf.mxu1 }
 0xb33   :  { %v3277_v48 = vadd.f32 %v3234_v41, %v2034_v63  ;;  %v3278_v43 = vadd.f32 %v3247_v0, %v2063_v5 }
 0xb35   :  { %v4102_v51 = vmul.f32 -1.442695, %v3277_v48  ;;  %v4103_v19 = vmul.f32 -1.442695, %v3278_v43 }
 0xb37   :  { %4540 = vpow2.f32 %v4102_v51 }
 0xb38   :  { %4542 = vpow2.f32 %v4103_v19 }
 0xb39   :  { %v3260_v39 = vpop.f32.mrf.mxu2  ;;  %v3273_v50 = vpop.f32.mrf.mxu3 }
 0xb3a   :  { %v3280_v59 = vadd.f32 %v3273_v50, %v2121_v8  ;;  %v3236_v23 = vpop.f32.mrf.mxu0  ;;  %v3249_v56 = vpop.f32.mrf.mxu1  ;;  %v3279_v15 = vadd.f32 %v3260_v39, %v2092_v33 }
 0xb3c   :  { %v4104_v2 = vmul.f32 -1.442695, %v3280_v59 }
 0xb3d   :  { %v4541_v3 = vpop.eup %4540 }
 0xb3e   :  { %v4543_v53 = vpop.eup %4542  ;;  %v3284_v42 = vadd.f32 1.0, %v4541_v3  ;;  %4544 = vpow2.f32 %v4104_v2 }
 0xb3f   :  { %v3303_v45 = vadd.f32 1.0, %v4543_v53 }
 0xb40   :  { %4546 = vrcp.f32 %v3284_v42  ;;  %v3296_v26 = vand.u32 2147483648, %v3284_v42  ;;  %v3294_v31 = vand.u32 2147483647, %v3284_v42  ;;  %vm3290_vm6 = vweird.f32 %v3284_v42 }
 0xb41   :  { %4548 = vrcp.f32 %v3303_v45  ;;  %v3262_v36 = vpop.f32.mrf.mxu2  ;;  %v3275_v61 = vpop.f32.mrf.mxu3  ;;  %v3315_v14 = vand.u32 2147483648, %v3303_v45  ;;  %v3313_v7 = vand.u32 2147483647, %v3303_v45  ;;  %vm3309_vm7 = vweird.f32 %v3303_v45 }
 0xb42   :  { %v3297_v20 = vor.u32 1.1754944e-38, %v3296_v26  ;;  %vm3295_vm10 = vcmp.eq.f32.partialorder %v3294_v31, 8.507059e+37 }
 0xb43   :  { %v3316_v4 = vor.u32 1.1754944e-38, %v3315_v14  ;;  %vm3314_vm11 = vcmp.eq.f32.partialorder %v3313_v7, 8.507059e+37 }
 0xb44   :  { %v4545_v40 = vpop.eup %4544 }
 0xb45   :  { %v3323_v13 = vadd.f32 1.0, %v4545_v40 }
 0xb46   :  { %v4547_v17 = vpop.eup %4546 }
 0xb47   :  { %v4549_v1 = vpop.eup %4548  ;;  %v3286_v47 = vmul.f32 %v4547_v17, %v3284_v42  ;;  %4550 = vrcp.f32 %v3323_v13  ;;  %vm3291_vm4 = vweird.f32 %v4547_v17  ;;  %v3335_v44 = vand.u32 2147483648, %v3323_v13 }
 0xb48   :  { %v3305_v54 = vmul.f32 %v4549_v1, %v3303_v45  ;;  %4552 = vtanh.f32 %v3279_v15  ;;  %vm3310_vm5 = vweird.f32 %v4549_v1  ;;  %vm3292_vm8 = vmor %vm3290_vm6, %vm3291_vm4  ;;  %vm3329_vm13 = vweird.f32 %v3323_v13 }
 0xb49   :  { %v3287_v49 = vsub.f32 1.0, %v3286_v47  ;;  %vm3311_vm9 = vmor %vm3309_vm7, %vm3310_vm5  ;;  %v3333_v12 = vand.u32 2147483647, %v3323_v13  ;;  %v3336_v28 = vor.u32 1.1754944e-38, %v3335_v44 }
 0xb4a   :  { %v3306_v18 = vsub.f32 1.0, %v3305_v54 }
 0xb4b   :  { %v3288_v24 = vmul.f32 %v4547_v17, %v3287_v49  ;;  %vm3334_vm15 = vcmp.eq.f32.partialorder %v3333_v12, 8.507059e+37 }
 0xb4c   :  { %v3307_v11 = vmul.f32 %v4549_v1, %v3306_v18 }
 0xb4d   :  { %v4551_v38 = vpop.eup %4550  ;;  %v3289_v60 = vadd.f32 %v4547_v17, %v3288_v24 }
 0xb4e   :  { %v3308_v21 = vadd.f32 %v4549_v1, %v3307_v11  ;;  %v3325_v32 = vmul.f32 %v4551_v38, %v3323_v13  ;;  %v4553_v10 = vpop.eup %4552  ;;  %vm3330_vm12 = vweird.f32 %v4551_v38 }
 0xb4f   :  { %v3293_v27 = vsel %vm3292_vm8, %v4547_v17, %v3289_v60  ;;  %vm3331_vm14 = vmor %vm3329_vm13, %vm3330_vm12 }
 0xb50   :  { %v3298_v62 = vsel %vm3295_vm10, %v3297_v20, %v3293_v27  ;;  %v3312_v57 = vsel %vm3311_vm9, %v4549_v1, %v3308_v21  ;;  %v3326_v29 = vsub.f32 1.0, %v3325_v32 }
 0xb51   :  { %v3317_v58 = vsel %vm3314_vm11, %v3316_v4, %v3312_v57  ;;  %v3340_v16 = vmul.f32 %v4553_v10, %v3298_v62 }
 0xb52   :  { %v3339_v55 = vmul.f32 %v3317_v58, %v6006_v52  ;;  %v3327_v6 = vmul.f32 %v4551_v38, %v3326_v29  ;;  %v4299_v52 = vld [vmem:[%s6044_s8] ss:$0 sm:$0xff]  ;;  %s3483_s8 = sshll.u32 %s6047_s11, 4  ;;  %s3484_s8 = int_to_ptr.hbm [resolvable:$true] %s3483_s8 }
 0xb54   :  { %v3341_v9 = vadd.f32 %v3340_v16, %v3339_v55  ;;  %v3328_v22 = vadd.f32 %v4551_v38, %v3327_v6 }
 0xb56   :  { %4554 = vtanh.f32 %v3341_v9  ;;  %3347 = vst [vmem:[#allocation19 + $0x8] sm:$0xff] %v3341_v9  ;;  %v3332_v63 = vsel %vm3331_vm14, %v4551_v38, %v3328_v22 }
 0xb57   :  { %v3337_v37 = vsel %vm3334_vm15, %v3336_v28, %v3332_v63  ;;  %3475 = dma.vmem_to_hbm [thread:$0]  %s3468_s20, 256, %s3470_s18, [#allocation20], %s4843_s16, %s4843_s16, %s4844_s17  }
 0xb5c   :  { %v4555_v5 = vpop.eup %4554 }
 0xb5d   :  { %v3343_v41 = vmul.f32 %v4555_v5, %v3337_v37 }
 0xb5f   :  { %v3348_v0 = vpack.c.bf16 %v3343_v41, %v3343_v41  ;;  %3345 = vst [vmem:[#allocation18 + $0x8] sm:$0xff] %v3343_v41 }
 0xb60   :  { %3462 = dma.vmem_to_hbm [thread:$0]  %s3455_s22, 256, %s3457_s0, [#allocation6], %s4843_s16, %s4843_s16, %s4844_s17  }
 0xb61   :  { %3425 = vmatmul.bf16.vlgmr.msra.gmra.mxu0 %v3348_v0  ;;  %s3481_s16 = sshll.u32 %s4854_s9, 4  ;;  %s3482_s16 = int_to_ptr.vmem [resolvable:$true] %s3481_s16 }
 0xbde   :  { %v3426_v48 = vpop.f32.mrf.mxu0 }
 0xbdf   :  { %v3427_v43 = vadd.f32 %v4299_v52, %v3426_v48 }
 0xbe1   :  { %v4137_v51 = vmul.f32 -1.442695, %v3427_v43 }
 0xbe3   :  { %4556 = vpow2.f32 %v4137_v51 }
 0xbe6   :  { %v3428_v19 = vpop.f32.mrf.mxu0 }
 0xbe9   :  { %v4557_v30 = vpop.eup %4556 }
 0xbea   :  { %v3433_v25 = vadd.f32 1.0, %v4557_v30 }
 0xbec   :  { %4558 = vrcp.f32 %v3433_v25  ;;  %v3445_v50 = vand.u32 2147483648, %v3433_v25  ;;  %v3443_v23 = vand.u32 2147483647, %v3433_v25  ;;  %vm3439_vm1 = vweird.f32 %v3433_v25 }
 0xbee   :  { %v3446_v34 = vor.u32 1.1754944e-38, %v3445_v50  ;;  %vm3444_vm3 = vcmp.eq.f32.partialorder %v3443_v23, 8.507059e+37 }
 0xbf2   :  { %v4559_v46 = vpop.eup %4558 }
 0xbf3   :  { %v3435_v8 = vmul.f32 %v4559_v46, %v3433_v25  ;;  %vm3440_vm0 = vweird.f32 %v4559_v46 }
 0xbf4   :  { %vm3441_vm2 = vmor %vm3439_vm1, %vm3440_vm0 }
 0xbf5   :  { %v3436_v39 = vsub.f32 1.0, %v3435_v8 }
 0xbf7   :  { %v3437_v59 = vmul.f32 %v4559_v46, %v3436_v39 }
 0xbf9   :  { %v3438_v56 = vadd.f32 %v4559_v46, %v3437_v59 }
 0xbfb   :  { %v3442_v2 = vsel %vm3441_vm2, %v4559_v46, %v3438_v56 }
 0xbfc   :  { %v3447_v3 = vsel %vm3444_vm3, %v3446_v34, %v3442_v2 }
 0xbfd   :  { %3449 = vst [vmem:[#allocation21] sm:$0xff] %v3447_v3 }
 0xbfe   :  { %3486 = dma.vmem_to_hbm [thread:$0]  %s3482_s16, 128, %s3484_s8, [#allocation20]  }
 0xbff   :  { %4834 = dma.done.wait [#allocation6], 256  }
 0xc00   :  { %4835 = vsyncadd [#allocation6], 4294967040 }
 0xc01   :  { %4836 = dma.done.wait [#allocation20], 384  }
 0xc02   :  { %4837 = vsyncadd [#allocation20], 4294966912 }
 0xc03   :  { %3499 = vsyncpa [#allocation5], 1 }
 0xc04   :  { %3500 = vsyncpa [#allocation8], 1 }
 0xc05   :  { %3501 = vsyncpa [#allocation11], 1 }
 0xc06   :  { %3502 = vsyncpa [#allocation14], 1 }
 0xc07   :  { %3503 = vsyncpa [#allocation17], 1 }
 0xc08   :  { %3504 = vsyncpa [#allocation6], 1 }
 0xc09   :  { %3505 = vsyncpa [#allocation20], 1 }

</bundles_post_ra>
